<compile_context>
chip_gen: v7x
topology: tpu7x:2x2x1
jax: 0.10.0
libtpu: 0.0.40
codegen_flags: <defaults>
</compile_context>

<pallas_src>
import functools
import math

import jax
import jax.numpy as jnp
from jax import lax
from jax.experimental import pallas as pl
from jax.experimental.pallas import tpu as pltpu


# -----------------------------------------------------------------------------
# Model config (small synthetic BERT)
# -----------------------------------------------------------------------------
VOCAB = 128
MAX_POS = 8
HIDDEN = 128
N_HEADS = 2
HEAD_DIM = HIDDEN // N_HEADS
INTERMEDIATE = 256
N_LAYERS = 2
N_CLASSES = 4
LANE = 128              # lane-padded classifier output width


# -----------------------------------------------------------------------------
# In-kernel helpers (operate on loaded VMEM values)
# -----------------------------------------------------------------------------
def _layernorm(h, g, b, eps=1e-12):
    mu = jnp.mean(h, axis=-1, keepdims=True)
    var = jnp.mean((h - mu) ** 2, axis=-1, keepdims=True)
    return (h - mu) * lax.rsqrt(var + eps) * g + b


def _gelu_tanh(y):
    # tanh approximation -> EUP slot (vs erf polynomial on the VPU)
    c = math.sqrt(2.0 / math.pi)
    return 0.5 * y * (1.0 + jnp.tanh(c * (y + 0.044715 * (y * y * y))))


def _mm(x_bf16, w, b_f32):
    # bf16 MXU operands (caller casts the activation exactly once), f32 accum
    return jnp.dot(x_bf16, w, preferred_element_type=jnp.float32) + b_f32


# -----------------------------------------------------------------------------
# One fused mega-kernel for the whole forward pass
# -----------------------------------------------------------------------------
def _biobert_fwd_kernel(
    ids_ref,                       # (B*S, 1)     int32  token ids
    bias_ref,                      # (B*S, B*S)   f32    block-diag + pad bias
    word_emb_ref,                  # (VOCAB, H)   f32
    pos_type_ref,                  # (S, H)       f32    pos + token-type emb
    emb_g_ref, emb_b_ref,          # (1, H)       f32
    wqkv_ref, bqkv_ref,            # (L, H, 5H)   bf16 / (L, 1, 5H) f32
    wo_ref, bo_ref,                # (L, H, H)    bf16 / (L, 1, H)  f32
    ln1_g_ref, ln1_b_ref,          # (L, 1, H)    f32
    wi_ref, bi_ref,                # (L, H, I)    bf16 / (L, 1, I)  f32
    wo2_ref, bo2_ref,              # (L, I, H)    bf16 / (L, 1, H)  f32
    ln2_g_ref, ln2_b_ref,          # (L, 1, H)    f32
    pool_w_ref, pool_b_ref,        # (H, H) bf16 / (1, H) f32
    head_w_ref, head_b_ref,        # (H, H) bf16 / (1, H) f32
    cls_w_ref, cls_b_ref,          # (H, LANE) bf16 / (1, LANE) f32  (padded)
    out_ref,                       # (B, LANE)    f32   lane-dense logits
    *, batch, seq, n_heads, head_dim, n_layers, vocab,
):
    H = n_heads * head_dim
    M = batch * seq
    scale = 1.0 / math.sqrt(head_dim)

    # ---- embeddings: word-id gather fused as a one-hot MXU matmul (f32) ----
    onehot = (ids_ref[...] ==
              lax.broadcasted_iota(jnp.int32, (M, vocab), 1)).astype(jnp.float32)
    xw = jnp.dot(onehot, word_emb_ref[...], preferred_element_type=jnp.float32)
    x = (xw.reshape(batch, seq, H) + pos_type_ref[...]).reshape(M, H)
    x = _layernorm(x, emb_g_ref[...], emb_b_ref[...])            # (B*S, H) f32

    # additive attention bias (block-diag over batches + key padding), 1 KiB
    attn_bias = bias_ref[...]                                    # (M, M) f32

    # ---- encoder layers (statically unrolled over L=2) ----
    for l in range(n_layers):
        xb = x.astype(jnp.bfloat16)          # cast activation once per layer
        # fused projection: [ Q | K_h0 | K_h1 | V_h0 | V_h1 ]  ->  (M, 5H)
        qkv = _mm(xb, wqkv_ref[l], bqkv_ref[l])
        q_bf = qkv[:, 0:H].astype(jnp.bfloat16)

        ctx = None
        for h in range(n_heads):
            # whole-vreg, 128-lane-aligned column blocks (no 64-lane slicing);
            # the other head's lanes are exactly zero by weight construction.
            k_bf = qkv[:, (1 + h) * H:(2 + h) * H].astype(jnp.bfloat16)
            v_bf = qkv[:, (1 + n_heads + h) * H:
                        (2 + n_heads + h) * H].astype(jnp.bfloat16)
            # scores over ALL flattened rows at once (cross-batch pairs masked)
            s = lax.dot_general(q_bf, k_bf, (((1,), (1,)), ((), ())),
                                preferred_element_type=jnp.float32)   # (M, M)
            s = s * scale + attn_bias
            s = s - jnp.max(s, axis=-1, keepdims=True)
            p = jnp.exp(s)
            p = p * pl.reciprocal(jnp.sum(p, axis=-1, keepdims=True),
                                  approx=True)
            c = jnp.dot(p.astype(jnp.bfloat16), v_bf,
                        preferred_element_type=jnp.float32)           # (M, H)
            ctx = c if ctx is None else ctx + c   # per-head lanes are disjoint

        # attention output projection + residual + LayerNorm (fused epilogue)
        x = _layernorm(_mm(ctx.astype(jnp.bfloat16), wo_ref[l], bo_ref[l]) + x,
                       ln1_g_ref[l], ln1_b_ref[l])

        # FFN: GELU(x @ wi + bi) @ wo2 + bo2, + residual + LayerNorm
        ff = _gelu_tanh(_mm(x.astype(jnp.bfloat16), wi_ref[l], bi_ref[l]))
        x = _layernorm(_mm(ff.astype(jnp.bfloat16), wo2_ref[l], bo2_ref[l]) + x,
                       ln2_g_ref[l], ln2_b_ref[l])

    # ---- BERT pooler: tanh(Linear(hidden_state[:, 0])) ----
    cls = x.reshape(batch, seq, H)[:, 0, :]                      # (B, H)
    pooled = jnp.tanh(_mm(cls.astype(jnp.bfloat16),
                          pool_w_ref[...], pool_b_ref[...]))

    # ---- classification head (dropout = identity in eval mode) ----
    hidden = jnp.maximum(
        _mm(pooled.astype(jnp.bfloat16), head_w_ref[...], head_b_ref[...]), 0.0)
    # lane-dense (B, 128) store; wrapper slices to num_classes
    out_ref[...] = _mm(hidden.astype(jnp.bfloat16),
                       cls_w_ref[...], cls_b_ref[...])


# -----------------------------------------------------------------------------
# Deterministic parameter construction (stacked per-layer weights, bf16 MXU ops)
# -----------------------------------------------------------------------------
def _init_params(key):
    W = jnp.bfloat16  # MXU-operand dtype

    def nrm(k, shape, dtype=jnp.float32):
        return (0.02 * jax.random.normal(k, shape)).astype(dtype)

    keys = iter(jax.random.split(key, 64))

    head_of_col = jnp.arange(HIDDEN) // HEAD_DIM                 # (H,)

    def head_masked(w, h):
        # zero every output column that does not belong to head h
        keep = (head_of_col == h).astype(w.dtype)
        return w * keep[None, None, :]

    wq = nrm(next(keys), (N_LAYERS, HIDDEN, HIDDEN))
    wk = nrm(next(keys), (N_LAYERS, HIDDEN, HIDDEN))
    wv = nrm(next(keys), (N_LAYERS, HIDDEN, HIDDEN))
    bq = jnp.zeros((N_LAYERS, 1, HIDDEN), jnp.float32)
    bk = jnp.zeros((N_LAYERS, 1, HIDDEN), jnp.float32)
    bv = jnp.zeros((N_LAYERS, 1, HIDDEN), jnp.float32)

    # Fused projection weight [ Q | K_h0 | K_h1 | V_h0 | V_h1 ]: per-head K/V
    # copies with the other head's output columns zeroed, so the kernel never
    # slices 64-lane head blocks out of a vreg.
    wqkv = jnp.concatenate(
        [wq]
        + [head_masked(wk, h) for h in range(N_HEADS)]
        + [head_masked(wv, h) for h in range(N_HEADS)], axis=2).astype(W)
    bqkv = jnp.concatenate(
        [bq]
        + [head_masked(bk, h) for h in range(N_HEADS)]
        + [head_masked(bv, h) for h in range(N_HEADS)], axis=2)

    p = {
        "word_emb": nrm(next(keys), (VOCAB, HIDDEN)),
        "pos_emb": nrm(next(keys), (MAX_POS, HIDDEN)),
        "type_emb": nrm(next(keys), (2, HIDDEN)),
        "emb_ln_g": jnp.ones((1, HIDDEN), jnp.float32),
        "emb_ln_b": jnp.zeros((1, HIDDEN), jnp.float32),
        "wqkv": wqkv, "bqkv": bqkv,
        "wo":   nrm(next(keys), (N_LAYERS, HIDDEN, HIDDEN), W),
        "bo":   jnp.zeros((N_LAYERS, 1, HIDDEN), jnp.float32),
        "ln1_g": jnp.ones((N_LAYERS, 1, HIDDEN), jnp.float32),
        "ln1_b": jnp.zeros((N_LAYERS, 1, HIDDEN), jnp.float32),
        "wi":   nrm(next(keys), (N_LAYERS, HIDDEN, INTERMEDIATE), W),
        "bi":   jnp.zeros((N_LAYERS, 1, INTERMEDIATE), jnp.float32),
        "wo2":  nrm(next(keys), (N_LAYERS, INTERMEDIATE, HIDDEN), W),
        "bo2":  jnp.zeros((N_LAYERS, 1, HIDDEN), jnp.float32),
        "ln2_g": jnp.ones((N_LAYERS, 1, HIDDEN), jnp.float32),
        "ln2_b": jnp.zeros((N_LAYERS, 1, HIDDEN), jnp.float32),
        "pool_w": nrm(next(keys), (HIDDEN, HIDDEN), W),
        "pool_b": jnp.zeros((1, HIDDEN), jnp.float32),
        "head_w": nrm(next(keys), (HIDDEN, HIDDEN), W),
        "head_b": jnp.zeros((1, HIDDEN), jnp.float32),
    }
    # classifier weight zero-padded from (H, 4) to (H, 128) for lane-dense stores
    cls_w = nrm(next(keys), (HIDDEN, N_CLASSES), W)
    p["cls_w_padded"] = (jnp.zeros((HIDDEN, LANE), W)
                         .at[:, :N_CLASSES].set(cls_w))
    p["cls_b_padded"] = jnp.zeros((1, LANE), jnp.float32)
    return p


# -----------------------------------------------------------------------------
# Forward pass: everything (including the embedding lookup) in one kernel
# -----------------------------------------------------------------------------
def biobert_classifier_forward(params, input_ids, attention_mask):
    B, S = input_ids.shape
    M = B * S

    ids2d = input_ids.reshape(M, 1).astype(jnp.int32)
    # tiny (M, M) additive bias: block-diagonal across batches + key padding
    bid = jnp.repeat(jnp.arange(B), S)                              # (M,)
    same_batch = bid[:, None] == bid[None, :]
    key_ok = attention_mask.reshape(M).astype(bool)
    attn_bias = jnp.where(same_batch & key_ok[None, :],
                          0.0, -1e9).astype(jnp.float32)            # (M, M)
    # position + token-type (type 0) embeddings, no gather HLO needed
    pos_type = (params["pos_emb"][:S]
                + params["type_emb"][0][None, :]).astype(jnp.float32)

    kern = functools.partial(
        _biobert_fwd_kernel,
        batch=B, seq=S, n_heads=N_HEADS, head_dim=HEAD_DIM,
        n_layers=N_LAYERS, vocab=VOCAB)

    padded_logits = pl.pallas_call(
        kern,
        out_shape=jax.ShapeDtypeStruct((B, LANE), jnp.float32),
        compiler_params=pltpu.CompilerParams(vmem_limit_bytes=8 * 1024 * 1024),
    )(
        ids2d, attn_bias,
        params["word_emb"], pos_type,
        params["emb_ln_g"], params["emb_ln_b"],
        params["wqkv"], params["bqkv"],
        params["wo"], params["bo"],
        params["ln1_g"], params["ln1_b"],
        params["wi"], params["bi"],
        params["wo2"], params["bo2"],
        params["ln2_g"], params["ln2_b"],
        params["pool_w"], params["pool_b"],
        params["head_w"], params["head_b"],
        params["cls_w_padded"], params["cls_b_padded"],
    )
    return padded_logits[:, :N_CLASSES]            # (B, num_classes)


# -----------------------------------------------------------------------------
if __name__ == "__main__":
    key = jax.random.PRNGKey(0)
    pkey, ikey = jax.random.split(key)

    params = _init_params(pkey)

    B, S = 2, MAX_POS
    input_ids = jax.random.randint(ikey, (B, S), 0, VOCAB, dtype=jnp.int32)
    attention_mask = jnp.ones((B, S), dtype=jnp.int32)
    attention_mask = attention_mask.at[1, -2:].set(0)   # pad last two tokens of row 1

    fwd = jax.jit(biobert_classifier_forward)
    logits = jax.block_until_ready(fwd(params, input_ids, attention_mask))

    assert logits.shape == (B, N_CLASSES)
    assert bool(jnp.all(jnp.isfinite(logits)))
    print("KERNEL_OK")
</pallas_src>

<mosaic_0001>
module attributes {stable_mosaic.version = 11 : i64} {
  func.func @_biobert_fwd_kernel(%arg0: memref<16x1xi32, #tpu.memory_space<vmem>>, %arg1: memref<16x16xf32, #tpu.memory_space<vmem>>, %arg2: memref<128x128xf32, #tpu.memory_space<vmem>>, %arg3: memref<8x128xf32, #tpu.memory_space<vmem>>, %arg4: memref<1x128xf32, #tpu.memory_space<vmem>>, %arg5: memref<1x128xf32, #tpu.memory_space<vmem>>, %arg6: memref<2x128x640xbf16, #tpu.memory_space<vmem>>, %arg7: memref<2x1x640xf32, #tpu.memory_space<vmem>>, %arg8: memref<2x128x128xbf16, #tpu.memory_space<vmem>>, %arg9: memref<2x1x128xf32, #tpu.memory_space<vmem>>, %arg10: memref<2x1x128xf32, #tpu.memory_space<vmem>>, %arg11: memref<2x1x128xf32, #tpu.memory_space<vmem>>, %arg12: memref<2x128x256xbf16, #tpu.memory_space<vmem>>, %arg13: memref<2x1x256xf32, #tpu.memory_space<vmem>>, %arg14: memref<2x256x128xbf16, #tpu.memory_space<vmem>>, %arg15: memref<2x1x128xf32, #tpu.memory_space<vmem>>, %arg16: memref<2x1x128xf32, #tpu.memory_space<vmem>>, %arg17: memref<2x1x128xf32, #tpu.memory_space<vmem>>, %arg18: memref<128x128xbf16, #tpu.memory_space<vmem>>, %arg19: memref<1x128xf32, #tpu.memory_space<vmem>>, %arg20: memref<128x128xbf16, #tpu.memory_space<vmem>>, %arg21: memref<1x128xf32, #tpu.memory_space<vmem>>, %arg22: memref<128x128xbf16, #tpu.memory_space<vmem>>, %arg23: memref<1x128xf32, #tpu.memory_space<vmem>>, %arg24: memref<2x128xf32, #tpu.memory_space<vmem>>) attributes {dimension_semantics = [], scalar_prefetch = 0 : i64, scratch_operands = 0 : i64, tpu.core_type = #tpu.core_type<tc>} {
    %c0 = arith.constant 0 : index
    %c0_0 = arith.constant 0 : index
    %0 = vector.load %arg0[%c0, %c0_0] : memref<16x1xi32, #tpu.memory_space<vmem>>, vector<16x1xi32>
    %1 = tpu.iota {dimensions = array<i32: 1>} : vector<16x128xi32>
    %2 = vector.broadcast %0 : vector<16x1xi32> to vector<16x128xi32>
    %3 = arith.cmpi eq, %2, %1 : vector<16x128xi32>
    %4 = arith.extui %3 : vector<16x128xi1> to vector<16x128xi32>
    %5 = arith.sitofp %4 : vector<16x128xi32> to vector<16x128xf32>
    %c0_1 = arith.constant 0 : index
    %c0_2 = arith.constant 0 : index
    %6 = vector.load %arg2[%c0_1, %c0_2] : memref<128x128xf32, #tpu.memory_space<vmem>>, vector<128x128xf32>
    %cst = arith.constant dense<0.000000e+00> : vector<16x128xf32>
    %7 = tpu.matmul %5, %6, %cst {dimension_numbers = #tpu.dot_dimension_numbers<[1], [0], [0], [1], [0, 0, 1, 1], [], []>} : vector<16x128xf32>, vector<128x128xf32>, vector<16x128xf32> -> vector<16x128xf32>
    %8 = vector.shape_cast %7 : vector<16x128xf32> to vector<2x8x128xf32>
    %c0_3 = arith.constant 0 : index
    %c0_4 = arith.constant 0 : index
    %9 = vector.load %arg3[%c0_3, %c0_4] : memref<8x128xf32, #tpu.memory_space<vmem>>, vector<8x128xf32>
    %10 = vector.shape_cast %9 : vector<8x128xf32> to vector<1x8x128xf32>
    %11 = vector.broadcast %10 : vector<1x8x128xf32> to vector<2x8x128xf32>
    %12 = arith.addf %8, %11 : vector<2x8x128xf32>
    %13 = vector.shape_cast %12 : vector<2x8x128xf32> to vector<16x128xf32>
    %c0_5 = arith.constant 0 : index
    %c0_6 = arith.constant 0 : index
    %14 = vector.load %arg4[%c0_5, %c0_6] : memref<1x128xf32, #tpu.memory_space<vmem>>, vector<1x128xf32>
    %c0_7 = arith.constant 0 : index
    %c0_8 = arith.constant 0 : index
    %15 = vector.load %arg5[%c0_7, %c0_8] : memref<1x128xf32, #tpu.memory_space<vmem>>, vector<1x128xf32>
    %cst_9 = arith.constant dense<0.000000e+00> : vector<16xf32>
    %16 = vector.multi_reduction <add>, %13, %cst_9 [1] : vector<16x128xf32> to vector<16xf32>
    %17 = vector.shape_cast %16 : vector<16xf32> to vector<16x1xf32>
    %cst_10 = arith.constant 1.280000e+02 : f32
    %18 = vector.broadcast %cst_10 : f32 to vector<16x1xf32>
    %19 = arith.divf %17, %18 : vector<16x1xf32>
    %20 = vector.broadcast %19 : vector<16x1xf32> to vector<16x128xf32>
    %21 = arith.subf %13, %20 : vector<16x128xf32>
    %22 = arith.mulf %21, %21 : vector<16x128xf32>
    %cst_11 = arith.constant dense<0.000000e+00> : vector<16xf32>
    %23 = vector.multi_reduction <add>, %22, %cst_11 [1] : vector<16x128xf32> to vector<16xf32>
    %24 = vector.shape_cast %23 : vector<16xf32> to vector<16x1xf32>
    %cst_12 = arith.constant 1.280000e+02 : f32
    %25 = vector.broadcast %cst_12 : f32 to vector<16x1xf32>
    %26 = arith.divf %24, %25 : vector<16x1xf32>
    %27 = vector.broadcast %19 : vector<16x1xf32> to vector<16x128xf32>
    %28 = arith.subf %13, %27 : vector<16x128xf32>
    %cst_13 = arith.constant 9.99999996E-13 : f32
    %29 = vector.broadcast %cst_13 : f32 to vector<16x1xf32>
    %30 = arith.addf %26, %29 : vector<16x1xf32>
    %31 = math.rsqrt %30 : vector<16x1xf32>
    %32 = vector.broadcast %31 : vector<16x1xf32> to vector<16x128xf32>
    %33 = arith.mulf %28, %32 : vector<16x128xf32>
    %34 = vector.broadcast %14 : vector<1x128xf32> to vector<16x128xf32>
    %35 = arith.mulf %33, %34 : vector<16x128xf32>
    %36 = vector.broadcast %15 : vector<1x128xf32> to vector<16x128xf32>
    %37 = arith.addf %35, %36 : vector<16x128xf32>
    %c0_14 = arith.constant 0 : index
    %c0_15 = arith.constant 0 : index
    %38 = vector.load %arg1[%c0_14, %c0_15] : memref<16x16xf32, #tpu.memory_space<vmem>>, vector<16x16xf32>
    %39 = arith.truncf %37 : vector<16x128xf32> to vector<16x128xbf16>
    %c0_16 = arith.constant 0 : index
    %c0_17 = arith.constant 0 : index
    %c0_18 = arith.constant 0 : index
    %40 = vector.load %arg6[%c0_16, %c0_17, %c0_18] : memref<2x128x640xbf16, #tpu.memory_space<vmem>>, vector<1x128x640xbf16>
    %41 = vector.shape_cast %40 : vector<1x128x640xbf16> to vector<128x640xbf16>
    %c0_19 = arith.constant 0 : index
    %c0_20 = arith.constant 0 : index
    %c0_21 = arith.constant 0 : index
    %42 = vector.load %arg7[%c0_19, %c0_20, %c0_21] : memref<2x1x640xf32, #tpu.memory_space<vmem>>, vector<1x1x640xf32>
    %43 = vector.shape_cast %42 : vector<1x1x640xf32> to vector<1x640xf32>
    %cst_22 = arith.constant dense<0.000000e+00> : vector<16x640xf32>
    %44 = tpu.matmul %39, %41, %cst_22 {dimension_numbers = #tpu.dot_dimension_numbers<[1], [0], [0], [1], [0, 0, 1, 1], [], []>} : vector<16x128xbf16>, vector<128x640xbf16>, vector<16x640xf32> -> vector<16x640xf32>
    %45 = vector.broadcast %43 : vector<1x640xf32> to vector<16x640xf32>
    %46 = arith.addf %44, %45 : vector<16x640xf32>
    %47 = vector.extract_strided_slice %46 {offsets = [0, 0], sizes = [16, 128], strides = [1, 1]} : vector<16x640xf32> to vector<16x128xf32>
    %48 = arith.truncf %47 : vector<16x128xf32> to vector<16x128xbf16>
    %49 = vector.extract_strided_slice %46 {offsets = [0, 128], sizes = [16, 128], strides = [1, 1]} : vector<16x640xf32> to vector<16x128xf32>
    %50 = arith.truncf %49 : vector<16x128xf32> to vector<16x128xbf16>
    %51 = vector.extract_strided_slice %46 {offsets = [0, 384], sizes = [16, 128], strides = [1, 1]} : vector<16x640xf32> to vector<16x128xf32>
    %52 = arith.truncf %51 : vector<16x128xf32> to vector<16x128xbf16>
    %cst_23 = arith.constant dense<0.000000e+00> : vector<16x16xf32>
    %53 = tpu.matmul %48, %50, %cst_23 {dimension_numbers = #tpu.dot_dimension_numbers<[1], [1], [0], [0], [0, 0, 1, 0], [], []>} : vector<16x128xbf16>, vector<16x128xbf16>, vector<16x16xf32> -> vector<16x16xf32>
    %cst_24 = arith.constant 1.250000e-01 : f32
    %54 = vector.broadcast %cst_24 : f32 to vector<16x16xf32>
    %55 = arith.mulf %53, %54 : vector<16x16xf32>
    %56 = arith.addf %55, %38 : vector<16x16xf32>
    %cst_25 = arith.constant dense<0xFF800000> : vector<16xf32>
    %57 = vector.multi_reduction <maximumf>, %56, %cst_25 [1] : vector<16x16xf32> to vector<16xf32>
    %58 = vector.shape_cast %57 : vector<16xf32> to vector<16x1xf32>
    %59 = vector.broadcast %58 : vector<16x1xf32> to vector<16x16xf32>
    %60 = arith.subf %56, %59 : vector<16x16xf32>
    %61 = math.exp %60 : vector<16x16xf32>
    %cst_26 = arith.constant dense<0.000000e+00> : vector<16xf32>
    %62 = vector.multi_reduction <add>, %61, %cst_26 [1] : vector<16x16xf32> to vector<16xf32>
    %63 = vector.shape_cast %62 : vector<16xf32> to vector<16x1xf32>
    %64 = tpu.reciprocal %63 {approx = true} : vector<16x1xf32> -> vector<16x1xf32>
    %65 = vector.broadcast %64 : vector<16x1xf32> to vector<16x16xf32>
    %66 = arith.mulf %61, %65 : vector<16x16xf32>
    %67 = arith.truncf %66 : vector<16x16xf32> to vector<16x16xbf16>
    %cst_27 = arith.constant dense<0.000000e+00> : vector<16x128xf32>
    %68 = tpu.matmul %67, %52, %cst_27 {dimension_numbers = #tpu.dot_dimension_numbers<[1], [0], [0], [1], [0, 0, 1, 1], [], []>} : vector<16x16xbf16>, vector<16x128xbf16>, vector<16x128xf32> -> vector<16x128xf32>
    %69 = vector.extract_strided_slice %46 {offsets = [0, 256], sizes = [16, 128], strides = [1, 1]} : vector<16x640xf32> to vector<16x128xf32>
    %70 = arith.truncf %69 : vector<16x128xf32> to vector<16x128xbf16>
    %71 = vector.extract_strided_slice %46 {offsets = [0, 512], sizes = [16, 128], strides = [1, 1]} : vector<16x640xf32> to vector<16x128xf32>
    %72 = arith.truncf %71 : vector<16x128xf32> to vector<16x128xbf16>
    %cst_28 = arith.constant dense<0.000000e+00> : vector<16x16xf32>
    %73 = tpu.matmul %48, %70, %cst_28 {dimension_numbers = #tpu.dot_dimension_numbers<[1], [1], [0], [0], [0, 0, 1, 0], [], []>} : vector<16x128xbf16>, vector<16x128xbf16>, vector<16x16xf32> -> vector<16x16xf32>
    %cst_29 = arith.constant 1.250000e-01 : f32
    %74 = vector.broadcast %cst_29 : f32 to vector<16x16xf32>
    %75 = arith.mulf %73, %74 : vector<16x16xf32>
    %76 = arith.addf %75, %38 : vector<16x16xf32>
    %cst_30 = arith.constant dense<0xFF800000> : vector<16xf32>
    %77 = vector.multi_reduction <maximumf>, %76, %cst_30 [1] : vector<16x16xf32> to vector<16xf32>
    %78 = vector.shape_cast %77 : vector<16xf32> to vector<16x1xf32>
    %79 = vector.broadcast %78 : vector<16x1xf32> to vector<16x16xf32>
    %80 = arith.subf %76, %79 : vector<16x16xf32>
    %81 = math.exp %80 : vector<16x16xf32>
    %cst_31 = arith.constant dense<0.000000e+00> : vector<16xf32>
    %82 = vector.multi_reduction <add>, %81, %cst_31 [1] : vector<16x16xf32> to vector<16xf32>
    %83 = vector.shape_cast %82 : vector<16xf32> to vector<16x1xf32>
    %84 = tpu.reciprocal %83 {approx = true} : vector<16x1xf32> -> vector<16x1xf32>
    %85 = vector.broadcast %84 : vector<16x1xf32> to vector<16x16xf32>
    %86 = arith.mulf %81, %85 : vector<16x16xf32>
    %87 = arith.truncf %86 : vector<16x16xf32> to vector<16x16xbf16>
    %cst_32 = arith.constant dense<0.000000e+00> : vector<16x128xf32>
    %88 = tpu.matmul %87, %72, %cst_32 {dimension_numbers = #tpu.dot_dimension_numbers<[1], [0], [0], [1], [0, 0, 1, 1], [], []>} : vector<16x16xbf16>, vector<16x128xbf16>, vector<16x128xf32> -> vector<16x128xf32>
    %89 = arith.addf %68, %88 : vector<16x128xf32>
    %90 = arith.truncf %89 : vector<16x128xf32> to vector<16x128xbf16>
    %c0_33 = arith.constant 0 : index
    %c0_34 = arith.constant 0 : index
    %c0_35 = arith.constant 0 : index
    %91 = vector.load %arg8[%c0_33, %c0_34, %c0_35] : memref<2x128x128xbf16, #tpu.memory_space<vmem>>, vector<1x128x128xbf16>
    %92 = vector.shape_cast %91 : vector<1x128x128xbf16> to vector<128x128xbf16>
    %c0_36 = arith.constant 0 : index
    %c0_37 = arith.constant 0 : index
    %c0_38 = arith.constant 0 : index
    %93 = vector.load %arg9[%c0_36, %c0_37, %c0_38] : memref<2x1x128xf32, #tpu.memory_space<vmem>>, vector<1x1x128xf32>
    %94 = vector.shape_cast %93 : vector<1x1x128xf32> to vector<1x128xf32>
    %cst_39 = arith.constant dense<0.000000e+00> : vector<16x128xf32>
    %95 = tpu.matmul %90, %92, %cst_39 {dimension_numbers = #tpu.dot_dimension_numbers<[1], [0], [0], [1], [0, 0, 1, 1], [], []>} : vector<16x128xbf16>, vector<128x128xbf16>, vector<16x128xf32> -> vector<16x128xf32>
    %96 = vector.broadcast %94 : vector<1x128xf32> to vector<16x128xf32>
    %97 = arith.addf %95, %96 : vector<16x128xf32>
    %98 = arith.addf %97, %37 : vector<16x128xf32>
    %c0_40 = arith.constant 0 : index
    %c0_41 = arith.constant 0 : index
    %c0_42 = arith.constant 0 : index
    %99 = vector.load %arg10[%c0_40, %c0_41, %c0_42] : memref<2x1x128xf32, #tpu.memory_space<vmem>>, vector<1x1x128xf32>
    %100 = vector.shape_cast %99 : vector<1x1x128xf32> to vector<1x128xf32>
    %c0_43 = arith.constant 0 : index
    %c0_44 = arith.constant 0 : index
    %c0_45 = arith.constant 0 : index
    %101 = vector.load %arg11[%c0_43, %c0_44, %c0_45] : memref<2x1x128xf32, #tpu.memory_space<vmem>>, vector<1x1x128xf32>
    %102 = vector.shape_cast %101 : vector<1x1x128xf32> to vector<1x128xf32>
    %cst_46 = arith.constant dense<0.000000e+00> : vector<16xf32>
    %103 = vector.multi_reduction <add>, %98, %cst_46 [1] : vector<16x128xf32> to vector<16xf32>
    %104 = vector.shape_cast %103 : vector<16xf32> to vector<16x1xf32>
    %cst_47 = arith.constant 1.280000e+02 : f32
    %105 = vector.broadcast %cst_47 : f32 to vector<16x1xf32>
    %106 = arith.divf %104, %105 : vector<16x1xf32>
    %107 = vector.broadcast %106 : vector<16x1xf32> to vector<16x128xf32>
    %108 = arith.subf %98, %107 : vector<16x128xf32>
    %109 = arith.mulf %108, %108 : vector<16x128xf32>
    %cst_48 = arith.constant dense<0.000000e+00> : vector<16xf32>
    %110 = vector.multi_reduction <add>, %109, %cst_48 [1] : vector<16x128xf32> to vector<16xf32>
    %111 = vector.shape_cast %110 : vector<16xf32> to vector<16x1xf32>
    %cst_49 = arith.constant 1.280000e+02 : f32
    %112 = vector.broadcast %cst_49 : f32 to vector<16x1xf32>
    %113 = arith.divf %111, %112 : vector<16x1xf32>
    %114 = vector.broadcast %106 : vector<16x1xf32> to vector<16x128xf32>
    %115 = arith.subf %98, %114 : vector<16x128xf32>
    %cst_50 = arith.constant 9.99999996E-13 : f32
    %116 = vector.broadcast %cst_50 : f32 to vector<16x1xf32>
    %117 = arith.addf %113, %116 : vector<16x1xf32>
    %118 = math.rsqrt %117 : vector<16x1xf32>
    %119 = vector.broadcast %118 : vector<16x1xf32> to vector<16x128xf32>
    %120 = arith.mulf %115, %119 : vector<16x128xf32>
    %121 = vector.broadcast %100 : vector<1x128xf32> to vector<16x128xf32>
    %122 = arith.mulf %120, %121 : vector<16x128xf32>
    %123 = vector.broadcast %102 : vector<1x128xf32> to vector<16x128xf32>
    %124 = arith.addf %122, %123 : vector<16x128xf32>
    %125 = arith.truncf %124 : vector<16x128xf32> to vector<16x128xbf16>
    %c0_51 = arith.constant 0 : index
    %c0_52 = arith.constant 0 : index
    %c0_53 = arith.constant 0 : index
    %126 = vector.load %arg12[%c0_51, %c0_52, %c0_53] : memref<2x128x256xbf16, #tpu.memory_space<vmem>>, vector<1x128x256xbf16>
    %127 = vector.shape_cast %126 : vector<1x128x256xbf16> to vector<128x256xbf16>
    %c0_54 = arith.constant 0 : index
    %c0_55 = arith.constant 0 : index
    %c0_56 = arith.constant 0 : index
    %128 = vector.load %arg13[%c0_54, %c0_55, %c0_56] : memref<2x1x256xf32, #tpu.memory_space<vmem>>, vector<1x1x256xf32>
    %129 = vector.shape_cast %128 : vector<1x1x256xf32> to vector<1x256xf32>
    %cst_57 = arith.constant dense<0.000000e+00> : vector<16x256xf32>
    %130 = tpu.matmul %125, %127, %cst_57 {dimension_numbers = #tpu.dot_dimension_numbers<[1], [0], [0], [1], [0, 0, 1, 1], [], []>} : vector<16x128xbf16>, vector<128x256xbf16>, vector<16x256xf32> -> vector<16x256xf32>
    %131 = vector.broadcast %129 : vector<1x256xf32> to vector<16x256xf32>
    %132 = arith.addf %130, %131 : vector<16x256xf32>
    %cst_58 = arith.constant 5.000000e-01 : f32
    %133 = vector.broadcast %cst_58 : f32 to vector<16x256xf32>
    %134 = arith.mulf %133, %132 : vector<16x256xf32>
    %135 = arith.mulf %132, %132 : vector<16x256xf32>
    %136 = arith.mulf %135, %132 : vector<16x256xf32>
    %cst_59 = arith.constant 4.471500e-02 : f32
    %137 = vector.broadcast %cst_59 : f32 to vector<16x256xf32>
    %138 = arith.mulf %137, %136 : vector<16x256xf32>
    %139 = arith.addf %132, %138 : vector<16x256xf32>
    %cst_60 = arith.constant 0.797884583 : f32
    %140 = vector.broadcast %cst_60 : f32 to vector<16x256xf32>
    %141 = arith.mulf %140, %139 : vector<16x256xf32>
    %142 = math.tanh %141 : vector<16x256xf32>
    %cst_61 = arith.constant 1.000000e+00 : f32
    %143 = vector.broadcast %cst_61 : f32 to vector<16x256xf32>
    %144 = arith.addf %143, %142 : vector<16x256xf32>
    %145 = arith.mulf %134, %144 : vector<16x256xf32>
    %146 = arith.truncf %145 : vector<16x256xf32> to vector<16x256xbf16>
    %c0_62 = arith.constant 0 : index
    %c0_63 = arith.constant 0 : index
    %c0_64 = arith.constant 0 : index
    %147 = vector.load %arg14[%c0_62, %c0_63, %c0_64] : memref<2x256x128xbf16, #tpu.memory_space<vmem>>, vector<1x256x128xbf16>
    %148 = vector.shape_cast %147 : vector<1x256x128xbf16> to vector<256x128xbf16>
    %c0_65 = arith.constant 0 : index
    %c0_66 = arith.constant 0 : index
    %c0_67 = arith.constant 0 : index
    %149 = vector.load %arg15[%c0_65, %c0_66, %c0_67] : memref<2x1x128xf32, #tpu.memory_space<vmem>>, vector<1x1x128xf32>
    %150 = vector.shape_cast %149 : vector<1x1x128xf32> to vector<1x128xf32>
    %cst_68 = arith.constant dense<0.000000e+00> : vector<16x128xf32>
    %151 = tpu.matmul %146, %148, %cst_68 {dimension_numbers = #tpu.dot_dimension_numbers<[1], [0], [0], [1], [0, 0, 1, 1], [], []>} : vector<16x256xbf16>, vector<256x128xbf16>, vector<16x128xf32> -> vector<16x128xf32>
    %152 = vector.broadcast %150 : vector<1x128xf32> to vector<16x128xf32>
    %153 = arith.addf %151, %152 : vector<16x128xf32>
    %154 = arith.addf %153, %124 : vector<16x128xf32>
    %c0_69 = arith.constant 0 : index
    %c0_70 = arith.constant 0 : index
    %c0_71 = arith.constant 0 : index
    %155 = vector.load %arg16[%c0_69, %c0_70, %c0_71] : memref<2x1x128xf32, #tpu.memory_space<vmem>>, vector<1x1x128xf32>
    %156 = vector.shape_cast %155 : vector<1x1x128xf32> to vector<1x128xf32>
    %c0_72 = arith.constant 0 : index
    %c0_73 = arith.constant 0 : index
    %c0_74 = arith.constant 0 : index
    %157 = vector.load %arg17[%c0_72, %c0_73, %c0_74] : memref<2x1x128xf32, #tpu.memory_space<vmem>>, vector<1x1x128xf32>
    %158 = vector.shape_cast %157 : vector<1x1x128xf32> to vector<1x128xf32>
    %cst_75 = arith.constant dense<0.000000e+00> : vector<16xf32>
    %159 = vector.multi_reduction <add>, %154, %cst_75 [1] : vector<16x128xf32> to vector<16xf32>
    %160 = vector.shape_cast %159 : vector<16xf32> to vector<16x1xf32>
    %cst_76 = arith.constant 1.280000e+02 : f32
    %161 = vector.broadcast %cst_76 : f32 to vector<16x1xf32>
    %162 = arith.divf %160, %161 : vector<16x1xf32>
    %163 = vector.broadcast %162 : vector<16x1xf32> to vector<16x128xf32>
    %164 = arith.subf %154, %163 : vector<16x128xf32>
    %165 = arith.mulf %164, %164 : vector<16x128xf32>
    %cst_77 = arith.constant dense<0.000000e+00> : vector<16xf32>
    %166 = vector.multi_reduction <add>, %165, %cst_77 [1] : vector<16x128xf32> to vector<16xf32>
    %167 = vector.shape_cast %166 : vector<16xf32> to vector<16x1xf32>
    %cst_78 = arith.constant 1.280000e+02 : f32
    %168 = vector.broadcast %cst_78 : f32 to vector<16x1xf32>
    %169 = arith.divf %167, %168 : vector<16x1xf32>
    %170 = vector.broadcast %162 : vector<16x1xf32> to vector<16x128xf32>
    %171 = arith.subf %154, %170 : vector<16x128xf32>
    %cst_79 = arith.constant 9.99999996E-13 : f32
    %172 = vector.broadcast %cst_79 : f32 to vector<16x1xf32>
    %173 = arith.addf %169, %172 : vector<16x1xf32>
    %174 = math.rsqrt %173 : vector<16x1xf32>
    %175 = vector.broadcast %174 : vector<16x1xf32> to vector<16x128xf32>
    %176 = arith.mulf %171, %175 : vector<16x128xf32>
    %177 = vector.broadcast %156 : vector<1x128xf32> to vector<16x128xf32>
    %178 = arith.mulf %176, %177 : vector<16x128xf32>
    %179 = vector.broadcast %158 : vector<1x128xf32> to vector<16x128xf32>
    %180 = arith.addf %178, %179 : vector<16x128xf32>
    %181 = arith.truncf %180 : vector<16x128xf32> to vector<16x128xbf16>
    %c1 = arith.constant 1 : index
    %c0_80 = arith.constant 0 : index
    %c0_81 = arith.constant 0 : index
    %182 = vector.load %arg6[%c1, %c0_80, %c0_81] : memref<2x128x640xbf16, #tpu.memory_space<vmem>>, vector<1x128x640xbf16>
    %183 = vector.shape_cast %182 : vector<1x128x640xbf16> to vector<128x640xbf16>
    %c1_82 = arith.constant 1 : index
    %c0_83 = arith.constant 0 : index
    %c0_84 = arith.constant 0 : index
    %184 = vector.load %arg7[%c1_82, %c0_83, %c0_84] : memref<2x1x640xf32, #tpu.memory_space<vmem>>, vector<1x1x640xf32>
    %185 = vector.shape_cast %184 : vector<1x1x640xf32> to vector<1x640xf32>
    %cst_85 = arith.constant dense<0.000000e+00> : vector<16x640xf32>
    %186 = tpu.matmul %181, %183, %cst_85 {dimension_numbers = #tpu.dot_dimension_numbers<[1], [0], [0], [1], [0, 0, 1, 1], [], []>} : vector<16x128xbf16>, vector<128x640xbf16>, vector<16x640xf32> -> vector<16x640xf32>
    %187 = vector.broadcast %185 : vector<1x640xf32> to vector<16x640xf32>
    %188 = arith.addf %186, %187 : vector<16x640xf32>
    %189 = vector.extract_strided_slice %188 {offsets = [0, 0], sizes = [16, 128], strides = [1, 1]} : vector<16x640xf32> to vector<16x128xf32>
    %190 = arith.truncf %189 : vector<16x128xf32> to vector<16x128xbf16>
    %191 = vector.extract_strided_slice %188 {offsets = [0, 128], sizes = [16, 128], strides = [1, 1]} : vector<16x640xf32> to vector<16x128xf32>
    %192 = arith.truncf %191 : vector<16x128xf32> to vector<16x128xbf16>
    %193 = vector.extract_strided_slice %188 {offsets = [0, 384], sizes = [16, 128], strides = [1, 1]} : vector<16x640xf32> to vector<16x128xf32>
    %194 = arith.truncf %193 : vector<16x128xf32> to vector<16x128xbf16>
    %cst_86 = arith.constant dense<0.000000e+00> : vector<16x16xf32>
    %195 = tpu.matmul %190, %192, %cst_86 {dimension_numbers = #tpu.dot_dimension_numbers<[1], [1], [0], [0], [0, 0, 1, 0], [], []>} : vector<16x128xbf16>, vector<16x128xbf16>, vector<16x16xf32> -> vector<16x16xf32>
    %cst_87 = arith.constant 1.250000e-01 : f32
    %196 = vector.broadcast %cst_87 : f32 to vector<16x16xf32>
    %197 = arith.mulf %195, %196 : vector<16x16xf32>
    %198 = arith.addf %197, %38 : vector<16x16xf32>
    %cst_88 = arith.constant dense<0xFF800000> : vector<16xf32>
    %199 = vector.multi_reduction <maximumf>, %198, %cst_88 [1] : vector<16x16xf32> to vector<16xf32>
    %200 = vector.shape_cast %199 : vector<16xf32> to vector<16x1xf32>
    %201 = vector.broadcast %200 : vector<16x1xf32> to vector<16x16xf32>
    %202 = arith.subf %198, %201 : vector<16x16xf32>
    %203 = math.exp %202 : vector<16x16xf32>
    %cst_89 = arith.constant dense<0.000000e+00> : vector<16xf32>
    %204 = vector.multi_reduction <add>, %203, %cst_89 [1] : vector<16x16xf32> to vector<16xf32>
    %205 = vector.shape_cast %204 : vector<16xf32> to vector<16x1xf32>
    %206 = tpu.reciprocal %205 {approx = true} : vector<16x1xf32> -> vector<16x1xf32>
    %207 = vector.broadcast %206 : vector<16x1xf32> to vector<16x16xf32>
    %208 = arith.mulf %203, %207 : vector<16x16xf32>
    %209 = arith.truncf %208 : vector<16x16xf32> to vector<16x16xbf16>
    %cst_90 = arith.constant dense<0.000000e+00> : vector<16x128xf32>
    %210 = tpu.matmul %209, %194, %cst_90 {dimension_numbers = #tpu.dot_dimension_numbers<[1], [0], [0], [1], [0, 0, 1, 1], [], []>} : vector<16x16xbf16>, vector<16x128xbf16>, vector<16x128xf32> -> vector<16x128xf32>
    %211 = vector.extract_strided_slice %188 {offsets = [0, 256], sizes = [16, 128], strides = [1, 1]} : vector<16x640xf32> to vector<16x128xf32>
    %212 = arith.truncf %211 : vector<16x128xf32> to vector<16x128xbf16>
    %213 = vector.extract_strided_slice %188 {offsets = [0, 512], sizes = [16, 128], strides = [1, 1]} : vector<16x640xf32> to vector<16x128xf32>
    %214 = arith.truncf %213 : vector<16x128xf32> to vector<16x128xbf16>
    %cst_91 = arith.constant dense<0.000000e+00> : vector<16x16xf32>
    %215 = tpu.matmul %190, %212, %cst_91 {dimension_numbers = #tpu.dot_dimension_numbers<[1], [1], [0], [0], [0, 0, 1, 0], [], []>} : vector<16x128xbf16>, vector<16x128xbf16>, vector<16x16xf32> -> vector<16x16xf32>
    %cst_92 = arith.constant 1.250000e-01 : f32
    %216 = vector.broadcast %cst_92 : f32 to vector<16x16xf32>
    %217 = arith.mulf %215, %216 : vector<16x16xf32>
    %218 = arith.addf %217, %38 : vector<16x16xf32>
    %cst_93 = arith.constant dense<0xFF800000> : vector<16xf32>
    %219 = vector.multi_reduction <maximumf>, %218, %cst_93 [1] : vector<16x16xf32> to vector<16xf32>
    %220 = vector.shape_cast %219 : vector<16xf32> to vector<16x1xf32>
    %221 = vector.broadcast %220 : vector<16x1xf32> to vector<16x16xf32>
    %222 = arith.subf %218, %221 : vector<16x16xf32>
    %223 = math.exp %222 : vector<16x16xf32>
    %cst_94 = arith.constant dense<0.000000e+00> : vector<16xf32>
    %224 = vector.multi_reduction <add>, %223, %cst_94 [1] : vector<16x16xf32> to vector<16xf32>
    %225 = vector.shape_cast %224 : vector<16xf32> to vector<16x1xf32>
    %226 = tpu.reciprocal %225 {approx = true} : vector<16x1xf32> -> vector<16x1xf32>
    %227 = vector.broadcast %226 : vector<16x1xf32> to vector<16x16xf32>
    %228 = arith.mulf %223, %227 : vector<16x16xf32>
    %229 = arith.truncf %228 : vector<16x16xf32> to vector<16x16xbf16>
    %cst_95 = arith.constant dense<0.000000e+00> : vector<16x128xf32>
    %230 = tpu.matmul %229, %214, %cst_95 {dimension_numbers = #tpu.dot_dimension_numbers<[1], [0], [0], [1], [0, 0, 1, 1], [], []>} : vector<16x16xbf16>, vector<16x128xbf16>, vector<16x128xf32> -> vector<16x128xf32>
    %231 = arith.addf %210, %230 : vector<16x128xf32>
    %232 = arith.truncf %231 : vector<16x128xf32> to vector<16x128xbf16>
    %c1_96 = arith.constant 1 : index
    %c0_97 = arith.constant 0 : index
    %c0_98 = arith.constant 0 : index
    %233 = vector.load %arg8[%c1_96, %c0_97, %c0_98] : memref<2x128x128xbf16, #tpu.memory_space<vmem>>, vector<1x128x128xbf16>
    %234 = vector.shape_cast %233 : vector<1x128x128xbf16> to vector<128x128xbf16>
    %c1_99 = arith.constant 1 : index
    %c0_100 = arith.constant 0 : index
    %c0_101 = arith.constant 0 : index
    %235 = vector.load %arg9[%c1_99, %c0_100, %c0_101] : memref<2x1x128xf32, #tpu.memory_space<vmem>>, vector<1x1x128xf32>
    %236 = vector.shape_cast %235 : vector<1x1x128xf32> to vector<1x128xf32>
    %cst_102 = arith.constant dense<0.000000e+00> : vector<16x128xf32>
    %237 = tpu.matmul %232, %234, %cst_102 {dimension_numbers = #tpu.dot_dimension_numbers<[1], [0], [0], [1], [0, 0, 1, 1], [], []>} : vector<16x128xbf16>, vector<128x128xbf16>, vector<16x128xf32> -> vector<16x128xf32>
    %238 = vector.broadcast %236 : vector<1x128xf32> to vector<16x128xf32>
    %239 = arith.addf %237, %238 : vector<16x128xf32>
    %240 = arith.addf %239, %180 : vector<16x128xf32>
    %c1_103 = arith.constant 1 : index
    %c0_104 = arith.constant 0 : index
    %c0_105 = arith.constant 0 : index
    %241 = vector.load %arg10[%c1_103, %c0_104, %c0_105] : memref<2x1x128xf32, #tpu.memory_space<vmem>>, vector<1x1x128xf32>
    %242 = vector.shape_cast %241 : vector<1x1x128xf32> to vector<1x128xf32>
    %c1_106 = arith.constant 1 : index
    %c0_107 = arith.constant 0 : index
    %c0_108 = arith.constant 0 : index
    %243 = vector.load %arg11[%c1_106, %c0_107, %c0_108] : memref<2x1x128xf32, #tpu.memory_space<vmem>>, vector<1x1x128xf32>
    %244 = vector.shape_cast %243 : vector<1x1x128xf32> to vector<1x128xf32>
    %cst_109 = arith.constant dense<0.000000e+00> : vector<16xf32>
    %245 = vector.multi_reduction <add>, %240, %cst_109 [1] : vector<16x128xf32> to vector<16xf32>
    %246 = vector.shape_cast %245 : vector<16xf32> to vector<16x1xf32>
    %cst_110 = arith.constant 1.280000e+02 : f32
    %247 = vector.broadcast %cst_110 : f32 to vector<16x1xf32>
    %248 = arith.divf %246, %247 : vector<16x1xf32>
    %249 = vector.broadcast %248 : vector<16x1xf32> to vector<16x128xf32>
    %250 = arith.subf %240, %249 : vector<16x128xf32>
    %251 = arith.mulf %250, %250 : vector<16x128xf32>
    %cst_111 = arith.constant dense<0.000000e+00> : vector<16xf32>
    %252 = vector.multi_reduction <add>, %251, %cst_111 [1] : vector<16x128xf32> to vector<16xf32>
    %253 = vector.shape_cast %252 : vector<16xf32> to vector<16x1xf32>
    %cst_112 = arith.constant 1.280000e+02 : f32
    %254 = vector.broadcast %cst_112 : f32 to vector<16x1xf32>
    %255 = arith.divf %253, %254 : vector<16x1xf32>
    %256 = vector.broadcast %248 : vector<16x1xf32> to vector<16x128xf32>
    %257 = arith.subf %240, %256 : vector<16x128xf32>
    %cst_113 = arith.constant 9.99999996E-13 : f32
    %258 = vector.broadcast %cst_113 : f32 to vector<16x1xf32>
    %259 = arith.addf %255, %258 : vector<16x1xf32>
    %260 = math.rsqrt %259 : vector<16x1xf32>
    %261 = vector.broadcast %260 : vector<16x1xf32> to vector<16x128xf32>
    %262 = arith.mulf %257, %261 : vector<16x128xf32>
    %263 = vector.broadcast %242 : vector<1x128xf32> to vector<16x128xf32>
    %264 = arith.mulf %262, %263 : vector<16x128xf32>
    %265 = vector.broadcast %244 : vector<1x128xf32> to vector<16x128xf32>
    %266 = arith.addf %264, %265 : vector<16x128xf32>
    %267 = arith.truncf %266 : vector<16x128xf32> to vector<16x128xbf16>
    %c1_114 = arith.constant 1 : index
    %c0_115 = arith.constant 0 : index
    %c0_116 = arith.constant 0 : index
    %268 = vector.load %arg12[%c1_114, %c0_115, %c0_116] : memref<2x128x256xbf16, #tpu.memory_space<vmem>>, vector<1x128x256xbf16>
    %269 = vector.shape_cast %268 : vector<1x128x256xbf16> to vector<128x256xbf16>
    %c1_117 = arith.constant 1 : index
    %c0_118 = arith.constant 0 : index
    %c0_119 = arith.constant 0 : index
    %270 = vector.load %arg13[%c1_117, %c0_118, %c0_119] : memref<2x1x256xf32, #tpu.memory_space<vmem>>, vector<1x1x256xf32>
    %271 = vector.shape_cast %270 : vector<1x1x256xf32> to vector<1x256xf32>
    %cst_120 = arith.constant dense<0.000000e+00> : vector<16x256xf32>
    %272 = tpu.matmul %267, %269, %cst_120 {dimension_numbers = #tpu.dot_dimension_numbers<[1], [0], [0], [1], [0, 0, 1, 1], [], []>} : vector<16x128xbf16>, vector<128x256xbf16>, vector<16x256xf32> -> vector<16x256xf32>
    %273 = vector.broadcast %271 : vector<1x256xf32> to vector<16x256xf32>
    %274 = arith.addf %272, %273 : vector<16x256xf32>
    %cst_121 = arith.constant 5.000000e-01 : f32
    %275 = vector.broadcast %cst_121 : f32 to vector<16x256xf32>
    %276 = arith.mulf %275, %274 : vector<16x256xf32>
    %277 = arith.mulf %274, %274 : vector<16x256xf32>
    %278 = arith.mulf %277, %274 : vector<16x256xf32>
    %cst_122 = arith.constant 4.471500e-02 : f32
    %279 = vector.broadcast %cst_122 : f32 to vector<16x256xf32>
    %280 = arith.mulf %279, %278 : vector<16x256xf32>
    %281 = arith.addf %274, %280 : vector<16x256xf32>
    %cst_123 = arith.constant 0.797884583 : f32
    %282 = vector.broadcast %cst_123 : f32 to vector<16x256xf32>
    %283 = arith.mulf %282, %281 : vector<16x256xf32>
    %284 = math.tanh %283 : vector<16x256xf32>
    %cst_124 = arith.constant 1.000000e+00 : f32
    %285 = vector.broadcast %cst_124 : f32 to vector<16x256xf32>
    %286 = arith.addf %285, %284 : vector<16x256xf32>
    %287 = arith.mulf %276, %286 : vector<16x256xf32>
    %288 = arith.truncf %287 : vector<16x256xf32> to vector<16x256xbf16>
    %c1_125 = arith.constant 1 : index
    %c0_126 = arith.constant 0 : index
    %c0_127 = arith.constant 0 : index
    %289 = vector.load %arg14[%c1_125, %c0_126, %c0_127] : memref<2x256x128xbf16, #tpu.memory_space<vmem>>, vector<1x256x128xbf16>
    %290 = vector.shape_cast %289 : vector<1x256x128xbf16> to vector<256x128xbf16>
    %c1_128 = arith.constant 1 : index
    %c0_129 = arith.constant 0 : index
    %c0_130 = arith.constant 0 : index
    %291 = vector.load %arg15[%c1_128, %c0_129, %c0_130] : memref<2x1x128xf32, #tpu.memory_space<vmem>>, vector<1x1x128xf32>
    %292 = vector.shape_cast %291 : vector<1x1x128xf32> to vector<1x128xf32>
    %cst_131 = arith.constant dense<0.000000e+00> : vector<16x128xf32>
    %293 = tpu.matmul %288, %290, %cst_131 {dimension_numbers = #tpu.dot_dimension_numbers<[1], [0], [0], [1], [0, 0, 1, 1], [], []>} : vector<16x256xbf16>, vector<256x128xbf16>, vector<16x128xf32> -> vector<16x128xf32>
    %294 = vector.broadcast %292 : vector<1x128xf32> to vector<16x128xf32>
    %295 = arith.addf %293, %294 : vector<16x128xf32>
    %296 = arith.addf %295, %266 : vector<16x128xf32>
    %c1_132 = arith.constant 1 : index
    %c0_133 = arith.constant 0 : index
    %c0_134 = arith.constant 0 : index
    %297 = vector.load %arg16[%c1_132, %c0_133, %c0_134] : memref<2x1x128xf32, #tpu.memory_space<vmem>>, vector<1x1x128xf32>
    %298 = vector.shape_cast %297 : vector<1x1x128xf32> to vector<1x128xf32>
    %c1_135 = arith.constant 1 : index
    %c0_136 = arith.constant 0 : index
    %c0_137 = arith.constant 0 : index
    %299 = vector.load %arg17[%c1_135, %c0_136, %c0_137] : memref<2x1x128xf32, #tpu.memory_space<vmem>>, vector<1x1x128xf32>
    %300 = vector.shape_cast %299 : vector<1x1x128xf32> to vector<1x128xf32>
    %cst_138 = arith.constant dense<0.000000e+00> : vector<16xf32>
    %301 = vector.multi_reduction <add>, %296, %cst_138 [1] : vector<16x128xf32> to vector<16xf32>
    %302 = vector.shape_cast %301 : vector<16xf32> to vector<16x1xf32>
    %cst_139 = arith.constant 1.280000e+02 : f32
    %303 = vector.broadcast %cst_139 : f32 to vector<16x1xf32>
    %304 = arith.divf %302, %303 : vector<16x1xf32>
    %305 = vector.broadcast %304 : vector<16x1xf32> to vector<16x128xf32>
    %306 = arith.subf %296, %305 : vector<16x128xf32>
    %307 = arith.mulf %306, %306 : vector<16x128xf32>
    %cst_140 = arith.constant dense<0.000000e+00> : vector<16xf32>
    %308 = vector.multi_reduction <add>, %307, %cst_140 [1] : vector<16x128xf32> to vector<16xf32>
    %309 = vector.shape_cast %308 : vector<16xf32> to vector<16x1xf32>
    %cst_141 = arith.constant 1.280000e+02 : f32
    %310 = vector.broadcast %cst_141 : f32 to vector<16x1xf32>
    %311 = arith.divf %309, %310 : vector<16x1xf32>
    %312 = vector.broadcast %304 : vector<16x1xf32> to vector<16x128xf32>
    %313 = arith.subf %296, %312 : vector<16x128xf32>
    %cst_142 = arith.constant 9.99999996E-13 : f32
    %314 = vector.broadcast %cst_142 : f32 to vector<16x1xf32>
    %315 = arith.addf %311, %314 : vector<16x1xf32>
    %316 = math.rsqrt %315 : vector<16x1xf32>
    %317 = vector.broadcast %316 : vector<16x1xf32> to vector<16x128xf32>
    %318 = arith.mulf %313, %317 : vector<16x128xf32>
    %319 = vector.broadcast %298 : vector<1x128xf32> to vector<16x128xf32>
    %320 = arith.mulf %318, %319 : vector<16x128xf32>
    %321 = vector.broadcast %300 : vector<1x128xf32> to vector<16x128xf32>
    %322 = arith.addf %320, %321 : vector<16x128xf32>
    %323 = vector.shape_cast %322 : vector<16x128xf32> to vector<2x8x128xf32>
    %324 = vector.extract_strided_slice %323 {offsets = [0, 0, 0], sizes = [2, 1, 128], strides = [1, 1, 1]} : vector<2x8x128xf32> to vector<2x1x128xf32>
    %325 = vector.shape_cast %324 : vector<2x1x128xf32> to vector<2x128xf32>
    %326 = arith.truncf %325 : vector<2x128xf32> to vector<2x128xbf16>
    %c0_143 = arith.constant 0 : index
    %c0_144 = arith.constant 0 : index
    %327 = vector.load %arg18[%c0_143, %c0_144] : memref<128x128xbf16, #tpu.memory_space<vmem>>, vector<128x128xbf16>
    %c0_145 = arith.constant 0 : index
    %c0_146 = arith.constant 0 : index
    %328 = vector.load %arg19[%c0_145, %c0_146] : memref<1x128xf32, #tpu.memory_space<vmem>>, vector<1x128xf32>
    %cst_147 = arith.constant dense<0.000000e+00> : vector<2x128xf32>
    %329 = tpu.matmul %326, %327, %cst_147 {dimension_numbers = #tpu.dot_dimension_numbers<[1], [0], [0], [1], [0, 0, 1, 1], [], []>} : vector<2x128xbf16>, vector<128x128xbf16>, vector<2x128xf32> -> vector<2x128xf32>
    %330 = vector.broadcast %328 : vector<1x128xf32> to vector<2x128xf32>
    %331 = arith.addf %329, %330 : vector<2x128xf32>
    %332 = math.tanh %331 : vector<2x128xf32>
    %333 = arith.truncf %332 : vector<2x128xf32> to vector<2x128xbf16>
    %c0_148 = arith.constant 0 : index
    %c0_149 = arith.constant 0 : index
    %334 = vector.load %arg20[%c0_148, %c0_149] : memref<128x128xbf16, #tpu.memory_space<vmem>>, vector<128x128xbf16>
    %c0_150 = arith.constant 0 : index
    %c0_151 = arith.constant 0 : index
    %335 = vector.load %arg21[%c0_150, %c0_151] : memref<1x128xf32, #tpu.memory_space<vmem>>, vector<1x128xf32>
    %cst_152 = arith.constant dense<0.000000e+00> : vector<2x128xf32>
    %336 = tpu.matmul %333, %334, %cst_152 {dimension_numbers = #tpu.dot_dimension_numbers<[1], [0], [0], [1], [0, 0, 1, 1], [], []>} : vector<2x128xbf16>, vector<128x128xbf16>, vector<2x128xf32> -> vector<2x128xf32>
    %337 = vector.broadcast %335 : vector<1x128xf32> to vector<2x128xf32>
    %338 = arith.addf %336, %337 : vector<2x128xf32>
    %cst_153 = arith.constant 0.000000e+00 : f32
    %339 = vector.broadcast %cst_153 : f32 to vector<2x128xf32>
    %340 = arith.maximumf %338, %339 : vector<2x128xf32>
    %341 = arith.truncf %340 : vector<2x128xf32> to vector<2x128xbf16>
    %c0_154 = arith.constant 0 : index
    %c0_155 = arith.constant 0 : index
    %342 = vector.load %arg22[%c0_154, %c0_155] : memref<128x128xbf16, #tpu.memory_space<vmem>>, vector<128x128xbf16>
    %c0_156 = arith.constant 0 : index
    %c0_157 = arith.constant 0 : index
    %343 = vector.load %arg23[%c0_156, %c0_157] : memref<1x128xf32, #tpu.memory_space<vmem>>, vector<1x128xf32>
    %cst_158 = arith.constant dense<0.000000e+00> : vector<2x128xf32>
    %344 = tpu.matmul %341, %342, %cst_158 {dimension_numbers = #tpu.dot_dimension_numbers<[1], [0], [0], [1], [0, 0, 1, 1], [], []>} : vector<2x128xbf16>, vector<128x128xbf16>, vector<2x128xf32> -> vector<2x128xf32>
    %345 = vector.broadcast %343 : vector<1x128xf32> to vector<2x128xf32>
    %346 = arith.addf %344, %345 : vector<2x128xf32>
    %c0_159 = arith.constant 0 : index
    %c0_160 = arith.constant 0 : index
    %347 = vector.load %arg24[%c0_159, %c0_160] : memref<2x128xf32, #tpu.memory_space<vmem>>, vector<2x128xf32>
    tpu.vector_store %arg24[%c0_159, %c0_160], %346 {strides = array<i32>} : memref<2x128xf32, #tpu.memory_space<vmem>>, vector<2x128xf32>,
    return
  }
}

</mosaic_0001>

<bundles_post_ra>
// kernel: eq.8
= control target key start
LH: loop header
LB: loop body
LE: loop exit
PB: predicated region body
PF: predicated region fallthrough
CT: control target
= control target key end

     0   :  { %vm7_vm0 = vcmask 64512   ;;  %vm13_vm1 = vcmask 130112   ;;  %s39_s0 = inlined_call_operand.vmem [shape: s32[2,8], index: 0, kind: input, shape index: {}]   ;;  %s40_s1 = inlined_call_operand.vmem [shape: s32[16], index: 1, kind: output, shape index: {}]  }
   0x1   :  { %v4_v0 = vld [vmem:[%s39_s0] sm:$0x3]  ;;  %s22_s0 = smov 8  }
   0x2   :  { %5 = vst [vmem:[#allocation1] sm:$0x3] %v4_v0 }
   0x9   :  { %v10_v1 = vld [vmem:[#allocation1 + $0x1] sm:$0x1]   ;;  %v6_v2 = vld [vmem:[#allocation1] sm:$0x1]  }
   0xa   :  { %11 = vrot.lane.b32.xlu0 %v10_v1, %s22_s0  ;;  %8 = vst.msk [vmem:[#allocation0] sm:$0x1] %vm7_vm0, %v6_v2  }
  0x7c   :  { %v12_v3 = vpop.permute.xlu0 %11  }
  0x7d   :  { %14 = vst.msk [vmem:[#allocation0] sm:$0x1] %vm13_vm1, %v12_v3  }
  0x84   :  { %v18_v4 = vld [vmem:[#allocation0] sm:$0x1] }
  0x85   :  { %20 = vst [vmem:[%s40_s1] sm:$0x1] %v18_v4 }

// kernel: biobert_classifier_forward.1
= control target key start
LH: loop header
LB: loop body
LE: loop exit
PB: predicated region body
PF: predicated region fallthrough
CT: control target
= control target key end

     0   :  { %s5163_s0 = inlined_call_operand.vmem [shape: s32[16,1], index: 0, kind: input, shape index: {}]   ;;  %s5164_s1 = inlined_call_operand.vmem [shape: f32[16,16], index: 1, kind: input, shape index: {}]   ;;  %s5165_s2 = inlined_call_operand.vmem [shape: f32[128,128], index: 2, kind: input, shape index: {}]   ;;  %s5166_s3 = inlined_call_operand.vmem [shape: f32[8,128], index: 3, kind: input, shape index: {}]   ;;  %s5167_s4 = inlined_call_operand.hbm [shape: f32[1,128], index: 4, kind: input, shape index: {}]   ;;  %s5168_s5 = inlined_call_operand.hbm [shape: f32[1,128], index: 5, kind: input, shape index: {}]   ;;  %s5169_s6 = inlined_call_operand.hbm [shape: bf16[2,128,640], index: 6, kind: input, shape index: {}]   ;;  %s5170_s7 = inlined_call_operand.vmem [shape: f32[2,1,640], index: 7, kind: input, shape index: {}]   ;;  %s5171_s8 = inlined_call_operand.hbm [shape: bf16[2,128,128], index: 8, kind: input, shape index: {}]   ;;  %s5172_s9 = inlined_call_operand.vmem [shape: f32[2,1,128], index: 9, kind: input, shape index: {}]   ;;  %s5173_s10 = inlined_call_operand.vmem [shape: f32[2,1,128], index: 10, kind: input, shape index: {}]   ;;  %s5174_s11 = inlined_call_operand.vmem [shape: f32[2,1,128], index: 11, kind: input, shape index: {}]   ;;  %s5175_s12 = inlined_call_operand.hbm [shape: bf16[2,128,256], index: 12, kind: input, shape index: {}]   ;;  %s5176_s13 = inlined_call_operand.vmem [shape: f32[2,1,256], index: 13, kind: input, shape index: {}]   ;;  %s5177_s14 = inlined_call_operand.hbm [shape: bf16[2,256,128], index: 14, kind: input, shape index: {}]   ;;  %s5178_s15 = inlined_call_operand.vmem [shape: f32[2,1,128], index: 15, kind: input, shape index: {}]   ;;  %s5179_s16 = inlined_call_operand.vmem [shape: f32[2,1,128], index: 16, kind: input, shape index: {}]   ;;  %s5180_s17 = inlined_call_operand.hbm [shape: f32[2,1,128], index: 17, kind: input, shape index: {}]   ;;  %s5181_s18 = inlined_call_operand.hbm [shape: bf16[128,128], index: 18, kind: input, shape index: {}]   ;;  %s5182_s19 = inlined_call_operand.hbm [shape: f32[1,128], index: 19, kind: input, shape index: {}]   ;;  %s5183_s20 = inlined_call_operand.hbm [shape: bf16[128,128], index: 20, kind: input, shape index: {}]   ;;  %s5184_s21 = inlined_call_operand.hbm [shape: f32[1,128], index: 21, kind: input, shape index: {}]   ;;  %s5185_s22 = inlined_call_operand.hbm [shape: bf16[128,128], index: 22, kind: input, shape index: {}]   ;;  %s5186_s23 = inlined_call_operand.hbm [shape: f32[1,128], index: 23, kind: input, shape index: {}]   ;;  %s5187_s24 = inlined_call_operand.hbm [shape: f32[2,128], index: 24, kind: output, shape index: {}]  }
   0x1   :  { %5198 = sst [smem:[#allocation32_spill]] %s5163_s0 }
   0x2   :  { %5199 = sst [smem:[#allocation33_spill]] %s5164_s1 }
   0x3   :  { %5200 = sst [smem:[#allocation34_spill]] %s5165_s2 }
   0x4   :  { %5201 = sst [smem:[#allocation35_spill]] %s5166_s3 }
   0x5   :  { %5202 = sst [smem:[#allocation36_spill]] %s5167_s4 }
   0x6   :  { %5203 = sst [smem:[#allocation37_spill]] %s5168_s5 }
   0x7   :  { %5204 = sst [smem:[#allocation38_spill]] %s5169_s6 }
   0x8   :  { %5205 = sst [smem:[#allocation39_spill]] %s5170_s7 }
   0x9   :  { %5206 = sst [smem:[#allocation40_spill]] %s5171_s8 }
   0xa   :  { %5207 = sst [smem:[#allocation41_spill]] %s5179_s16 }
   0xb   :  { %5208 = sst [smem:[#allocation42_spill]] %s5187_s24 }
   0xc   :  { %29 = vsyncpa [#allocation3], 0 }
   0xd   :  { %30 = vsyncpa [#allocation6], 0 }
   0xe   :  { %31 = vsyncpa [#allocation9], 0 }
   0xf   :  { %32 = vsyncpa [#allocation12], 0 }
  0x10   :  { %33 = vsyncpa [#allocation15], 0 }
  0x11   :  { %34 = vsyncpa [#allocation18], 0 }
  0x12   :  { %35 = vsyncpa [#allocation21], 0 }
  0x13   :  { %36 = vsyncpa [#allocation4], 0  ;;  %s4460_s5 = smov [#allocation5]   ;;  %s4461_s27 = smov [#allocation8]  }
  0x14   :  { %s61_s26 = sshll.u32 %s4460_s5, 4  ;;  %s84_s28 = sshll.u32 %s4461_s27, 4  ;;  %s62_s26 = int_to_ptr.vmem [resolvable:$true] %s61_s26  ;;  %s4611_s28 = int_to_ptr.vmem [resolvable:$true] %s84_s28 }
  0x15   :  { %s5209_s29 = sld [smem:[#allocation37_spill]] }
  0x1b   :  { %s4136_s0 = scalar_lea.hbm %s5209_s29, 16 }
  0x1c   :  { %p4137_p0 = scmp.ne.s32.totalorder %s5209_s29, %s4136_s0  ;;  %p4140_p1 = scmp.lt.u32.totalorder %s4136_s0, %s5209_s29 }
  0x1e   :  { %p4142_p2 = pnand %p4140_p1, %p4137_p0 }
  0x20   :  { %4145 = shalt.err (!%p4142_p2)
}
  0x21   :  { %s4146_s8 = scalar_lea.vmem %s62_s26, 16  ;;  %s4150_s4 = scalar_lea.vmem %s62_s26, 32 }
  0x22   :  { %p4147_p3 = scmp.ne.s32.totalorder %s62_s26, %s4146_s8  ;;  %p4151_p4 = scmp.lt.s32.totalorder %s62_s26, %s62_s26 }
  0x23   :  { %p4152_p5 = scmp.lt.s32.totalorder %s4150_s4, %s4146_s8 }
  0x25   :  { %p4153_p6 = por %p4152_p5, %p4151_p4 }
  0x27   :  { %p4154_p7 = pnand %p4153_p6, %p4147_p3 }
  0x29   :  { %4157 = shalt.err (!%p4154_p7)
}
  0x2a   :  { %64 = dma.hbm_to_vmem [thread:$0]  %s5209_s29, 16, %s62_s26, [#allocation6]  }
  0x2b   :  { %s5210_s2 = sld [smem:[#allocation40_spill]] }
  0x31   :  { %s4158_s7 = scalar_lea.hbm %s5210_s2, 2048 }
  0x32   :  { %p4159_p8 = scmp.ne.s32.totalorder %s5210_s2, %s4158_s7  ;;  %p4162_p9 = scmp.lt.u32.totalorder %s4158_s7, %s5210_s2 }
  0x34   :  { %p4164_p10 = pnand %p4162_p9, %p4159_p8 }
  0x36   :  { %4167 = shalt.err (!%p4164_p10)
}
  0x37   :  { %s4168_s8 = scalar_lea.vmem %s4611_s28, 2048  ;;  %p4173_p12 = scmp.lt.s32.totalorder %s4611_s28, %s4611_s28 }
  0x38   :  { %p4169_p11 = scmp.ne.s32.totalorder %s4611_s28, %s4168_s8  ;;  %p4174_p13 = scmp.lt.s32.totalorder %s4168_s8, %s4168_s8 }
  0x3a   :  { %p4175_p0 = por %p4174_p13, %p4173_p12 }
  0x3c   :  { %p4176_p1 = pnand %p4175_p0, %p4169_p11 }
  0x3e   :  { %4179 = shalt.err (!%p4176_p1)
}
  0x3f   :  { %s4462_s26 = smov 64   ;;  %s4463_s29 = smov 4  }
  0x40   :  { %90 = dma.hbm_to_vmem [thread:$0]  %s5210_s2, 2048, %s4611_s28, [#allocation9], %s4462_s26, %s4462_s26, %s4463_s29  }
  0x41   :  { %s4464_s5 = smov [#allocation11]   ;;  %s4465_s6 = smov [#allocation14]  }
  0x42   :  { %s116_s27 = sshll.u32 %s4464_s5, 4  ;;  %s144_s7 = sshll.u32 %s4465_s6, 4  ;;  %s117_s27 = int_to_ptr.vmem [resolvable:$true] %s116_s27  ;;  %s4645_s7 = int_to_ptr.vmem [resolvable:$true] %s144_s7 }
  0x43   :  { %s4180_s3 = scalar_lea.hbm %s5177_s14, 4096 }
  0x44   :  { %p4181_p2 = scmp.ne.s32.totalorder %s5177_s14, %s4180_s3  ;;  %p4184_p3 = scmp.lt.u32.totalorder %s4180_s3, %s5177_s14 }
  0x46   :  { %p4186_p4 = pnand %p4184_p3, %p4181_p2 }
  0x48   :  { %4189 = shalt.err (!%p4186_p4)
}
  0x49   :  { %s4190_s28 = scalar_lea.vmem %s117_s27, 4096  ;;  %p4195_p6 = scmp.lt.s32.totalorder %s117_s27, %s117_s27 }
  0x4a   :  { %p4191_p5 = scmp.ne.s32.totalorder %s117_s27, %s4190_s28  ;;  %p4196_p7 = scmp.lt.s32.totalorder %s4190_s28, %s4190_s28 }
  0x4c   :  { %p4197_p8 = por %p4196_p7, %p4195_p6 }
  0x4e   :  { %p4198_p9 = pnand %p4197_p8, %p4191_p5 }
  0x50   :  { %4201 = shalt.err (!%p4198_p9)
}
  0x51   :  { %122 = dma.hbm_to_vmem [thread:$0]  %s5177_s14, 4096, %s117_s27, [#allocation12], %s4462_s26, %s4462_s26, %s4463_s29  }
  0x52   :  { %s4202_s16 = scalar_lea.hbm %s5181_s18, 1024 }
  0x53   :  { %p4203_p10 = scmp.ne.s32.totalorder %s5181_s18, %s4202_s16  ;;  %p4206_p11 = scmp.lt.u32.totalorder %s4202_s16, %s5181_s18 }
  0x55   :  { %p4208_p12 = pnand %p4206_p11, %p4203_p10 }
  0x57   :  { %4211 = shalt.err (!%p4208_p12)
}
  0x58   :  { %s4212_s3 = scalar_lea.vmem %s4645_s7, 1024  ;;  %p4217_p0 = scmp.lt.s32.totalorder %s4645_s7, %s4645_s7 }
  0x59   :  { %p4213_p13 = scmp.ne.s32.totalorder %s4645_s7, %s4212_s3  ;;  %p4218_p1 = scmp.lt.s32.totalorder %s4212_s3, %s4212_s3 }
  0x5b   :  { %p4219_p2 = por %p4218_p1, %p4217_p0 }
  0x5d   :  { %p4220_p3 = pnand %p4219_p2, %p4213_p13 }
  0x5f   :  { %4223 = shalt.err (!%p4220_p3)
}
  0x60   :  { %150 = dma.hbm_to_vmem [thread:$0]  %s5181_s18, 1024, %s4645_s7, [#allocation15], %s4462_s26, %s4462_s26, %s4463_s29  }
  0x61   :  { %s4466_s25 = smov [#allocation17]   ;;  %s4467_s28 = smov [#allocation20]  }
  0x62   :  { %s166_s8 = sshll.u32 %s4466_s25, 4  ;;  %s188_s2 = sshll.u32 %s4467_s28, 4  ;;  %s167_s8 = int_to_ptr.vmem [resolvable:$true] %s166_s8  ;;  %s4682_s2 = int_to_ptr.vmem [resolvable:$true] %s188_s2 }
  0x63   :  { %s4224_s5 = scalar_lea.hbm %s5183_s20, 1024 }
  0x64   :  { %p4225_p4 = scmp.ne.s32.totalorder %s5183_s20, %s4224_s5  ;;  %p4228_p5 = scmp.lt.u32.totalorder %s4224_s5, %s5183_s20 }
  0x66   :  { %p4230_p6 = pnand %p4228_p5, %p4225_p4 }
  0x68   :  { %4233 = shalt.err (!%p4230_p6)
}
  0x69   :  { %s4234_s18 = scalar_lea.vmem %s167_s8, 1024  ;;  %p4239_p8 = scmp.lt.s32.totalorder %s167_s8, %s167_s8 }
  0x6a   :  { %p4235_p7 = scmp.ne.s32.totalorder %s167_s8, %s4234_s18  ;;  %p4240_p9 = scmp.lt.s32.totalorder %s4234_s18, %s4234_s18 }
  0x6c   :  { %p4241_p10 = por %p4240_p9, %p4239_p8 }
  0x6e   :  { %p4242_p11 = pnand %p4241_p10, %p4235_p7 }
  0x70   :  { %4245 = shalt.err (!%p4242_p11)
}
  0x71   :  { %172 = dma.hbm_to_vmem [thread:$0]  %s5183_s20, 1024, %s167_s8, [#allocation18], %s4462_s26, %s4462_s26, %s4463_s29  }
  0x72   :  { %s4246_s27 = scalar_lea.hbm %s5185_s22, 1024 }
  0x73   :  { %p4247_p12 = scmp.ne.s32.totalorder %s5185_s22, %s4246_s27  ;;  %p4250_p13 = scmp.lt.u32.totalorder %s4246_s27, %s5185_s22 }
  0x75   :  { %p4252_p0 = pnand %p4250_p13, %p4247_p12 }
  0x77   :  { %4255 = shalt.err (!%p4252_p0)
}
  0x78   :  { %s4256_s5 = scalar_lea.vmem %s4682_s2, 1024  ;;  %p4261_p2 = scmp.lt.s32.totalorder %s4682_s2, %s4682_s2 }
  0x79   :  { %p4257_p1 = scmp.ne.s32.totalorder %s4682_s2, %s4256_s5  ;;  %p4262_p3 = scmp.lt.s32.totalorder %s4256_s5, %s4256_s5 }
  0x7b   :  { %p4263_p4 = por %p4262_p3, %p4261_p2 }
  0x7d   :  { %p4264_p5 = pnand %p4263_p4, %p4257_p1 }
  0x7f   :  { %4267 = shalt.err (!%p4264_p5)
}
  0x80   :  { %194 = dma.hbm_to_vmem [thread:$0]  %s5185_s22, 1024, %s4682_s2, [#allocation21], %s4462_s26, %s4462_s26, %s4463_s29  }
  0x81   :  { %s4468_s16 = smov [#allocation2]   ;;  %s4469_s6 = smov [#allocation7]  }
  0x82   :  { %s51_s24 = sshll.u32 %s4468_s16, 4  ;;  %s70_s30 = sshll.u32 %s4469_s6, 4  ;;  %s52_s24 = int_to_ptr.vmem [resolvable:$true] %s51_s24  ;;  %s4719_s30 = int_to_ptr.vmem [resolvable:$true] %s70_s30 }
  0x83   :  { %s5211_s0 = sld [smem:[#allocation36_spill]] }
  0x89   :  { %s4268_s3 = scalar_lea.hbm %s5211_s0, 16 }
  0x8a   :  { %p4269_p6 = scmp.ne.s32.totalorder %s5211_s0, %s4268_s3  ;;  %p4272_p7 = scmp.lt.u32.totalorder %s4268_s3, %s5211_s0 }
  0x8c   :  { %p4274_p8 = pnand %p4272_p7, %p4269_p6 }
  0x8e   :  { %4277 = shalt.err (!%p4274_p8)
}
  0x8f   :  { %s4278_s22 = scalar_lea.vmem %s52_s24, 16  ;;  %s4282_s26 = scalar_lea.vmem %s52_s24, 32 }
  0x90   :  { %p4279_p9 = scmp.ne.s32.totalorder %s52_s24, %s4278_s22  ;;  %p4283_p10 = scmp.lt.s32.totalorder %s52_s24, %s52_s24 }
  0x91   :  { %p4284_p11 = scmp.lt.s32.totalorder %s4282_s26, %s4278_s22 }
  0x93   :  { %p4285_p12 = por %p4284_p11, %p4283_p10 }
  0x95   :  { %p4286_p13 = pnand %p4285_p12, %p4279_p9 }
  0x97   :  { %4289 = shalt.err (!%p4286_p13)
}
  0x98   :  { %54 = dma.hbm_to_vmem [thread:$0]  %s5211_s0, 16, %s52_s24, [#allocation3]  }
  0x99   :  { %s5212_s5 = sld [smem:[#allocation38_spill]] }
  0x9f   :  { %s4290_s20 = scalar_lea.hbm %s5212_s5, 10240 }
  0xa0   :  { %p4291_p0 = scmp.ne.s32.totalorder %s5212_s5, %s4290_s20  ;;  %p4294_p1 = scmp.lt.u32.totalorder %s4290_s20, %s5212_s5 }
  0xa2   :  { %p4296_p2 = pnand %p4294_p1, %p4291_p0 }
  0xa4   :  { %4299 = shalt.err (!%p4296_p2)
}
  0xa5   :  { %s4300_s7 = scalar_lea.vmem %s4719_s30, 10240  ;;  %p4305_p4 = scmp.lt.s32.totalorder %s4719_s30, %s4719_s30 }
  0xa6   :  { %p4301_p3 = scmp.ne.s32.totalorder %s4719_s30, %s4300_s7  ;;  %p4306_p5 = scmp.lt.s32.totalorder %s4300_s7, %s4300_s7 }
  0xa8   :  { %p4307_p6 = por %p4306_p5, %p4305_p4 }
  0xaa   :  { %p4308_p7 = pnand %p4307_p6, %p4301_p3 }
  0xac   :  { %4311 = shalt.err (!%p4308_p7)
}
  0xad   :  { %s4470_s24 = smov 320   ;;  %s4471_s0 = smov 20  }
  0xae   :  { %76 = dma.hbm_to_vmem [thread:$0]  %s5212_s5, 10240, %s4719_s30, [#allocation6], %s4470_s24, %s4470_s24, %s4471_s0  }
  0xaf   :  { %s4472_s27 = smov [#allocation10]   ;;  %s4312_s26 = scalar_lea.hbm %s5175_s12, 4096 }
  0xb0   :  { %s102_s25 = sshll.u32 %s4472_s27, 4  ;;  %p4313_p8 = scmp.ne.s32.totalorder %s5175_s12, %s4312_s26  ;;  %s103_s25 = int_to_ptr.vmem [resolvable:$true] %s102_s25 }
  0xb1   :  { %p4316_p9 = scmp.lt.u32.totalorder %s4312_s26, %s5175_s12 }
  0xb3   :  { %p4318_p10 = pnand %p4316_p9, %p4313_p8 }
  0xb5   :  { %4321 = shalt.err (!%p4318_p10)
}
  0xb6   :  { %s4322_s20 = scalar_lea.vmem %s103_s25, 4096  ;;  %p4327_p12 = scmp.lt.s32.totalorder %s103_s25, %s103_s25 }
  0xb7   :  { %p4323_p11 = scmp.ne.s32.totalorder %s103_s25, %s4322_s20  ;;  %p4328_p13 = scmp.lt.s32.totalorder %s4322_s20, %s4322_s20 }
  0xb9   :  { %p4329_p0 = por %p4328_p13, %p4327_p12 }
  0xbb   :  { %p4330_p1 = pnand %p4329_p0, %p4323_p11 }
  0xbd   :  { %4333 = shalt.err (!%p4330_p1)
}
  0xbe   :  { %s4473_s30 = smov 128   ;;  %s4474_s5 = smov 8  }
  0xbf   :  { %108 = dma.hbm_to_vmem [thread:$0]  %s5175_s12, 4096, %s103_s25, [#allocation9], %s4473_s30, %s4473_s30, %s4474_s5  }
  0xc0   :  { %s4475_s6 = smov [#allocation13]   ;;  %s4334_s0 = scalar_lea.hbm %s5180_s17, 32 }
  0xc1   :  { %s132_s18 = sshll.u32 %s4475_s6, 4  ;;  %p4335_p2 = scmp.ne.s32.totalorder %s5180_s17, %s4334_s0  ;;  %s133_s18 = int_to_ptr.vmem [resolvable:$true] %s132_s18 }
  0xc2   :  { %p4338_p3 = scmp.lt.u32.totalorder %s4334_s0, %s5180_s17 }
  0xc4   :  { %p4340_p4 = pnand %p4338_p3, %p4335_p2 }
  0xc6   :  { %4343 = shalt.err (!%p4340_p4)
}
  0xc7   :  { %s4344_s22 = scalar_lea.vmem %s133_s18, 32  ;;  %p4349_p6 = scmp.lt.s32.totalorder %s133_s18, %s133_s18 }
  0xc8   :  { %p4345_p5 = scmp.ne.s32.totalorder %s133_s18, %s4344_s22  ;;  %p4350_p7 = scmp.lt.s32.totalorder %s4344_s22, %s4344_s22 }
  0xca   :  { %p4351_p8 = por %p4350_p7, %p4349_p6 }
  0xcc   :  { %p4352_p9 = pnand %p4351_p8, %p4345_p5 }
  0xce   :  { %4355 = shalt.err (!%p4352_p9)
}
  0xcf   :  { %s4476_s12 = smov 16   ;;  %s4477_s25 = smov 1  }
  0xd0   :  { %138 = dma.hbm_to_vmem [thread:$0]  %s5180_s17, 32, %s133_s18, [#allocation12], %s4476_s12, %s4476_s12, %s4477_s25  }
  0xd1   :  { %s4478_s2 = smov [#allocation16]   ;;  %s4479_s1 = smov [#allocation19]  }
  0xd2   :  { %s157_s4 = sshll.u32 %s4478_s2, 4  ;;  %s179_s20 = sshll.u32 %s4479_s1, 4  ;;  %s158_s4 = int_to_ptr.vmem [resolvable:$true] %s157_s4  ;;  %s180_s20 = int_to_ptr.vmem [resolvable:$true] %s179_s20 }
  0xd3   :  { %s4356_s8 = scalar_lea.hbm %s5182_s19, 16 }
  0xd4   :  { %p4357_p10 = scmp.ne.s32.totalorder %s5182_s19, %s4356_s8  ;;  %p4360_p11 = scmp.lt.u32.totalorder %s4356_s8, %s5182_s19 }
  0xd6   :  { %p4362_p12 = pnand %p4360_p11, %p4357_p10 }
  0xd8   :  { %4365 = shalt.err (!%p4362_p12)
}
  0xd9   :  { %s4366_s17 = scalar_lea.vmem %s158_s4, 16  ;;  %s4370_s18 = scalar_lea.vmem %s158_s4, 32 }
  0xda   :  { %p4367_p13 = scmp.ne.s32.totalorder %s158_s4, %s4366_s17  ;;  %p4371_p0 = scmp.lt.s32.totalorder %s158_s4, %s158_s4 }
  0xdb   :  { %p4372_p1 = scmp.lt.s32.totalorder %s4370_s18, %s4366_s17 }
  0xdd   :  { %p4373_p2 = por %p4372_p1, %p4371_p0 }
  0xdf   :  { %p4374_p3 = pnand %p4373_p2, %p4367_p13 }
  0xe1   :  { %4377 = shalt.err (!%p4374_p3)
}
  0xe2   :  { %160 = dma.hbm_to_vmem [thread:$0]  %s5182_s19, 16, %s158_s4, [#allocation15]  }
  0xe3   :  { %s4378_s28 = scalar_lea.hbm %s5184_s21, 16 }
  0xe4   :  { %p4379_p4 = scmp.ne.s32.totalorder %s5184_s21, %s4378_s28  ;;  %p4382_p5 = scmp.lt.u32.totalorder %s4378_s28, %s5184_s21 }
  0xe6   :  { %p4384_p6 = pnand %p4382_p5, %p4379_p4 }
  0xe8   :  { %4387 = shalt.err (!%p4384_p6)
}
  0xe9   :  { %s4388_s29 = scalar_lea.vmem %s180_s20, 16  ;;  %s4392_s2 = scalar_lea.vmem %s180_s20, 32 }
  0xea   :  { %p4389_p7 = scmp.ne.s32.totalorder %s180_s20, %s4388_s29  ;;  %p4393_p8 = scmp.lt.s32.totalorder %s180_s20, %s180_s20 }
  0xeb   :  { %p4394_p9 = scmp.lt.s32.totalorder %s4392_s2, %s4388_s29 }
  0xed   :  { %p4395_p10 = por %p4394_p9, %p4393_p8 }
  0xef   :  { %p4396_p11 = pnand %p4395_p10, %p4389_p7 }
  0xf1   :  { %4399 = shalt.err (!%p4396_p11)
}
  0xf2   :  { %182 = dma.hbm_to_vmem [thread:$0]  %s5184_s21, 16, %s180_s20, [#allocation18]  }
  0xf3   :  { %s4480_s1 = smov [#allocation22]   ;;  %s4400_s16 = scalar_lea.hbm %s5186_s23, 16 }
  0xf4   :  { %s201_s30 = sshll.u32 %s4480_s1, 4  ;;  %p4401_p12 = scmp.ne.s32.totalorder %s5186_s23, %s4400_s16  ;;  %s202_s30 = int_to_ptr.vmem [resolvable:$true] %s201_s30 }
  0xf5   :  { %p4404_p13 = scmp.lt.u32.totalorder %s4400_s16, %s5186_s23 }
  0xf7   :  { %p4406_p0 = pnand %p4404_p13, %p4401_p12 }
  0xf9   :  { %4409 = shalt.err (!%p4406_p0)
}
  0xfa   :  { %s4410_s18 = scalar_lea.vmem %s202_s30, 16  ;;  %s4414_s21 = scalar_lea.vmem %s202_s30, 32 }
  0xfb   :  { %p4411_p1 = scmp.ne.s32.totalorder %s202_s30, %s4410_s18  ;;  %p4415_p2 = scmp.lt.s32.totalorder %s202_s30, %s202_s30 }
  0xfc   :  { %p4416_p3 = scmp.lt.s32.totalorder %s4414_s21, %s4410_s18 }
  0xfe   :  { %p4417_p4 = por %p4416_p3, %p4415_p2 }
 0x100   :  { %p4418_p5 = pnand %p4417_p4, %p4411_p1 }
 0x102   :  { %4421 = shalt.err (!%p4418_p5)
}
 0x103   :  { %204 = dma.hbm_to_vmem [thread:$0]  %s5186_s23, 16, %s202_s30, [#allocation21]  }
 0x104   :  { %4444 = dma.done.wait [#allocation3], 16  }
 0x105   :  { %4445 = vsyncadd [#allocation3], 4294967280 }
 0x106   :  { %4446 = dma.done.wait [#allocation6], 10256  }
 0x107   :  { %4447 = vsyncadd [#allocation6], 4294957040 }
 0x108   :  { %4448 = dma.done.wait [#allocation9], 6144  }
 0x109   :  { %4449 = vsyncadd [#allocation9], 4294961152 }
 0x10a   :  { %4450 = dma.done.wait [#allocation12], 4128  }
 0x10b   :  { %4451 = vsyncadd [#allocation12], 4294963168 }
 0x10c   :  { %4452 = dma.done.wait [#allocation15], 1040  }
 0x10d   :  { %4453 = vsyncadd [#allocation15], 4294966256 }
 0x10e   :  { %4454 = dma.done.wait [#allocation18], 1040  }
 0x10f   :  { %4455 = vsyncadd [#allocation18], 4294966256 }
 0x110   :  { %4456 = dma.done.wait [#allocation21], 1040  }
 0x111   :  { %4457 = vsyncadd [#allocation21], 4294966256  ;;  %v4481_v0 = vmov 0   ;;  %s5213_s14 = sld [smem:[#allocation32_spill]]  ;;  %s5214_s22 = sld [smem:[#allocation34_spill]]  ;;  %v247_v27 = vlaneseq  ;;  %v4482_v30 = vmov 1.0  }
 0x112   :  { %3833 = vset.pattern.permute.xlu0 %v4481_v0  ;;  %714 = vmatprep.mubr.bf16.mxu1 %v4481_v0  ;;  %s5215_s30 = sld [smem:[#allocation35_spill]]  ;;  %v3834_v37 = vld [vmem:[#allocation7 + $0x4] ss:$20 sps:$4 sm:$0xff]   ;;  %v3836_v38 = vld [vmem:[#allocation7] ss:$20 sps:$4 sm:$0xff]   ;;  %vm4484_vm2 = vmmov 0  }
 0x113   :  { %v248_v28 = vand.u32 127, %v247_v27  ;;  %v3837_v39 = vld [vmem:[#allocation7 + $0x8] ss:$20 sps:$4 sm:$0xff]   ;;  %v3839_v40 = vld [vmem:[#allocation7 + $0xc] ss:$20 sps:$4 sm:$0xff]   ;;  %682 = vmatprep.subr.bf16.mxu1 %v3834_v37  ;;  %s5216_s16 = sld [smem:[#allocation39_spill]] }
 0x114   :  { %v3840_v41 = vld [vmem:[#allocation7 + $0x2c] ss:$20 sps:$4 sm:$0xff]   ;;  %v3845_v42 = vld [vmem:[#allocation7 + $0x34] ss:$20 sps:$4 sm:$0xff]   ;;  %683 = vmatpush1.bf16.msra.mxu1 %v3836_v38  ;;  %v3843_v44 = vld [vmem:[#allocation7 + $0x30] ss:$20 sps:$4 sm:$0xff]  }
 0x115   :  { %v3842_v43 = vld [vmem:[#allocation7 + $0x28] ss:$20 sps:$4 sm:$0xff]   ;;  %684 = vmatprep.subr.bf16.mxu1 %v3840_v41  ;;  %v3848_v54 = vld [vmem:[#allocation7 + $0x50] ss:$20 sps:$4 sm:$0xff]   ;;  %v3849_v56 = vld [vmem:[#allocation7 + $0x58] ss:$20 sps:$4 sm:$0xff]  }
 0x116   :  { %v3846_v53 = vld [vmem:[#allocation7 + $0x54] ss:$20 sps:$4 sm:$0xff]   ;;  %v3851_v55 = vld [vmem:[#allocation7 + $0x5c] ss:$20 sps:$4 sm:$0xff]   ;;  %v3854_v58 = vld [vmem:[#allocation7 + $0x78] ss:$20 sps:$4 sm:$0xff]  }
 0x117   :  { %v245_v1 = vld [vmem:[%s5213_s14] sm:$0xff]  ;;  %v262_v3 = vld [vmem:[%s5214_s22 + $0x8] sm:$0xff]  ;;  %v263_v4 = vld [vmem:[%s5214_s22 + $0x10] sm:$0xff]  ;;  %v4904_v41 = vshrl.u32 %v247_v27, 7  ;;  %s5217_s24 = sld [smem:[#allocation33_spill]]  ;;  %vm857_vm3 = vcmask 130048  }
 0x118   :  { %v261_v2 = vld [vmem:[%s5214_s22] sm:$0xff]  ;;  %250 = vperm.xlu0 %3833, %v245_v1   ;;  %v264_v5 = vld [vmem:[%s5214_s22 + $0x18] sm:$0xff]  ;;  %v246_v6 = vld [vmem:[%s5213_s14 + $0x8] sm:$0xff]  ;;  %685 = vmatpush1.bf16.msra.mxu1 %v3842_v43  ;;  %s5218_s2 = sld [smem:[#allocation41_spill]]  ;;  %vm2847_vm4 = vcmask 1041409   ;;  %s4485_s7 = smov [#allocation23]  }
 0x119   :  { %v3767_v7 = vpack.c.bf16 %v262_v3, %v261_v2  ;;  %v3771_v8 = vpack.c.bf16 %v264_v5, %v263_v4  ;;  %v265_v9 = vld [vmem:[%s5214_s22 + $0x20] sm:$0xff]  ;;  %v266_v10 = vld [vmem:[%s5214_s22 + $0x28] sm:$0xff]  ;;  %v267_v11 = vld [vmem:[%s5214_s22 + $0x30] sm:$0xff]  ;;  %686 = vmatprep.subr.bf16.mxu1 %v3846_v53  ;;  %v459_v43 = vsub.s32 2, %v4904_v41 }
 0x11a   :  { %v268_v12 = vld [vmem:[%s5214_s22 + $0x38] sm:$0xff]  ;;  %v3775_v13 = vpack.c.bf16 %v266_v10, %v265_v9  ;;  %v269_v14 = vld [vmem:[%s5214_s22 + $0x40] sm:$0xff]  ;;  %v270_v15 = vld [vmem:[%s5214_s22 + $0x48] sm:$0xff] }
 0x11b   :  { %3768 = vmatprep.subr.bf16.mxu0 %v3767_v7  ;;  %v3779_v16 = vpack.c.bf16 %v268_v12, %v267_v11  ;;  %v271_v17 = vld [vmem:[%s5214_s22 + $0x50] sm:$0xff]  ;;  %v272_v18 = vld [vmem:[%s5214_s22 + $0x58] sm:$0xff]  ;;  %v3783_v19 = vpack.c.bf16 %v270_v15, %v269_v14  ;;  %v273_v20 = vld [vmem:[%s5214_s22 + $0x60] sm:$0xff]  ;;  %v4483_v14 = vmov 0.0  }
 0x11c   :  { %253 = vperm.xlu0 %3833, %v246_v6   ;;  %3770 = vmatpush3.bf16.msra.mxu0 %v3767_v7  ;;  %v274_v21 = vld [vmem:[%s5214_s22 + $0x68] sm:$0xff]  ;;  %v3787_v22 = vpack.c.bf16 %v272_v18, %v271_v17  ;;  %v275_v23 = vld [vmem:[%s5214_s22 + $0x70] sm:$0xff]  ;;  %v276_v24 = vld [vmem:[%s5214_s22 + $0x78] sm:$0xff] }
 0x11d   :  { %3772 = vmatprep.subr.bf16.mxu0 %v3771_v8  ;;  %v3791_v25 = vpack.c.bf16 %v274_v21, %v273_v20  ;;  %v3795_v26 = vpack.c.bf16 %v276_v24, %v275_v23  ;;  %v352_v32 = vld [vmem:[%s5215_s30] sm:$0xff]  ;;  %687 = vmatpush1.bf16.msra.mxu1 %v3848_v54  ;;  %v3857_v59 = vld [vmem:[#allocation7 + $0x84] ss:$20 sps:$4 sm:$0xff]   ;;  %v3869_v3 = vld [vmem:[#allocation7 + $0xd4] ss:$20 sps:$4 sm:$0xff]  }
 0x11e   :  { %v3852_v57 = vld [vmem:[#allocation7 + $0x7c] ss:$20 sps:$4 sm:$0xff]   ;;  %v3855_v60 = vld [vmem:[#allocation7 + $0x80] ss:$20 sps:$4 sm:$0xff]   ;;  %v3858_v61 = vld [vmem:[#allocation7 + $0xa4] ss:$20 sps:$4 sm:$0xff]  }
 0x11f   :  { %688 = vmatprep.subr.bf16.mxu1 %v3852_v57  ;;  %v3860_v62 = vld [vmem:[#allocation7 + $0xa0] ss:$20 sps:$4 sm:$0xff]   ;;  %v3861_v63 = vld [vmem:[#allocation7 + $0xa8] ss:$20 sps:$4 sm:$0xff]   ;;  %v3867_v5 = vld [vmem:[#allocation7 + $0xd0] ss:$20 sps:$4 sm:$0xff]  }
 0x120   :  { %3774 = vmatpush3.bf16.msra.mxu0 %v3771_v8  ;;  %v3863_v1 = vld [vmem:[#allocation7 + $0xac] ss:$20 sps:$4 sm:$0xff]   ;;  %v3866_v4 = vld [vmem:[#allocation7 + $0xc8] ss:$20 sps:$4 sm:$0xff]   ;;  %v3872_v8 = vld [vmem:[#allocation7 + $0xf0] ss:$20 sps:$4 sm:$0xff]  }
 0x121   :  { %3776 = vmatprep.subr.bf16.mxu0 %v3775_v13  ;;  %689 = vmatpush1.bf16.msra.mxu1 %v3854_v58  ;;  %v3864_v2 = vld [vmem:[#allocation7 + $0xcc] ss:$20 sps:$4 sm:$0xff]   ;;  %v3870_v6 = vld [vmem:[#allocation7 + $0xf4] ss:$20 sps:$4 sm:$0xff]   ;;  %v3875_v7 = vld [vmem:[#allocation7 + $0xfc] ss:$20 sps:$4 sm:$0xff]  }
 0x122   :  { %690 = vmatprep.subr.bf16.mxu1 %v3858_v61  ;;  %v3873_v9 = vld [vmem:[#allocation7 + $0xf8] ss:$20 sps:$4 sm:$0xff]   ;;  %v3876_v10 = vld [vmem:[#allocation7 + $0x11c] ss:$20 sps:$4 sm:$0xff]  }
 0x123   :  { %v3881_v11 = vld [vmem:[#allocation7 + $0x124] ss:$20 sps:$4 sm:$0xff]   ;;  %v3191_v23 = vld [vmem:[#allocation2] ss:$0 sm:$0xff] }
 0x124   :  { %3778 = vmatpush3.bf16.msra.mxu0 %v3775_v13  ;;  %v3878_v12 = vld [vmem:[#allocation7 + $0x118] ss:$20 sps:$4 sm:$0xff]   ;;  %v3879_v13 = vld [vmem:[#allocation7 + $0x120] ss:$20 sps:$4 sm:$0xff]   ;;  %v3886_v37 = vld [vmem:[#allocation7 + $0xb0] ss:$20 sps:$4 sm:$0xff]  }
 0x125   :  { %3780 = vmatprep.subr.bf16.mxu0 %v3779_v16  ;;  %691 = vmatpush1.bf16.msra.mxu1 %v3860_v62  ;;  %v3887_v38 = vld [vmem:[#allocation7 + $0xd8] ss:$20 sps:$4 sm:$0xff]  }
 0x126   :  { %692 = vmatprep.subr.bf16.mxu1 %v3864_v2 }
 0x128   :  { %3782 = vmatpush3.bf16.msra.mxu0 %v3779_v16 }
 0x129   :  { %3784 = vmatprep.subr.bf16.mxu0 %v3783_v19  ;;  %693 = vmatpush1.bf16.msra.mxu1 %v3866_v4 }
 0x12a   :  { %694 = vmatprep.subr.bf16.mxu1 %v3870_v6 }
 0x12c   :  { %3786 = vmatpush3.bf16.msra.mxu0 %v3783_v19 }
 0x12d   :  { %3788 = vmatprep.subr.bf16.mxu0 %v3787_v22  ;;  %695 = vmatpush1.bf16.msra.mxu1 %v3872_v8 }
 0x12e   :  { %696 = vmatprep.subr.bf16.mxu1 %v3876_v10 }
 0x130   :  { %3790 = vmatpush3.bf16.msra.mxu0 %v3787_v22 }
 0x131   :  { %3792 = vmatprep.subr.bf16.mxu0 %v3791_v25  ;;  %697 = vmatpush1.bf16.msra.mxu1 %v3878_v12 }
 0x132   :  { %3579 = vmatprep.subr.bf16.mxu1 %v4483_v14 }
 0x134   :  { %3794 = vmatpush3.bf16.msra.mxu0 %v3791_v25 }
 0x135   :  { %3796 = vmatprep.subr.bf16.mxu0 %v3795_v26 }
 0x138   :  { %3798 = vmatpush3.bf16.msra.mxu0 %v3795_v26 }
 0x139   :  { %725 = vmatprep.subr.bf16.mxu0 %v3839_v40  ;;  %v3889_v40 = vld [vmem:[#allocation7 + $0x128] ss:$20 sps:$4 sm:$0xff]  }
 0x197   :  { %v251_v29 = vpop.permute.xlu0 %250 }
 0x198   :  { %vm255_vm0 = vcmp.eq.s32.totalorder %v251_v29, %v248_v28 }
 0x199   :  { %3576 = vmatprep.mubr.msk.f32.mxu0 %vm255_vm0, %v4482_v30 }
 0x19b   :  { %v254_v31 = vpop.permute.xlu0 %253 }
 0x19c   :  { %vm256_vm1 = vcmp.eq.s32.totalorder %v254_v31, %v248_v28  ;;  %v3192_v28 = vld [vmem:[#allocation5] ss:$0 sm:$0xff] }
 0x19d   :  { %3577 = vmatmul.mubr.msk.f32.vlgmr.msra.gmra.mrb[0].mxu0 %vm256_vm1, %v4482_v30 }
 0x19e   :  { %757 = vmatprep.mubr.bf16.mxu0 %v4481_v0  ;;  %726 = vmatpush1.bf16.msra.mxu0 %v3837_v39  ;;  %v3888_v39 = vld [vmem:[#allocation7 + $0x100] ss:$20 sps:$4 sm:$0xff]  }
 0x19f   :  { %727 = vmatprep.subr.bf16.mxu0 %v3845_v42  ;;  %v4907_v42 = vsub.s32 0, %v4904_v41 }
 0x1a2   :  { %728 = vmatpush1.bf16.msra.mxu0 %v3843_v44  ;;  %v447_v44 = vld [vmem:[%s5216_s16] sm:$0x1f] }
 0x1a3   :  { %729 = vmatprep.subr.bf16.mxu0 %v3851_v55  ;;  %v460_v27 = vrot.slane %v447_v44, %v459_v43 }
 0x1a6   :  { %730 = vmatpush1.bf16.msra.mxu0 %v3849_v56 }
 0x1a7   :  { %731 = vmatprep.subr.bf16.mxu0 %v3857_v59 }
 0x1aa   :  { %732 = vmatpush1.bf16.msra.mxu0 %v3855_v60 }
 0x1ab   :  { %733 = vmatprep.subr.bf16.mxu0 %v3863_v1 }
 0x1ae   :  { %734 = vmatpush1.bf16.msra.mxu0 %v3861_v63 }
 0x1af   :  { %735 = vmatprep.subr.bf16.mxu0 %v3869_v3 }
 0x1b2   :  { %736 = vmatpush1.bf16.msra.mxu0 %v3867_v5 }
 0x1b3   :  { %737 = vmatprep.subr.bf16.mxu0 %v3875_v7  ;;  %v467_v7 = vsub.s32 4, %v4904_v41 }
 0x1b5   :  { %v468_v8 = vrot.slane %v447_v44, %v467_v7 }
 0x1b6   :  { %738 = vmatpush1.bf16.msra.mxu0 %v3873_v9 }
 0x1b7   :  { %739 = vmatprep.subr.bf16.mxu0 %v3881_v11 }
 0x1ba   :  { %740 = vmatpush1.bf16.msra.mxu0 %v3879_v13 }
 0x1bb   :  { %3611 = vmatprep.subr.bf16.mxu0 %v4483_v14 }
 0x270   :  { %v3578_v33 = vpop.f32.mrb[0].mxu0 }
 0x271   :  { %v343_v34 = vpop.f32.mrb[1].mxu0  ;;  %v354_v36 = vadd.f32 %v3578_v33, %v352_v32 }
 0x272   :  { %v353_v35 = vadd.f32 %v352_v32, %v343_v34  ;;  %v3882_v32 = vld [vmem:[#allocation7 + $0x10] ss:$20 sps:$4 sm:$0xff]   ;;  %v3883_v34 = vld [vmem:[#allocation7 + $0x38] ss:$20 sps:$4 sm:$0xff]  }
 0x274   :  { %357 = vadd.xlane.f32.xlu1 %v353_v35 }
 0x278   :  { %359 = vadd.xlane.f32.xlu1 %v354_v36 }
 0x301   :  { %v358_v45 = vpop.xlane.xlu1 %357 }
 0x302   :  { %v362_v46 = vmul.f32 0.0078125, %v358_v45  ;;  %v4914_v45 = vsub.s32 1, %v4904_v41 }
 0x304   :  { %v4871_v47 = vsub.f32 %v353_v35, %v362_v46  ;;  %v3884_v35 = vld [vmem:[#allocation7 + $0x60] ss:$20 sps:$4 sm:$0xff]   ;;  %v463_v46 = vsub.s32 3, %v4904_v41 }
 0x305   :  { %v360_v48 = vpop.xlane.xlu1 %359 }
 0x306   :  { %v363_v49 = vmul.f32 0.0078125, %v360_v48  ;;  %v366_v50 = vmul.f32 %v4871_v47, %v4871_v47 }
 0x308   :  { %v4875_v51 = vsub.f32 %v354_v36, %v363_v49  ;;  %368 = vadd.xlane.f32.xlu0 %v366_v50  ;;  %v3885_v36 = vld [vmem:[#allocation7 + $0x88] ss:$20 sps:$4 sm:$0xff]   ;;  %v456_v50 = vrot.slane %v447_v44, %v4914_v45 }
 0x30a   :  { %v367_v52 = vmul.f32 %v4875_v51, %v4875_v51 }
 0x30c   :  { %370 = vadd.xlane.f32.xlu1 %v367_v52 }
 0x395   :  { %v369_v15 = vpop.xlane.xlu0 %368 }
 0x396   :  { %v372_v16 = vmul.f32 0.0078125, %v369_v15 }
 0x398   :  { %v374_v17 = vadd.f32 1e-12, %v372_v16 }
 0x399   :  { %v371_v18 = vpop.xlane.xlu1 %370 }
 0x39a   :  { %4066 = vrsqrt.f32 %v374_v17  ;;  %v373_v19 = vmul.f32 0.0078125, %v371_v18 }
 0x39c   :  { %v375_v20 = vadd.f32 1e-12, %v373_v19 }
 0x39e   :  { %4068 = vrsqrt.f32 %v375_v20 }
 0x3a4   :  { %v4067_v21 = vpop.eup %4066 }
 0x3a5   :  { %v378_v22 = vmul.f32 %v4067_v21, %v4871_v47  ;;  %v452_v47 = vrot.slane %v447_v44, %v4907_v42 }
 0x3a7   :  { %v386_v26 = vmul.f32 %v3191_v23, %v378_v22 }
 0x3a8   :  { %v4069_v24 = vpop.eup %4068 }
 0x3a9   :  { %v379_v25 = vmul.f32 %v4069_v24, %v4875_v51  ;;  %v4883_v30 = vadd.f32 %v3192_v28, %v386_v26  ;;  %v464_v51 = vrot.slane %v447_v44, %v463_v46 }
 0x3ab   :  { %v387_v29 = vmul.f32 %v3191_v23, %v379_v25  ;;  %v4942_v25 = vld [vmem:[%s5217_s24] sm:$0xff] }
 0x3ad   :  { %v4885_v31 = vadd.f32 %v3192_v28, %v387_v29 }
 0x3af   :  { %v398_v33 = vpack.c.bf16 %v4885_v31, %v4883_v30 }
 0x3b1   :  { %715 = vmatmul.mubr.bf16.vlgmr.msra.gmra.mrb[0].mxu1 %v398_v33  ;;  %758 = vmatmul.mubr.bf16.vlgmr.msra.gmra.mrb[4].mxu0 %v398_v33 }
 0x3b2   :  { %3580 = vmatpush3.bf16.msra.mxu1 %v3882_v32  ;;  %3595 = vmatprep.mubr.msk.bf16.mxu1 %vm4484_vm2, %v4483_v14  ;;  %v4948_v32 = vld [vmem:[%s5217_s24 + $0x8] sm:$0xff]  ;;  %s3172_s24 = sshll.u32 %s4485_s7, 4  ;;  %s3173_s24 = int_to_ptr.vmem [resolvable:$true] %s3172_s24 }
 0x3b3   :  { %3581 = vmatprep.subr.bf16.mxu1 %v4483_v14  ;;  %3613 = vmatprep.mubr.msk.bf16.mxu0 %vm4484_vm2, %v4483_v14  ;;  %s4422_s17 = scalar_lea.vmem %s3173_s24, 32  ;;  %p4427_p7 = scmp.lt.s32.totalorder %s3173_s24, %s3173_s24 }
 0x3b4   :  { %p4423_p6 = scmp.ne.s32.totalorder %s3173_s24, %s4422_s17  ;;  %p4428_p8 = scmp.lt.s32.totalorder %s4422_s17, %s4422_s17 }
 0x3b6   :  { %3582 = vmatpush3.bf16.msra.mxu1 %v3883_v34  ;;  %p4429_p9 = por %p4428_p8, %p4427_p7 }
 0x3b7   :  { %3583 = vmatprep.subr.bf16.mxu1 %v4483_v14 }
 0x3b8   :  { %p4430_p10 = pnand %p4429_p9, %p4423_p6 }
 0x3ba   :  { %3584 = vmatpush3.bf16.msra.mxu1 %v3884_v35 }
 0x3bb   :  { %3585 = vmatprep.subr.bf16.mxu1 %v4483_v14 }
 0x3be   :  { %3586 = vmatpush3.bf16.msra.mxu1 %v3885_v36 }
 0x3bf   :  { %3587 = vmatprep.subr.bf16.mxu1 %v4483_v14 }
 0x3c2   :  { %3588 = vmatpush3.bf16.msra.mxu1 %v3886_v37 }
 0x3c3   :  { %3589 = vmatprep.subr.bf16.mxu1 %v4483_v14 }
 0x3c6   :  { %3590 = vmatpush3.bf16.msra.mxu1 %v3887_v38 }
 0x3c7   :  { %3591 = vmatprep.subr.bf16.mxu1 %v4483_v14 }
 0x3ca   :  { %3592 = vmatpush3.bf16.msra.mxu1 %v3888_v39 }
 0x3cb   :  { %3593 = vmatprep.subr.bf16.mxu1 %v4483_v14 }
 0x3ce   :  { %3594 = vmatpush3.bf16.msra.mxu1 %v3889_v40 }
 0x3cf   :  { %3599 = vmatprep.subr.bf16.mxu1 %v4483_v14 }
 0x3d1   :  { %3596 = vmatmul.mubr.bf16.vlgmr.msra.gmra.mrb[4].mxu1 %v398_v33 }
 0x3d2   :  { %3601 = vmatprep.mubr.msk.bf16.mxu1 %vm4484_vm2, %v4483_v14 }
 0x484   :  { %v716_v48 = vpop.f32.mrb[0].mxu1  ;;  %v759_v49 = vpop.f32.mrb[4].mxu0 }
 0x485   :  { %v718_v52 = vpop.f32.mrb[1].mxu1  ;;  %v761_v53 = vpop.f32.mrb[5].mxu0  ;;  %v717_v56 = vadd.f32 %v716_v48, %v452_v47  ;;  %v760_v57 = vadd.f32 %v759_v49, %v460_v27 }
 0x486   :  { %v720_v54 = vpop.f32.mrb[2].mxu1  ;;  %v763_v55 = vpop.f32.mrb[6].mxu0  ;;  %v719_v62 = vadd.f32 %v718_v52, %v456_v50  ;;  %v4923_v63 = vadd.f32 %v761_v53, %v464_v51 }
 0x487   :  { %v721_v58 = vadd.f32 %v720_v54, %v452_v47  ;;  %v764_v59 = vadd.f32 %v763_v55, %v460_v27  ;;  %v722_v60 = vpop.f32.mrb[3].mxu1  ;;  %v765_v61 = vpop.f32.mrb[7].mxu0 }
 0x488   :  { %v723_v1 = vadd.f32 %v722_v60, %v456_v50  ;;  %v4925_v2 = vadd.f32 %v765_v61, %v464_v51 }
 0x489   :  { %v809_v3 = vpack.c.bf16 %v721_v58, %v717_v56  ;;  %v881_v4 = vpack.c.bf16 %v764_v59, %v760_v57 }
 0x48a   :  { %v810_v5 = vpack.c.bf16 %v723_v1, %v719_v62  ;;  %v811_v6 = vpack.c.bf16 %v4925_v2, %v4923_v63  ;;  %v3235_v2 = vld [vmem:[%s5172_s9] ss:$0 sm:$0xff] }
 0x48c   :  { %3600 = vmatpush3.bf16.xpose.msra.mxu1 %v810_v5  ;;  %v3890_v5 = vld [vmem:[#allocation8] sm:$0xff]  }
 0x48d   :  { %3605 = vmatprep.subr.bf16.mxu1 %v4483_v14 }
 0x493   :  { %3602 = vmatmul.mubr.bf16.vlgmr.msra.gmra.mrb[8].mxu1 %v809_v3 }
 0x494   :  { %3606 = vmatpush3.bf16.xpose.msra.mxu1 %v881_v4  ;;  %3607 = vmatprep.mubr.msk.bf16.mxu1 %vm4484_vm2, %v4483_v14 }
 0x495   :  { %3623 = vmatprep.subr.bf16.mxu1 %v4483_v14 }
 0x49b   :  { %3608 = vmatmul.mubr.bf16.vlgmr.msra.gmra.mrb[12].mxu1 %v809_v3 }
 0x49c   :  { %3639 = vmatprep.mubr.msk.bf16.mxu1 %vm4484_vm2, %v4483_v14  ;;  %3624 = vmatpush3.bf16.msra.mxu1 %v3890_v5  ;;  %v3915_v5 = vld [vmem:[#allocation10 + $0x54] ss:$8 sps:$4 sm:$0xff]  }
 0x49d   :  { %3625 = vmatprep.subr.bf16.mxu1 %v4483_v14 }
 0x4a4   :  { %v802_v9 = vpop.f32.mrb[4].mxu1 }
 0x4a5   :  { %v3597_v10 = vpop.f32.mrb[5].mxu1  ;;  %v803_v12 = vadd.f32 %v802_v9, %v468_v8  ;;  %v3892_v9 = vld [vmem:[#allocation8 + $0x10] sm:$0xff]  }
 0x4a6   :  { %v805_v11 = vpop.f32.mrb[6].mxu1  ;;  %v3893_v10 = vld [vmem:[#allocation8 + $0x18] sm:$0xff]  }
 0x4a7   :  { %v806_v13 = vadd.f32 %v805_v11, %v468_v8  ;;  %v3598_v15 = vpop.f32.mrb[7].mxu1  ;;  %v3891_v8 = vld [vmem:[#allocation8 + $0x8] sm:$0xff]   ;;  %v3894_v11 = vld [vmem:[#allocation8 + $0x20] sm:$0xff]  }
 0x4a8   :  { %3626 = vmatpush3.bf16.msra.mxu1 %v3891_v8  ;;  %v3913_v8 = vld [vmem:[#allocation10 + $0x50] ss:$8 sps:$4 sm:$0xff]  }
 0x4a9   :  { %v882_v16 = vpack.c.bf16 %v806_v13, %v803_v12  ;;  %3627 = vmatprep.subr.bf16.mxu1 %v4483_v14  ;;  %v3895_v12 = vld [vmem:[#allocation8 + $0x28] sm:$0xff]   ;;  %v3896_v13 = vld [vmem:[#allocation8 + $0x30] sm:$0xff]  }
 0x4ab   :  { %3612 = vmatpush3.bf16.msra.mxu0 %v882_v16 }
 0x4ac   :  { %3617 = vmatprep.subr.bf16.mxu0 %v4483_v14  ;;  %3628 = vmatpush3.bf16.msra.mxu1 %v3892_v9  ;;  %v3918_v9 = vld [vmem:[#allocation10 + $0x64] ss:$8 sps:$4 sm:$0xff]  }
 0x4ad   :  { %3629 = vmatprep.subr.bf16.mxu1 %v4483_v14 }
 0x4b0   :  { %3630 = vmatpush3.bf16.msra.mxu1 %v3893_v10  ;;  %v3916_v10 = vld [vmem:[#allocation10 + $0x60] ss:$8 sps:$4 sm:$0xff]  }
 0x4b1   :  { %3631 = vmatprep.subr.bf16.mxu1 %v4483_v14 }
 0x4b4   :  { %3632 = vmatpush3.bf16.msra.mxu1 %v3894_v11  ;;  %v3921_v11 = vld [vmem:[#allocation10 + $0x74] ss:$8 sps:$4 sm:$0xff]  }
 0x4b5   :  { %3633 = vmatprep.subr.bf16.mxu1 %v4483_v14 }
 0x4b8   :  { %3634 = vmatpush3.bf16.msra.mxu1 %v3895_v12  ;;  %v3919_v12 = vld [vmem:[#allocation10 + $0x70] ss:$8 sps:$4 sm:$0xff]  }
 0x4b9   :  { %3635 = vmatprep.subr.bf16.mxu1 %v4483_v14 }
 0x4bc   :  { %3636 = vmatpush3.bf16.msra.mxu1 %v3896_v13 }
 0x4bd   :  { %3637 = vmatprep.subr.bf16.mxu1 %v4483_v14 }
 0x566   :  { %v846_v17 = vpop.f32.mrb[8].mxu1 }
 0x567   :  { %v3603_v18 = vpop.f32.mrb[9].mxu1  ;;  %v853_v33 = vmul.f32 0.125, %v846_v17 }
 0x568   :  { %v849_v19 = vpop.f32.mrb[10].mxu1 }
 0x569   :  { %v3604_v20 = vpop.f32.mrb[11].mxu1  ;;  %v854_v36 = vmul.f32 0.125, %v849_v19  ;;  %v855_v38 = vadd.f32 %v853_v33, %v4942_v25 }
 0x56b   :  { %v858_v39 = vsel %vm857_vm3, %v855_v38, -inf  ;;  %v856_v40 = vadd.f32 %v854_v36, %v4948_v32 }
 0x56d   :  { %v861_v44 = vsel %vm857_vm3, %v856_v40, -inf }
 0x56e   :  { %v917_v21 = vpop.f32.mrb[12].mxu1 }
 0x56f   :  { %v924_v22 = vmul.f32 0.125, %v917_v21  ;;  %v3609_v23 = vpop.f32.mrb[13].mxu1 }
 0x570   :  { %v920_v24 = vpop.f32.mrb[14].mxu1 }
 0x571   :  { %v925_v26 = vmul.f32 0.125, %v920_v24  ;;  %v3610_v28 = vpop.f32.mrb[15].mxu1  ;;  %v926_v29 = vadd.f32 %v924_v22, %v4942_v25 }
 0x573   :  { %v928_v34 = vsel %vm857_vm3, %v926_v29, -inf  ;;  %v927_v35 = vadd.f32 %v925_v26, %v4948_v32 }
 0x574   :  { %929 = vmax.xlane.f32.xlu1 %v928_v34  ;;  %v3897_v34 = vld [vmem:[#allocation8 + $0x38] sm:$0xff]  }
 0x575   :  { %v931_v37 = vsel %vm857_vm3, %v927_v35, -inf  ;;  %3638 = vmatpush3.bf16.msra.mxu1 %v3897_v34 }
 0x578   :  { %932 = vmax.xlane.f32.xlu1 %v931_v37 }
 0x57c   :  { %859 = vmax.xlane.f32.xlu1 %v858_v39 }
 0x580   :  { %862 = vmax.xlane.f32.xlu1 %v861_v44 }
 0x601   :  { %v930_v47 = vpop.xlane.xlu1 %929 }
 0x602   :  { %v934_v27 = vsub.f32 %v926_v29, %v930_v47 }
 0x604   :  { %v936_v48 = vmul.f32 1.442695, %v934_v27 }
 0x605   :  { %v933_v49 = vpop.xlane.xlu1 %932 }
 0x606   :  { %4070 = vpow2.f32 %v936_v48  ;;  %v935_v50 = vsub.f32 %v927_v35, %v933_v49 }
 0x608   :  { %v938_v51 = vmul.f32 1.442695, %v935_v50  ;;  %v3898_v50 = vld [vmem:[#allocation10] ss:$8 sps:$4 sm:$0xff]  }
 0x609   :  { %v860_v52 = vpop.xlane.xlu1 %859 }
 0x60a   :  { %4072 = vpow2.f32 %v938_v51  ;;  %v864_v53 = vsub.f32 %v855_v38, %v860_v52  ;;  %v3900_v51 = vld [vmem:[#allocation10 + $0x4] ss:$8 sps:$4 sm:$0xff]   ;;  %v3903_v52 = vld [vmem:[#allocation10 + $0x14] ss:$8 sps:$4 sm:$0xff]  }
 0x60c   :  { %v866_v54 = vmul.f32 1.442695, %v864_v53  ;;  %v3901_v53 = vld [vmem:[#allocation10 + $0x10] ss:$8 sps:$4 sm:$0xff]  }
 0x60d   :  { %v863_v55 = vpop.xlane.xlu1 %862 }
 0x60e   :  { %4074 = vpow2.f32 %v866_v54  ;;  %v865_v56 = vsub.f32 %v856_v40, %v863_v55 }
 0x610   :  { %v4071_v57 = vpop.eup %4070  ;;  %v868_v58 = vmul.f32 1.442695, %v865_v56 }
 0x611   :  { %v940_v59 = vsel %vm857_vm3, %v4071_v57, 0.0 }
 0x612   :  { %4076 = vpow2.f32 %v868_v58  ;;  %941 = vadd.xlane.f32.xlu1 %v940_v59 }
 0x614   :  { %v4073_v60 = vpop.eup %4072 }
 0x615   :  { %v943_v61 = vsel %vm857_vm3, %v4073_v60, 0.0 }
 0x616   :  { %944 = vadd.xlane.f32.xlu1 %v943_v61  ;;  %v3904_v61 = vld [vmem:[#allocation10 + $0x20] ss:$8 sps:$4 sm:$0xff]  }
 0x618   :  { %v4075_v62 = vpop.eup %4074 }
 0x619   :  { %v870_v1 = vsel %vm857_vm3, %v4075_v62, 0.0 }
 0x61a   :  { %871 = vadd.xlane.f32.xlu1 %v870_v1  ;;  %v3907_v1 = vld [vmem:[#allocation10 + $0x30] ss:$8 sps:$4 sm:$0xff]  }
 0x61c   :  { %v4077_v3 = vpop.eup %4076 }
 0x61d   :  { %v873_v4 = vsel %vm857_vm3, %v4077_v3, 0.0 }
 0x61e   :  { %874 = vadd.xlane.f32.xlu0 %v873_v4  ;;  %v3910_v4 = vld [vmem:[#allocation10 + $0x40] ss:$8 sps:$4 sm:$0xff]  }
 0x69f   :  { %v942_v15 = vpop.xlane.xlu1 %941 }
 0x6a0   :  { %4078 = vrcp.f32 %v942_v15 }
 0x6a3   :  { %v945_v16 = vpop.xlane.xlu1 %944 }
 0x6a4   :  { %4080 = vrcp.f32 %v945_v16 }
 0x6a7   :  { %v872_v17 = vpop.xlane.xlu1 %871 }
 0x6aa   :  { %v4079_v19 = vpop.eup %4078 }
 0x6ab   :  { %v875_v18 = vpop.xlane.xlu0 %874  ;;  %v948_v21 = vmul.f32 %v4079_v19, %v4071_v57 }
 0x6ac   :  { %4082 = vrcp.f32 %v875_v18 }
 0x6ad   :  { %4084 = vrcp.f32 %v872_v17 }
 0x6ae   :  { %v4081_v20 = vpop.eup %4080 }
 0x6af   :  { %v949_v22 = vmul.f32 %v4081_v20, %v4073_v60 }
 0x6b1   :  { %v950_v23 = vpack.c.bf16 %v949_v22, %v948_v21  ;;  %v3244_v21 = vld [vmem:[%s5173_s10] ss:$0 sm:$0xff] }
 0x6b3   :  { %3614 = vmatmul.mubr.msk.bf16.vlgmr.msra.gmra.mrb[8].mxu0 %vm857_vm3, %v950_v23 }
 0x6b4   :  { %3618 = vmatpush3.bf16.msra.mxu0 %v811_v6  ;;  %3619 = vmatprep.mubr.msk.bf16.mxu0 %vm4484_vm2, %v4483_v14 }
 0x6b5   :  { %1303 = vmatprep.subr.bf16.mxu0 %v3900_v51  ;;  %v3936_v51 = vld [vmem:[#allocation11 + $0x78] sm:$0xff]  }
 0x6b6   :  { %v4083_v24 = vpop.eup %4082 }
 0x6b7   :  { %v4085_v26 = vpop.eup %4084  ;;  %v879_v28 = vmul.f32 %v4083_v24, %v4077_v3  ;;  %v3912_v3 = vld [vmem:[#allocation10 + $0x44] ss:$8 sps:$4 sm:$0xff]  }
 0x6b8   :  { %v878_v29 = vmul.f32 %v4085_v26, %v4075_v62  ;;  %v3909_v62 = vld [vmem:[#allocation10 + $0x34] ss:$8 sps:$4 sm:$0xff]  }
 0x6ba   :  { %v880_v33 = vpack.c.bf16 %v879_v28, %v878_v29  ;;  %v3245_v28 = vld [vmem:[%s5174_s11] ss:$0 sm:$0xff] }
 0x6bf   :  { %3620 = vmatmul.mubr.msk.bf16.vlgmr.msra.gmra.mrb[8].mxu0 %vm857_vm3, %v880_v33 }
 0x6c0   :  { %1335 = vmatprep.mubr.bf16.mxu0 %v4481_v0  ;;  %1304 = vmatpush1.bf16.msra.mxu0 %v3898_v50  ;;  %v3935_v50 = vld [vmem:[#allocation11 + $0x30] sm:$0xff]  }
 0x6c1   :  { %1305 = vmatprep.subr.bf16.mxu0 %v3903_v52  ;;  %v3937_v52 = vld [vmem:[#allocation11 + $0x38] sm:$0xff]  }
 0x6c4   :  { %1306 = vmatpush1.bf16.msra.mxu0 %v3901_v53  ;;  %v1211_v53 = vld [vmem:[%s5176_s13] sm:$0x3] }
 0x792   :  { %v1032_v35 = vpop.f32.mrb[8].mxu0 }
 0x793   :  { %v3621_v36 = vpop.f32.mrb[9].mxu0 }
 0x794   :  { %v1035_v37 = vpop.f32.mrb[10].mxu0  ;;  %v3922_v36 = vld [vmem:[#allocation11 + $0x40] sm:$0xff]  }
 0x795   :  { %v1039_v38 = vpack.c.bf16 %v1035_v37, %v1032_v35  ;;  %v3622_v63 = vpop.f32.mrb[11].mxu0  ;;  %v3923_v37 = vld [vmem:[#allocation11] sm:$0xff]   ;;  %3447 = vmatprep.subr.bf16.mxu1 %v3922_v36 }
 0x796   :  { %v3925_v63 = vld [vmem:[#allocation11 + $0x8] sm:$0xff]  }
 0x797   :  { %3640 = vmatmul.mubr.bf16.vlgmr.msra.gmra.mrb[16].mxu1 %v1039_v38  ;;  %v3924_v38 = vld [vmem:[#allocation11 + $0x48] sm:$0xff]  }
 0x798   :  { %3448 = vmatpush3.bf16.msra.mxu1 %v3923_v37 }
 0x799   :  { %3449 = vmatprep.subr.bf16.mxu1 %v3924_v38 }
 0x79c   :  { %3450 = vmatpush3.bf16.msra.mxu1 %v3925_v63 }
 0x86a   :  { %v1145_v6 = vpop.f32.mrb[16].mxu1 }
 0x86b   :  { %v1146_v39 = vadd.f32 %v3235_v2, %v1145_v6  ;;  %v3641_v40 = vpop.f32.mrb[17].mxu1  ;;  %v3927_v6 = vld [vmem:[#allocation11 + $0x10] sm:$0xff]  }
 0x86c   :  { %v1148_v44 = vpop.f32.mrb[18].mxu1  ;;  %v3929_v40 = vld [vmem:[#allocation11 + $0x18] sm:$0xff]  }
 0x86d   :  { %v1149_v47 = vadd.f32 %v3235_v2, %v1148_v44  ;;  %v3642_v27 = vpop.f32.mrb[19].mxu1  ;;  %v1152_v48 = vadd.f32 %v1146_v39, %v4883_v30  ;;  %v3926_v2 = vld [vmem:[#allocation11 + $0x50] sm:$0xff]   ;;  %v3928_v39 = vld [vmem:[#allocation11 + $0x58] sm:$0xff]   ;;  %v3930_v44 = vld [vmem:[#allocation11 + $0x60] sm:$0xff]  }
 0x86e   :  { %3451 = vmatprep.subr.bf16.mxu1 %v3926_v2  ;;  %v3932_v27 = vld [vmem:[#allocation11 + $0x68] sm:$0xff]  }
 0x86f   :  { %1156 = vadd.xlane.f32.xlu1 %v1152_v48  ;;  %v1153_v49 = vadd.f32 %v1149_v47, %v4885_v31  ;;  %v3906_v31 = vld [vmem:[#allocation10 + $0x24] ss:$8 sps:$4 sm:$0xff]   ;;  %3452 = vmatpush3.bf16.msra.mxu1 %v3927_v6 }
 0x870   :  { %1307 = vmatprep.subr.bf16.mxu0 %v3906_v31  ;;  %3453 = vmatprep.subr.bf16.mxu1 %v3928_v39  ;;  %v3931_v47 = vld [vmem:[#allocation11 + $0x20] sm:$0xff]  }
 0x871   :  { %1158 = vadd.xlane.f32.xlu0 %v1153_v49  ;;  %1308 = vmatpush1.bf16.msra.mxu0 %v3904_v61 }
 0x872   :  { %1309 = vmatprep.subr.bf16.mxu0 %v3909_v62 }
 0x873   :  { %3454 = vmatpush3.bf16.msra.mxu1 %v3929_v40 }
 0x874   :  { %3455 = vmatprep.subr.bf16.mxu1 %v3930_v44 }
 0x875   :  { %1310 = vmatpush1.bf16.msra.mxu0 %v3907_v1 }
 0x876   :  { %1311 = vmatprep.subr.bf16.mxu0 %v3912_v3 }
 0x877   :  { %3456 = vmatpush3.bf16.msra.mxu1 %v3931_v47 }
 0x878   :  { %3457 = vmatprep.subr.bf16.mxu1 %v3932_v27 }
 0x879   :  { %1312 = vmatpush1.bf16.msra.mxu0 %v3910_v4 }
 0x87a   :  { %1313 = vmatprep.subr.bf16.mxu0 %v3915_v5 }
 0x87d   :  { %1314 = vmatpush1.bf16.msra.mxu0 %v3913_v8 }
 0x87e   :  { %1315 = vmatprep.subr.bf16.mxu0 %v3918_v9 }
 0x881   :  { %1316 = vmatpush1.bf16.msra.mxu0 %v3916_v10 }
 0x882   :  { %1317 = vmatprep.subr.bf16.mxu0 %v3921_v11 }
 0x885   :  { %1318 = vmatpush1.bf16.msra.mxu0 %v3919_v12 }
 0x8fc   :  { %v1157_v54 = vpop.xlane.xlu1 %1156 }
 0x8fd   :  { %v1160_v55 = vmul.f32 0.0078125, %v1157_v54  ;;  %v1216_v54 = vrot.slane %v1211_v53, %v4907_v42 }
 0x8fe   :  { %v1159_v56 = vpop.xlane.xlu0 %1158 }
 0x8ff   :  { %v1162_v57 = vsub.f32 %v1152_v48, %v1160_v55  ;;  %v1161_v58 = vmul.f32 0.0078125, %v1159_v56  ;;  %v3933_v48 = vld [vmem:[#allocation11 + $0x28] sm:$0xff]   ;;  %v1220_v55 = vrot.slane %v1211_v53, %v4914_v45 }
 0x900   :  { %3458 = vmatpush3.bf16.msra.mxu1 %v3933_v48 }
 0x901   :  { %v1163_v59 = vsub.f32 %v1153_v49, %v1161_v58  ;;  %v1164_v60 = vmul.f32 %v1162_v57, %v1162_v57  ;;  %v3934_v49 = vld [vmem:[#allocation11 + $0x70] sm:$0xff]  }
 0x902   :  { %3459 = vmatprep.subr.bf16.mxu1 %v3934_v49 }
 0x903   :  { %1166 = vadd.xlane.f32.xlu1 %v1164_v60  ;;  %v1165_v30 = vmul.f32 %v1163_v59, %v1163_v59 }
 0x904   :  { %3460 = vmatpush3.bf16.msra.mxu1 %v3935_v50 }
 0x905   :  { %1168 = vadd.xlane.f32.xlu0 %v1165_v30  ;;  %3461 = vmatprep.subr.bf16.mxu1 %v3936_v51  ;;  %v3262_v51 = vld [vmem:[%s5178_s15] ss:$0 sm:$0xff] }
 0x908   :  { %3462 = vmatpush3.bf16.msra.mxu1 %v3937_v52 }
 0x990   :  { %v1167_v13 = vpop.xlane.xlu1 %1166 }
 0x991   :  { %v1170_v15 = vmul.f32 0.0078125, %v1167_v13 }
 0x992   :  { %v1169_v16 = vpop.xlane.xlu0 %1168 }
 0x993   :  { %v1172_v17 = vadd.f32 1e-12, %v1170_v15  ;;  %v1171_v18 = vmul.f32 0.0078125, %v1169_v16 }
 0x995   :  { %4086 = vrsqrt.f32 %v1172_v17  ;;  %v1173_v19 = vadd.f32 1e-12, %v1171_v18 }
 0x997   :  { %4088 = vrsqrt.f32 %v1173_v19 }
 0x99f   :  { %v4087_v20 = vpop.eup %4086 }
 0x9a0   :  { %v1176_v22 = vmul.f32 %v4087_v20, %v1162_v57 }
 0x9a1   :  { %v4089_v23 = vpop.eup %4088 }
 0x9a2   :  { %v1177_v24 = vmul.f32 %v4089_v23, %v1163_v59  ;;  %v1184_v26 = vmul.f32 %v3244_v21, %v1176_v22 }
 0x9a4   :  { %v1185_v29 = vmul.f32 %v3244_v21, %v1177_v24  ;;  %v4987_v33 = vadd.f32 %v3245_v28, %v1184_v26 }
 0x9a6   :  { %v4989_v34 = vadd.f32 %v3245_v28, %v1185_v29 }
 0x9a8   :  { %v1194_v35 = vpack.c.bf16 %v4989_v34, %v4987_v33 }
 0x9aa   :  { %1336 = vmatmul.mubr.bf16.vlgmr.msra.gmra.mrb[12].mxu0 %v1194_v35 }
 0x9ab   :  { %1920 = vmatprep.mubr.bf16.mxu0 %v4481_v0 }
 0xa7d   :  { %v1337_v56 = vpop.f32.mrb[12].mxu0 }
 0xa7e   :  { %v1338_v57 = vadd.f32 %v1337_v56, %v1216_v54  ;;  %v1339_v58 = vpop.f32.mrb[13].mxu0 }
 0xa7f   :  { %v1340_v59 = vadd.f32 %v1339_v58, %v1220_v55  ;;  %v1341_v60 = vpop.f32.mrb[14].mxu0 }
 0xa80   :  { %v1350_v30 = vmul.f32 %v1338_v57, %v1338_v57  ;;  %v1342_v31 = vadd.f32 %v1341_v60, %v1216_v54  ;;  %v1343_v61 = vpop.f32.mrb[15].mxu0  ;;  %v1346_v37 = vmul.f32 0.5, %v1338_v57 }
 0xa81   :  { %v1351_v62 = vmul.f32 %v1340_v59, %v1340_v59  ;;  %v1344_v1 = vadd.f32 %v1343_v61, %v1220_v55  ;;  %v1347_v2 = vmul.f32 0.5, %v1340_v59  ;;  %v3941_v61 = vld [vmem:[#allocation7 + $0x148] ss:$20 sps:$4 sm:$0xff]  }
 0xa82   :  { %v1354_v3 = vmul.f32 %v1350_v30, %v1338_v57  ;;  %v1352_v4 = vmul.f32 %v1342_v31, %v1342_v31  ;;  %v1348_v38 = vmul.f32 0.5, %v1342_v31  ;;  %v3938_v30 = vld [vmem:[#allocation7 + $0x140] ss:$20 sps:$4 sm:$0xff]  }
 0xa83   :  { %v1355_v5 = vmul.f32 %v1351_v62, %v1340_v59  ;;  %v1353_v8 = vmul.f32 %v1344_v1, %v1344_v1  ;;  %v1349_v6 = vmul.f32 0.5, %v1344_v1  ;;  %v3943_v62 = vld [vmem:[#allocation7 + $0x14c] ss:$20 sps:$4 sm:$0xff]  }
 0xa84   :  { %v1358_v9 = vmul.f32 0.044715, %v1354_v3  ;;  %v1356_v10 = vmul.f32 %v1352_v4, %v1342_v31  ;;  %v3949_v3 = vld [vmem:[#allocation7 + $0x174] ss:$20 sps:$4 sm:$0xff]   ;;  %1931 = vmatprep.subr.bf16.mxu1 %v3943_v62 }
 0xa85   :  { %v1359_v11 = vmul.f32 0.044715, %v1355_v5  ;;  %v1357_v12 = vmul.f32 %v1353_v8, %v1344_v1  ;;  %v3944_v4 = vld [vmem:[#allocation7 + $0x168] ss:$20 sps:$4 sm:$0xff]   ;;  %v3947_v5 = vld [vmem:[#allocation7 + $0x170] ss:$20 sps:$4 sm:$0xff]  }
 0xa86   :  { %v1362_v13 = vadd.f32 %v1358_v9, %v1338_v57  ;;  %v1360_v15 = vmul.f32 0.044715, %v1356_v10 }
 0xa87   :  { %v1363_v16 = vadd.f32 %v1359_v11, %v1340_v59  ;;  %v1361_v17 = vmul.f32 0.044715, %v1357_v12 }
 0xa88   :  { %v1366_v18 = vmul.f32 0.7978846, %v1362_v13  ;;  %v1364_v19 = vadd.f32 %v1360_v15, %v1342_v31  ;;  %v3940_v31 = vld [vmem:[#allocation7 + $0x144] ss:$20 sps:$4 sm:$0xff]   ;;  %v3952_v15 = vld [vmem:[#allocation7 + $0x194] ss:$20 sps:$4 sm:$0xff]  }
 0xa89   :  { %v1367_v20 = vmul.f32 0.7978846, %v1363_v16  ;;  %v1365_v21 = vadd.f32 %v1361_v17, %v1344_v1  ;;  %v3946_v1 = vld [vmem:[#allocation7 + $0x16c] ss:$20 sps:$4 sm:$0xff]   ;;  %1888 = vmatprep.subr.bf16.mxu0 %v3940_v31  ;;  %v3950_v16 = vld [vmem:[#allocation7 + $0x190] ss:$20 sps:$4 sm:$0xff]  }
 0xa8a   :  { %4090 = vtanh.f32 %v1366_v18  ;;  %v1368_v22 = vmul.f32 0.7978846, %v1364_v19  ;;  %1889 = vmatpush1.bf16.msra.mxu0 %v3938_v30  ;;  %v3955_v17 = vld [vmem:[#allocation7 + $0x19c] ss:$20 sps:$4 sm:$0xff]   ;;  %v3953_v18 = vld [vmem:[#allocation7 + $0x198] ss:$20 sps:$4 sm:$0xff]  }
 0xa8b   :  { %4092 = vtanh.f32 %v1367_v20  ;;  %v1369_v23 = vmul.f32 0.7978846, %v1365_v21  ;;  %1890 = vmatprep.subr.bf16.mxu0 %v3946_v1  ;;  %v3958_v19 = vld [vmem:[#allocation7 + $0x1bc] ss:$20 sps:$4 sm:$0xff]   ;;  %v3956_v20 = vld [vmem:[#allocation7 + $0x1b8] ss:$20 sps:$4 sm:$0xff]  }
 0xa8c   :  { %4094 = vtanh.f32 %v1368_v22  ;;  %v3961_v21 = vld [vmem:[#allocation7 + $0x1c4] ss:$20 sps:$4 sm:$0xff]   ;;  %v3959_v22 = vld [vmem:[#allocation7 + $0x1c0] ss:$20 sps:$4 sm:$0xff]  }
 0xa8d   :  { %4096 = vtanh.f32 %v1369_v23  ;;  %v3964_v23 = vld [vmem:[#allocation7 + $0x1e4] ss:$20 sps:$4 sm:$0xff]  }
 0xa8e   :  { %1891 = vmatpush1.bf16.msra.mxu0 %v3944_v4  ;;  %v3987_v1 = vld [vmem:[#allocation7 + $0x178] ss:$20 sps:$4 sm:$0xff]   ;;  %v3989_v4 = vld [vmem:[#allocation7 + $0x1c8] ss:$20 sps:$4 sm:$0xff]  }
 0xa8f   :  { %1892 = vmatprep.subr.bf16.mxu0 %v3952_v15 }
 0xa92   :  { %1893 = vmatpush1.bf16.msra.mxu0 %v3950_v16 }
 0xa93   :  { %1894 = vmatprep.subr.bf16.mxu0 %v3958_v19 }
 0xa94   :  { %v4091_v24 = vpop.eup %4090 }
 0xa95   :  { %v4093_v26 = vpop.eup %4092  ;;  %v1374_v28 = vadd.f32 1.0, %v4091_v24  ;;  %v3962_v24 = vld [vmem:[#allocation7 + $0x1e0] ss:$20 sps:$4 sm:$0xff]  }
 0xa96   :  { %v4095_v29 = vpop.eup %4094  ;;  %v1375_v35 = vadd.f32 1.0, %v4093_v26  ;;  %1895 = vmatpush1.bf16.msra.mxu0 %v3956_v20  ;;  %v3967_v26 = vld [vmem:[#allocation7 + $0x1ec] ss:$20 sps:$4 sm:$0xff]  }
 0xa97   :  { %v4097_v36 = vpop.eup %4096  ;;  %v1376_v63 = vadd.f32 1.0, %v4095_v29  ;;  %v1378_v40 = vmul.f32 %v1374_v28, %v1346_v37  ;;  %1896 = vmatprep.subr.bf16.mxu0 %v3964_v23  ;;  %v3965_v28 = vld [vmem:[#allocation7 + $0x1e8] ss:$20 sps:$4 sm:$0xff]   ;;  %v3970_v29 = vld [vmem:[#allocation7 + $0x20c] ss:$20 sps:$4 sm:$0xff]  }
 0xa98   :  { %v1377_v39 = vadd.f32 1.0, %v4097_v36  ;;  %v1379_v47 = vmul.f32 %v1375_v35, %v1347_v2  ;;  %v3968_v35 = vld [vmem:[#allocation7 + $0x208] ss:$20 sps:$4 sm:$0xff]   ;;  %v3971_v37 = vld [vmem:[#allocation7 + $0x210] ss:$20 sps:$4 sm:$0xff]  }
 0xa99   :  { %v1380_v44 = vmul.f32 %v1376_v63, %v1348_v38  ;;  %v3973_v36 = vld [vmem:[#allocation7 + $0x214] ss:$20 sps:$4 sm:$0xff]   ;;  %v3974_v63 = vld [vmem:[#allocation7 + $0x230] ss:$20 sps:$4 sm:$0xff]  }
 0xa9a   :  { %v1381_v27 = vmul.f32 %v1377_v39, %v1349_v6  ;;  %1897 = vmatpush1.bf16.msra.mxu0 %v3962_v24  ;;  %v3976_v38 = vld [vmem:[#allocation7 + $0x234] ss:$20 sps:$4 sm:$0xff]   ;;  %v3979_v2 = vld [vmem:[#allocation7 + $0x23c] ss:$20 sps:$4 sm:$0xff]   ;;  %v3977_v6 = vld [vmem:[#allocation7 + $0x238] ss:$20 sps:$4 sm:$0xff]  }
 0xa9b   :  { %v1382_v48 = vpack.c.bf16 %v1380_v44, %v1378_v40  ;;  %1898 = vmatprep.subr.bf16.mxu0 %v3970_v29  ;;  %v3982_v39 = vld [vmem:[#allocation7 + $0x25c] ss:$20 sps:$4 sm:$0xff]   ;;  %v3980_v40 = vld [vmem:[#allocation7 + $0x258] ss:$20 sps:$4 sm:$0xff]  }
 0xa9c   :  { %v1383_v49 = vpack.c.bf16 %v1381_v27, %v1379_v47  ;;  %v3985_v44 = vld [vmem:[#allocation7 + $0x264] ss:$20 sps:$4 sm:$0xff]   ;;  %v3983_v47 = vld [vmem:[#allocation7 + $0x260] ss:$20 sps:$4 sm:$0xff]  }
 0xa9e   :  { %1551 = vmatprep.mubr.bf16.mxu1 %v1383_v49  ;;  %1899 = vmatpush1.bf16.msra.mxu0 %v3968_v35 }
 0xa9f   :  { %1552 = vmatmul.mubr.bf16.vlgmr.msra.gmra.mrb[20].mxu1 %v1382_v48  ;;  %1900 = vmatprep.subr.bf16.mxu0 %v3976_v38 }
 0xaa0   :  { %1963 = vmatprep.mubr.bf16.mxu1 %v4481_v0  ;;  %1932 = vmatpush1.bf16.msra.mxu1 %v3941_v61  ;;  %v3986_v61 = vld [vmem:[#allocation7 + $0x150] ss:$20 sps:$4 sm:$0xff]  }
 0xaa1   :  { %1933 = vmatprep.subr.bf16.mxu1 %v3949_v3  ;;  %v3988_v3 = vld [vmem:[#allocation7 + $0x1a0] ss:$20 sps:$4 sm:$0xff]  }
 0xaa2   :  { %1901 = vmatpush1.bf16.msra.mxu0 %v3974_v63 }
 0xaa3   :  { %1902 = vmatprep.subr.bf16.mxu0 %v3982_v39 }
 0xaa4   :  { %1934 = vmatpush1.bf16.msra.mxu1 %v3947_v5  ;;  %v3990_v5 = vld [vmem:[#allocation7 + $0x1f0] ss:$20 sps:$4 sm:$0xff]  }
 0xaa5   :  { %1935 = vmatprep.subr.bf16.mxu1 %v3955_v17 }
 0xaa6   :  { %1903 = vmatpush1.bf16.msra.mxu0 %v3980_v40 }
 0xaa7   :  { %3643 = vmatprep.subr.bf16.mxu0 %v4483_v14 }
 0xaa8   :  { %1936 = vmatpush1.bf16.msra.mxu1 %v3953_v18 }
 0xaa9   :  { %1937 = vmatprep.subr.bf16.mxu1 %v3961_v21 }
 0xaac   :  { %1938 = vmatpush1.bf16.msra.mxu1 %v3959_v22 }
 0xaad   :  { %1939 = vmatprep.subr.bf16.mxu1 %v3967_v26 }
 0xab0   :  { %1940 = vmatpush1.bf16.msra.mxu1 %v3965_v28 }
 0xab1   :  { %1941 = vmatprep.subr.bf16.mxu1 %v3973_v36 }
 0xab4   :  { %1942 = vmatpush1.bf16.msra.mxu1 %v3971_v37 }
 0xab5   :  { %1943 = vmatprep.subr.bf16.mxu1 %v3979_v2 }
 0xab8   :  { %1944 = vmatpush1.bf16.msra.mxu1 %v3977_v6 }
 0xab9   :  { %1945 = vmatprep.subr.bf16.mxu1 %v3985_v44 }
 0xabc   :  { %1946 = vmatpush1.bf16.msra.mxu1 %v3983_v47 }
 0xabd   :  { %3663 = vmatprep.subr.bf16.mxu1 %v4483_v14 }
 0xb72   :  { %v3463_v50 = vpop.f32.mrb[20].mxu1 }
 0xb73   :  { %v3464_v52 = vpop.f32.mrb[21].mxu1 }
 0xb74   :  { %v3465_v53 = vadd.f32 %v3464_v52, %v3463_v50  ;;  %v3466_v54 = vpop.f32.mrb[22].mxu1 }
 0xb75   :  { %v3467_v55 = vpop.f32.mrb[23].mxu1 }
 0xb76   :  { %v1554_v56 = vadd.f32 %v3465_v53, %v3262_v51  ;;  %v3468_v57 = vadd.f32 %v3467_v55, %v3466_v54  ;;  %v3279_v54 = vld [vmem:[%s5218_s2] ss:$0 sm:$0xff] }
 0xb78   :  { %v1557_v58 = vadd.f32 %v3468_v57, %v3262_v51  ;;  %v1560_v59 = vadd.f32 %v1554_v56, %v4987_v33 }
 0xb7a   :  { %1564 = vadd.xlane.f32.xlu1 %v1560_v59  ;;  %v1561_v60 = vadd.f32 %v1557_v58, %v4989_v34 }
 0xb7c   :  { %1566 = vadd.xlane.f32.xlu0 %v1561_v60 }
 0xc07   :  { %v1565_v33 = vpop.xlane.xlu1 %1564 }
 0xc08   :  { %v1568_v8 = vmul.f32 0.0078125, %v1565_v33  ;;  %v3991_v33 = vld [vmem:[#allocation7 + $0x218] ss:$20 sps:$4 sm:$0xff]  }
 0xc09   :  { %v1567_v34 = vpop.xlane.xlu0 %1566 }
 0xc0a   :  { %v5005_v9 = vsub.f32 %v1560_v59, %v1568_v8  ;;  %v1569_v10 = vmul.f32 0.0078125, %v1567_v34  ;;  %v3280_v59 = vld [vmem:[#allocation13] ss:$0 sm:$0xff]  ;;  %v3993_v34 = vld [vmem:[#allocation7 + $0x268] ss:$20 sps:$4 sm:$0xff]  }
 0xc0b   :  { %v3992_v8 = vld [vmem:[#allocation7 + $0x240] ss:$20 sps:$4 sm:$0xff]  }
 0xc0c   :  { %v5007_v11 = vsub.f32 %v1561_v60, %v1569_v10  ;;  %v1572_v12 = vmul.f32 %v5005_v9, %v5005_v9 }
 0xc0e   :  { %1574 = vadd.xlane.f32.xlu1 %v1572_v12  ;;  %v1573_v13 = vmul.f32 %v5007_v11, %v5007_v11 }
 0xc10   :  { %1576 = vadd.xlane.f32.xlu0 %v1573_v13 }
 0xc9b   :  { %v1575_v27 = vpop.xlane.xlu1 %1574 }
 0xc9c   :  { %v1578_v48 = vmul.f32 0.0078125, %v1575_v27 }
 0xc9d   :  { %v1577_v49 = vpop.xlane.xlu0 %1576 }
 0xc9e   :  { %v1580_v50 = vadd.f32 1e-12, %v1578_v48  ;;  %v1579_v51 = vmul.f32 0.0078125, %v1577_v49 }
 0xca0   :  { %4098 = vrsqrt.f32 %v1580_v50  ;;  %v1581_v52 = vadd.f32 1e-12, %v1579_v51 }
 0xca2   :  { %4100 = vrsqrt.f32 %v1581_v52 }
 0xcaa   :  { %v4099_v53 = vpop.eup %4098 }
 0xcab   :  { %v1584_v55 = vmul.f32 %v4099_v53, %v5005_v9  ;;  %v3281_v9 = vld [vmem:[%s5216_s16 + $0x5] sm:$0x1f] }
 0xcac   :  { %v4101_v56 = vpop.eup %4100  ;;  %v1658_v10 = vrot.slane %v3281_v9, %v4907_v42  ;;  %v1662_v15 = vrot.slane %v3281_v9, %v4914_v45  ;;  %v1670_v16 = vrot.slane %v3281_v9, %v463_v46  ;;  %v1674_v2 = vrot.slane %v3281_v9, %v467_v7 }
 0xcad   :  { %v1585_v57 = vmul.f32 %v4101_v56, %v5007_v11  ;;  %v1592_v58 = vmul.f32 %v3279_v54, %v1584_v55  ;;  %v1666_v11 = vrot.slane %v3281_v9, %v459_v43 }
 0xcaf   :  { %v1593_v60 = vmul.f32 %v3279_v54, %v1585_v57  ;;  %v5020_v30 = vadd.f32 %v3280_v59, %v1592_v58 }
 0xcb1   :  { %v5022_v31 = vadd.f32 %v3280_v59, %v1593_v60 }
 0xcb3   :  { %v1602_v62 = vpack.c.bf16 %v5022_v31, %v5020_v30 }
 0xcb5   :  { %1921 = vmatmul.mubr.bf16.vlgmr.msra.gmra.mrb[16].mxu0 %v1602_v62  ;;  %1964 = vmatmul.mubr.bf16.vlgmr.msra.gmra.mrb[24].mxu1 %v1602_v62 }
 0xcb6   :  { %3644 = vmatpush3.bf16.msra.mxu0 %v3986_v61  ;;  %3659 = vmatprep.mubr.msk.bf16.mxu0 %vm4484_vm2, %v4483_v14 }
 0xcb7   :  { %3645 = vmatprep.subr.bf16.mxu0 %v4483_v14  ;;  %3665 = vmatprep.mubr.msk.bf16.mxu1 %vm4484_vm2, %v4483_v14 }
 0xcba   :  { %3646 = vmatpush3.bf16.msra.mxu0 %v3987_v1 }
 0xcbb   :  { %3647 = vmatprep.subr.bf16.mxu0 %v4483_v14 }
 0xcbe   :  { %3648 = vmatpush3.bf16.msra.mxu0 %v3988_v3 }
 0xcbf   :  { %3649 = vmatprep.subr.bf16.mxu0 %v4483_v14 }
 0xcc2   :  { %3650 = vmatpush3.bf16.msra.mxu0 %v3989_v4 }
 0xcc3   :  { %3651 = vmatprep.subr.bf16.mxu0 %v4483_v14 }
 0xcc6   :  { %3652 = vmatpush3.bf16.msra.mxu0 %v3990_v5 }
 0xcc7   :  { %3653 = vmatprep.subr.bf16.mxu0 %v4483_v14 }
 0xcca   :  { %3654 = vmatpush3.bf16.msra.mxu0 %v3991_v33 }
 0xccb   :  { %3655 = vmatprep.subr.bf16.mxu0 %v4483_v14 }
 0xcce   :  { %3656 = vmatpush3.bf16.msra.mxu0 %v3992_v8 }
 0xccf   :  { %3657 = vmatprep.subr.bf16.mxu0 %v4483_v14 }
 0xcd2   :  { %3658 = vmatpush3.bf16.msra.mxu0 %v3993_v34 }
 0xcd3   :  { %3675 = vmatprep.subr.bf16.mxu0 %v4483_v14 }
 0xcd5   :  { %3660 = vmatmul.mubr.bf16.vlgmr.msra.gmra.mrb[20].mxu0 %v1602_v62 }
 0xcd6   :  { %3677 = vmatprep.mubr.msk.bf16.mxu0 %vm4484_vm2, %v4483_v14 }
 0xd88   :  { %v1922_v12 = vpop.f32.mrb[16].mxu0  ;;  %v1965_v13 = vpop.f32.mrb[24].mxu1 }
 0xd89   :  { %v1924_v17 = vpop.f32.mrb[17].mxu0  ;;  %v1967_v18 = vpop.f32.mrb[25].mxu1  ;;  %v1923_v21 = vadd.f32 %v1922_v12, %v1658_v10  ;;  %v1966_v22 = vadd.f32 %v1965_v13, %v1666_v11 }
 0xd8a   :  { %v1926_v19 = vpop.f32.mrb[18].mxu0  ;;  %v1969_v20 = vpop.f32.mrb[26].mxu1  ;;  %v1925_v29 = vadd.f32 %v1924_v17, %v1662_v15  ;;  %v5049_v35 = vadd.f32 %v1967_v18, %v1670_v16 }
 0xd8b   :  { %v1927_v23 = vadd.f32 %v1926_v19, %v1658_v10  ;;  %v1970_v24 = vadd.f32 %v1969_v20, %v1666_v11  ;;  %v1928_v26 = vpop.f32.mrb[19].mxu0  ;;  %v1971_v28 = vpop.f32.mrb[27].mxu1 }
 0xd8c   :  { %v1929_v43 = vadd.f32 %v1928_v26, %v1662_v15  ;;  %v5051_v36 = vadd.f32 %v1971_v28, %v1670_v16  ;;  %v3994_v26 = vld [vmem:[#allocation8 + $0x40] sm:$0xff]   ;;  %v3995_v28 = vld [vmem:[#allocation8 + $0x48] sm:$0xff]  }
 0xd8d   :  { %v2015_v37 = vpack.c.bf16 %v1927_v23, %v1923_v21  ;;  %v2086_v38 = vpack.c.bf16 %v1970_v24, %v1966_v22 }
 0xd8e   :  { %v2016_v63 = vpack.c.bf16 %v1929_v43, %v1925_v29  ;;  %v2017_v46 = vpack.c.bf16 %v5051_v36, %v5049_v35  ;;  %v3996_v29 = vld [vmem:[#allocation8 + $0x50] sm:$0xff]   ;;  %v3997_v43 = vld [vmem:[#allocation8 + $0x58] sm:$0xff]  }
 0xd8f   :  { %v3325_v36 = vld [vmem:[%s5172_s9 + $0x1] ss:$0 sm:$0xff] }
 0xd90   :  { %3664 = vmatpush3.bf16.xpose.msra.mxu1 %v2016_v63  ;;  %v4000_v63 = vld [vmem:[#allocation8 + $0x70] sm:$0xff]  }
 0xd91   :  { %3669 = vmatprep.subr.bf16.mxu1 %v4483_v14 }
 0xd97   :  { %3666 = vmatmul.mubr.bf16.vlgmr.msra.gmra.mrb[28].mxu1 %v2015_v37 }
 0xd98   :  { %3670 = vmatpush3.bf16.xpose.msra.mxu1 %v2086_v38  ;;  %3671 = vmatprep.mubr.msk.bf16.mxu1 %vm4484_vm2, %v4483_v14  ;;  %v3999_v38 = vld [vmem:[#allocation8 + $0x68] sm:$0xff]  }
 0xd99   :  { %3687 = vmatprep.subr.bf16.mxu1 %v4483_v14 }
 0xd9f   :  { %3672 = vmatmul.mubr.bf16.vlgmr.msra.gmra.mrb[32].mxu1 %v2015_v37  ;;  %v3998_v37 = vld [vmem:[#allocation8 + $0x60] sm:$0xff]  }
 0xda0   :  { %3703 = vmatprep.mubr.msk.bf16.mxu1 %vm4484_vm2, %v4483_v14  ;;  %3688 = vmatpush3.bf16.msra.mxu1 %v3994_v26 }
 0xda1   :  { %3689 = vmatprep.subr.bf16.mxu1 %v4483_v14 }
 0xda4   :  { %3690 = vmatpush3.bf16.msra.mxu1 %v3995_v28 }
 0xda5   :  { %3691 = vmatprep.subr.bf16.mxu1 %v4483_v14 }
 0xda8   :  { %v2008_v6 = vpop.f32.mrb[20].mxu0  ;;  %3692 = vmatpush3.bf16.msra.mxu1 %v3996_v29 }
 0xda9   :  { %v3661_v39 = vpop.f32.mrb[21].mxu0  ;;  %v2009_v44 = vadd.f32 %v2008_v6, %v1674_v2  ;;  %3693 = vmatprep.subr.bf16.mxu1 %v4483_v14 }
 0xdaa   :  { %v2011_v40 = vpop.f32.mrb[22].mxu0 }
 0xdab   :  { %v2012_v47 = vadd.f32 %v2011_v40, %v1674_v2  ;;  %v3662_v27 = vpop.f32.mrb[23].mxu0 }
 0xdac   :  { %3694 = vmatpush3.bf16.msra.mxu1 %v3997_v43 }
 0xdad   :  { %v2087_v48 = vpack.c.bf16 %v2012_v47, %v2009_v44  ;;  %3695 = vmatprep.subr.bf16.mxu1 %v4483_v14 }
 0xdaf   :  { %3676 = vmatpush3.bf16.msra.mxu0 %v2087_v48 }
 0xdb0   :  { %3681 = vmatprep.subr.bf16.mxu0 %v4483_v14  ;;  %3696 = vmatpush3.bf16.msra.mxu1 %v3998_v37 }
 0xdb1   :  { %3697 = vmatprep.subr.bf16.mxu1 %v4483_v14 }
 0xdb4   :  { %3698 = vmatpush3.bf16.msra.mxu1 %v3999_v38 }
 0xdb5   :  { %3699 = vmatprep.subr.bf16.mxu1 %v4483_v14 }
 0xdb8   :  { %3700 = vmatpush3.bf16.msra.mxu1 %v4000_v63  ;;  %v3336_v63 = vld [vmem:[%s5173_s10 + $0x1] ss:$0 sm:$0xff] }
 0xdb9   :  { %3701 = vmatprep.subr.bf16.mxu1 %v4483_v14 }
 0xe6a   :  { %v2052_v49 = vpop.f32.mrb[28].mxu1 }
 0xe6b   :  { %v3667_v50 = vpop.f32.mrb[29].mxu1  ;;  %v2059_v54 = vmul.f32 0.125, %v2052_v49 }
 0xe6c   :  { %v2055_v51 = vpop.f32.mrb[30].mxu1 }
 0xe6d   :  { %v3668_v52 = vpop.f32.mrb[31].mxu1  ;;  %v2060_v7 = vmul.f32 0.125, %v2055_v51  ;;  %v2061_v62 = vadd.f32 %v2059_v54, %v4942_v25 }
 0xe6f   :  { %v2062_v3 = vadd.f32 %v2060_v7, %v4948_v32  ;;  %v2063_v4 = vsel %vm857_vm3, %v2061_v62, -inf }
 0xe71   :  { %v2066_v5 = vsel %vm857_vm3, %v2062_v3, -inf }
 0xe72   :  { %v2122_v53 = vpop.f32.mrb[32].mxu1 }
 0xe73   :  { %v2129_v55 = vmul.f32 0.125, %v2122_v53  ;;  %v3673_v56 = vpop.f32.mrb[33].mxu1 }
 0xe74   :  { %v2125_v41 = vpop.f32.mrb[34].mxu1 }
 0xe75   :  { %v2130_v57 = vmul.f32 0.125, %v2125_v41  ;;  %v3674_v58 = vpop.f32.mrb[35].mxu1  ;;  %v2131_v59 = vadd.f32 %v2129_v55, %v4942_v25  ;;  %v4001_v55 = vld [vmem:[#allocation8 + $0x78] sm:$0xff]  }
 0xe76   :  { %3702 = vmatpush3.bf16.msra.mxu1 %v4001_v55  ;;  %v4031_v55 = vld [vmem:[#allocation11 + $0x90] sm:$0xff]  }
 0xe77   :  { %v2133_v60 = vsel %vm857_vm3, %v2131_v59, -inf  ;;  %v2132_v61 = vadd.f32 %v2130_v57, %v4948_v32 }
 0xe78   :  { %2134 = vmax.xlane.f32.xlu1 %v2133_v60 }
 0xe79   :  { %v2136_v1 = vsel %vm857_vm3, %v2132_v61, -inf }
 0xe7a   :  { %2137 = vmax.xlane.f32.xlu0 %v2136_v1 }
 0xe7c   :  { %2064 = vmax.xlane.f32.xlu1 %v2063_v4  ;;  %v4004_v4 = vld [vmem:[#allocation10 + $0x84] ss:$8 sps:$4 sm:$0xff]  }
 0xe7e   :  { %2067 = vmax.xlane.f32.xlu0 %v2066_v5  ;;  %v4007_v5 = vld [vmem:[#allocation10 + $0x94] ss:$8 sps:$4 sm:$0xff]  }
 0xf05   :  { %v2135_v33 = vpop.xlane.xlu1 %2134 }
 0xf06   :  { %v2139_v8 = vsub.f32 %v2131_v59, %v2135_v33  ;;  %v4005_v33 = vld [vmem:[#allocation10 + $0x90] ss:$8 sps:$4 sm:$0xff]  }
 0xf07   :  { %v2138_v34 = vpop.xlane.xlu0 %2137 }
 0xf08   :  { %v2141_v9 = vmul.f32 1.442695, %v2139_v8  ;;  %v2140_v10 = vsub.f32 %v2132_v61, %v2138_v34 }
 0xf09   :  { %v2065_v11 = vpop.xlane.xlu1 %2064 }
 0xf0a   :  { %4102 = vpow2.f32 %v2141_v9  ;;  %v2143_v25 = vmul.f32 1.442695, %v2140_v10  ;;  %v2069_v12 = vsub.f32 %v2061_v62, %v2065_v11 }
 0xf0b   :  { %v2068_v13 = vpop.xlane.xlu0 %2067 }
 0xf0c   :  { %4104 = vpow2.f32 %v2143_v25  ;;  %v2071_v15 = vmul.f32 1.442695, %v2069_v12  ;;  %v2070_v32 = vsub.f32 %v2062_v3, %v2068_v13  ;;  %v4002_v3 = vld [vmem:[#allocation10 + $0x80] ss:$8 sps:$4 sm:$0xff]  }
 0xf0d   :  { %v4008_v13 = vld [vmem:[#allocation10 + $0xa0] ss:$8 sps:$4 sm:$0xff]  }
 0xf0e   :  { %4106 = vpow2.f32 %v2071_v15  ;;  %v2073_v16 = vmul.f32 1.442695, %v2070_v32  ;;  %v4013_v15 = vld [vmem:[#allocation10 + $0xb4] ss:$8 sps:$4 sm:$0xff]   ;;  %v4011_v32 = vld [vmem:[#allocation10 + $0xb0] ss:$8 sps:$4 sm:$0xff]  }
 0xf10   :  { %4108 = vpow2.f32 %v2073_v16  ;;  %v4016_v16 = vld [vmem:[#allocation10 + $0xc4] ss:$8 sps:$4 sm:$0xff]  }
 0xf14   :  { %v4103_v17 = vpop.eup %4102 }
 0xf15   :  { %v2145_v18 = vsel %vm857_vm3, %v4103_v17, 0.0 }
 0xf16   :  { %v4105_v19 = vpop.eup %4104  ;;  %2146 = vadd.xlane.f32.xlu1 %v2145_v18  ;;  %v4019_v18 = vld [vmem:[#allocation10 + $0xd4] ss:$8 sps:$4 sm:$0xff]  }
 0xf17   :  { %v2148_v20 = vsel %vm857_vm3, %v4105_v19, 0.0 }
 0xf18   :  { %v4107_v21 = vpop.eup %4106  ;;  %2149 = vadd.xlane.f32.xlu0 %v2148_v20  ;;  %v4022_v20 = vld [vmem:[#allocation10 + $0xe4] ss:$8 sps:$4 sm:$0xff]  }
 0xf19   :  { %v2075_v22 = vsel %vm857_vm3, %v4107_v21, 0.0 }
 0xf1a   :  { %v4109_v23 = vpop.eup %4108  ;;  %2076 = vadd.xlane.f32.xlu1 %v2075_v22  ;;  %v4025_v22 = vld [vmem:[#allocation10 + $0xf4] ss:$8 sps:$4 sm:$0xff]  }
 0xf1b   :  { %v2078_v24 = vsel %vm857_vm3, %v4109_v23, 0.0 }
 0xf1c   :  { %2079 = vadd.xlane.f32.xlu0 %v2078_v24 }
 0xfa3   :  { %v2147_v2 = vpop.xlane.xlu1 %2146 }
 0xfa4   :  { %4110 = vrcp.f32 %v2147_v2 }
 0xfa5   :  { %v2150_v6 = vpop.xlane.xlu0 %2149 }
 0xfa6   :  { %4112 = vrcp.f32 %v2150_v6 }
 0xfa7   :  { %v2077_v40 = vpop.xlane.xlu1 %2076 }
 0xfa9   :  { %v2080_v39 = vpop.xlane.xlu0 %2079 }
 0xfaa   :  { %4114 = vrcp.f32 %v2080_v39 }
 0xfab   :  { %4116 = vrcp.f32 %v2077_v40 }
 0xfae   :  { %v4111_v44 = vpop.eup %4110 }
 0xfaf   :  { %v2153_v27 = vmul.f32 %v4111_v44, %v4103_v17  ;;  %v4014_v17 = vld [vmem:[#allocation10 + $0xc0] ss:$8 sps:$4 sm:$0xff]   ;;  %v3337_v44 = vld [vmem:[%s5174_s11 + $0x1] ss:$0 sm:$0xff] }
 0xfb0   :  { %v4113_v47 = vpop.eup %4112 }
 0xfb1   :  { %v2154_v48 = vmul.f32 %v4113_v47, %v4105_v19  ;;  %v4017_v19 = vld [vmem:[#allocation10 + $0xd0] ss:$8 sps:$4 sm:$0xff]  }
 0xfb3   :  { %v2155_v49 = vpack.c.bf16 %v2154_v48, %v2153_v27 }
 0xfb4   :  { %v4115_v50 = vpop.eup %4114 }
 0xfb5   :  { %3678 = vmatmul.mubr.msk.bf16.vlgmr.msra.gmra.mrb[24].mxu0 %vm857_vm3, %v2155_v49  ;;  %v4117_v51 = vpop.eup %4116  ;;  %v2084_v52 = vmul.f32 %v4115_v50, %v4109_v23  ;;  %v4023_v23 = vld [vmem:[#allocation10 + $0xf0] ss:$8 sps:$4 sm:$0xff]   ;;  %v4026_v50 = vld [vmem:[#allocation11 + $0xc0] sm:$0xff]  }
 0xfb6   :  { %3682 = vmatpush3.bf16.msra.mxu0 %v2017_v46  ;;  %3683 = vmatprep.mubr.msk.bf16.mxu0 %vm4484_vm2, %v4483_v14  ;;  %v2083_v53 = vmul.f32 %v4117_v51, %v4107_v21  ;;  %v4020_v21 = vld [vmem:[#allocation10 + $0xe0] ss:$8 sps:$4 sm:$0xff]  }
 0xfb7   :  { %2514 = vmatprep.subr.bf16.mxu0 %v4004_v4  ;;  %v4027_v51 = vld [vmem:[#allocation11 + $0x80] sm:$0xff]   ;;  %3495 = vmatprep.subr.bf16.mxu1 %v4026_v50 }
 0xfb8   :  { %v2085_v54 = vpack.c.bf16 %v2084_v52, %v2083_v53  ;;  %v4028_v52 = vld [vmem:[#allocation11 + $0xc8] sm:$0xff]  }
 0xfb9   :  { %v4029_v53 = vld [vmem:[#allocation11 + $0x88] sm:$0xff]  }
 0xfc1   :  { %3684 = vmatmul.mubr.msk.bf16.vlgmr.msra.gmra.mrb[24].mxu0 %vm857_vm3, %v2085_v54  ;;  %v4030_v54 = vld [vmem:[#allocation11 + $0xd0] sm:$0xff]  }
 0xfc2   :  { %2546 = vmatprep.mubr.bf16.mxu0 %v4481_v0  ;;  %2515 = vmatpush1.bf16.msra.mxu0 %v4002_v3 }
 0xfc3   :  { %2516 = vmatprep.subr.bf16.mxu0 %v4007_v5 }
 0xfc6   :  { %2517 = vmatpush1.bf16.msra.mxu0 %v4005_v33 }
0x1094   :  { %v2237_v56 = vpop.f32.mrb[24].mxu0 }
0x1095   :  { %v3685_v41 = vpop.f32.mrb[25].mxu0 }
0x1096   :  { %v2240_v7 = vpop.f32.mrb[26].mxu0  ;;  %v4033_v41 = vld [vmem:[#allocation11 + $0x98] sm:$0xff]  }
0x1097   :  { %v2244_v57 = vpack.c.bf16 %v2240_v7, %v2237_v56  ;;  %v3686_v35 = vpop.f32.mrb[27].mxu0  ;;  %v4032_v56 = vld [vmem:[#allocation11 + $0xd8] sm:$0xff]   ;;  %v4034_v7 = vld [vmem:[#allocation11 + $0xe0] sm:$0xff]  }
0x1098   :  { %v4036_v35 = vld [vmem:[#allocation11 + $0xe8] sm:$0xff]  }
0x1099   :  { %3704 = vmatmul.mubr.bf16.vlgmr.msra.gmra.mrb[36].mxu1 %v2244_v57  ;;  %v4035_v57 = vld [vmem:[#allocation11 + $0xa0] sm:$0xff]  }
0x109a   :  { %3496 = vmatpush3.bf16.msra.mxu1 %v4027_v51 }
0x109b   :  { %3497 = vmatprep.subr.bf16.mxu1 %v4028_v52 }
0x109e   :  { %3498 = vmatpush3.bf16.msra.mxu1 %v4029_v53 }
0x109f   :  { %3499 = vmatprep.subr.bf16.mxu1 %v4030_v54 }
0x10a2   :  { %3500 = vmatpush3.bf16.msra.mxu1 %v4031_v55  ;;  %v3356_v55 = vld [vmem:[%s5178_s15 + $0x1] ss:$0 sm:$0xff] }
0x10a3   :  { %3501 = vmatprep.subr.bf16.mxu1 %v4032_v56 }
0x10a6   :  { %3502 = vmatpush3.bf16.msra.mxu1 %v4033_v41 }
0x10a7   :  { %3503 = vmatprep.subr.bf16.mxu1 %v4034_v7 }
0x10aa   :  { %3504 = vmatpush3.bf16.msra.mxu1 %v4035_v57 }
0x10ab   :  { %3505 = vmatprep.subr.bf16.mxu1 %v4036_v35 }
0x116c   :  { %v2352_v46 = vpop.f32.mrb[36].mxu1 }
0x116d   :  { %v2353_v58 = vadd.f32 %v3325_v36, %v2352_v46  ;;  %v3705_v59 = vpop.f32.mrb[37].mxu1  ;;  %v4038_v46 = vld [vmem:[#allocation11 + $0xf0] sm:$0xff]  }
0x116e   :  { %v2355_v60 = vpop.f32.mrb[38].mxu1  ;;  %v4040_v59 = vld [vmem:[#allocation11 + $0xf8] sm:$0xff]  }
0x116f   :  { %v2356_v61 = vadd.f32 %v3325_v36, %v2355_v60  ;;  %v3706_v62 = vpop.f32.mrb[39].mxu1  ;;  %v2359_v0 = vadd.f32 %v2353_v58, %v5020_v30  ;;  %v4037_v36 = vld [vmem:[#allocation11 + $0xa8] sm:$0xff]   ;;  %v4039_v58 = vld [vmem:[#allocation11 + $0xb0] sm:$0xff]   ;;  %v4041_v60 = vld [vmem:[#allocation11 + $0xb8] sm:$0xff]  }
0x1170   :  { %3506 = vmatpush3.bf16.msra.mxu1 %v4037_v36 }
0x1171   :  { %2365 = vadd.xlane.f32.xlu1 %v2359_v0  ;;  %v2360_v1 = vadd.f32 %v2356_v61, %v5022_v31  ;;  %v4010_v31 = vld [vmem:[#allocation10 + $0xa4] ss:$8 sps:$4 sm:$0xff]   ;;  %3507 = vmatprep.subr.bf16.mxu1 %v4038_v46  ;;  %v3338_v61 = vld [vmem:[%s5176_s13 + $0x2] sm:$0x3] }
0x1172   :  { %2518 = vmatprep.subr.bf16.mxu0 %v4010_v31  ;;  %v2427_v62 = vrot.slane %v3338_v61, %v4907_v42 }
0x1173   :  { %2367 = vadd.xlane.f32.xlu0 %v2360_v1  ;;  %2519 = vmatpush1.bf16.msra.mxu0 %v4008_v13 }
0x1174   :  { %2520 = vmatprep.subr.bf16.mxu0 %v4013_v15  ;;  %3508 = vmatpush3.bf16.msra.mxu1 %v4039_v58 }
0x1175   :  { %3509 = vmatprep.subr.bf16.mxu1 %v4040_v59 }
0x1177   :  { %2521 = vmatpush1.bf16.msra.mxu0 %v4011_v32 }
0x1178   :  { %2522 = vmatprep.subr.bf16.mxu0 %v4016_v16  ;;  %3510 = vmatpush3.bf16.msra.mxu1 %v4041_v60 }
0x1179   :  { %3727 = vmatprep.subr.bf16.mxu1 %v4483_v14 }
0x117b   :  { %2523 = vmatpush1.bf16.msra.mxu0 %v4014_v17 }
0x117c   :  { %2524 = vmatprep.subr.bf16.mxu0 %v4019_v18 }
0x117f   :  { %2525 = vmatpush1.bf16.msra.mxu0 %v4017_v19 }
0x1180   :  { %2526 = vmatprep.subr.bf16.mxu0 %v4022_v20 }
0x1183   :  { %2527 = vmatpush1.bf16.msra.mxu0 %v4020_v21 }
0x1184   :  { %2528 = vmatprep.subr.bf16.mxu0 %v4025_v22 }
0x1187   :  { %2529 = vmatpush1.bf16.msra.mxu0 %v4023_v23 }
0x1188   :  { %3707 = vmatprep.subr.bf16.mxu0 %v4483_v14 }
0x11fe   :  { %v2366_v8 = vpop.xlane.xlu1 %2365 }
0x11ff   :  { %v2369_v34 = vmul.f32 0.0078125, %v2366_v8 }
0x1200   :  { %v2368_v9 = vpop.xlane.xlu0 %2367 }
0x1201   :  { %v2371_v10 = vsub.f32 %v2359_v0, %v2369_v34  ;;  %v2370_v11 = vmul.f32 0.0078125, %v2368_v9  ;;  %v2431_v0 = vrot.slane %v3338_v61, %v4914_v45 }
0x1203   :  { %v2372_v25 = vsub.f32 %v2360_v1, %v2370_v11  ;;  %v2373_v12 = vmul.f32 %v2371_v10, %v2371_v10 }
0x1205   :  { %2375 = vadd.xlane.f32.xlu1 %v2373_v12  ;;  %v2374_v30 = vmul.f32 %v2372_v25, %v2372_v25 }
0x1207   :  { %2377 = vadd.xlane.f32.xlu0 %v2374_v30 }
0x1292   :  { %v2376_v24 = vpop.xlane.xlu1 %2375 }
0x1293   :  { %v2379_v26 = vmul.f32 0.0078125, %v2376_v24 }
0x1294   :  { %v2378_v28 = vpop.xlane.xlu0 %2377 }
0x1295   :  { %v2381_v29 = vadd.f32 1e-12, %v2379_v26  ;;  %v2380_v43 = vmul.f32 0.0078125, %v2378_v28 }
0x1297   :  { %4118 = vrsqrt.f32 %v2381_v29  ;;  %v2382_v37 = vadd.f32 1e-12, %v2380_v43 }
0x1299   :  { %4120 = vrsqrt.f32 %v2382_v37 }
0x12a1   :  { %v4119_v38 = vpop.eup %4118 }
0x12a2   :  { %v2385_v2 = vmul.f32 %v4119_v38, %v2371_v10 }
0x12a3   :  { %v4121_v6 = vpop.eup %4120 }
0x12a4   :  { %v2386_v39 = vmul.f32 %v4121_v6, %v2372_v25  ;;  %v2393_v40 = vmul.f32 %v3336_v63, %v2385_v2 }
0x12a6   :  { %v2394_v47 = vmul.f32 %v3336_v63, %v2386_v39  ;;  %v5103_v27 = vadd.f32 %v3337_v44, %v2393_v40 }
0x12a8   :  { %v5105_v48 = vadd.f32 %v3337_v44, %v2394_v47 }
0x12aa   :  { %v2403_v49 = vpack.c.bf16 %v5105_v48, %v5103_v27 }
0x12ac   :  { %2547 = vmatmul.mubr.bf16.vlgmr.msra.gmra.mrb[28].mxu0 %v2403_v49 }
0x12ad   :  { %3723 = vmatprep.mubr.msk.bf16.mxu0 %vm4484_vm2, %v4483_v14 }
0x137f   :  { %v2548_v1 = vpop.f32.mrb[28].mxu0 }
0x1380   :  { %v2549_v3 = vadd.f32 %v2548_v1, %v2427_v62  ;;  %v2550_v4 = vpop.f32.mrb[29].mxu0 }
0x1381   :  { %v2551_v5 = vadd.f32 %v2550_v4, %v2431_v0  ;;  %v2552_v33 = vpop.f32.mrb[30].mxu0 }
0x1382   :  { %v2561_v8 = vmul.f32 %v2549_v3, %v2549_v3  ;;  %v2553_v34 = vadd.f32 %v2552_v33, %v2427_v62  ;;  %v2554_v9 = vpop.f32.mrb[31].mxu0  ;;  %v2557_v63 = vmul.f32 0.5, %v2549_v3  ;;  %v4042_v33 = vld [vmem:[#allocation14] sm:$0xff]  }
0x1383   :  { %v2562_v10 = vmul.f32 %v2551_v5, %v2551_v5  ;;  %v2555_v11 = vadd.f32 %v2554_v9, %v2431_v0  ;;  %v2558_v39 = vmul.f32 0.5, %v2551_v5  ;;  %3708 = vmatpush3.bf16.msra.mxu0 %v4042_v33  ;;  %v4047_v9 = vld [vmem:[#allocation14 + $0x28] sm:$0xff]   ;;  %v3394_v33 = vld [vmem:[#allocation22] ss:$0 sm:$0xff] }
0x1384   :  { %v2565_v25 = vmul.f32 %v2561_v8, %v2549_v3  ;;  %v2563_v12 = vmul.f32 %v2553_v34, %v2553_v34  ;;  %v2559_v2 = vmul.f32 0.5, %v2553_v34  ;;  %3709 = vmatprep.subr.bf16.mxu0 %v4483_v14  ;;  %v4043_v8 = vld [vmem:[#allocation14 + $0x8] sm:$0xff]  }
0x1385   :  { %v2566_v30 = vmul.f32 %v2562_v10, %v2551_v5  ;;  %v2564_v31 = vmul.f32 %v2555_v11, %v2555_v11  ;;  %v2560_v40 = vmul.f32 0.5, %v2555_v11  ;;  %v4048_v10 = vld [vmem:[#allocation14 + $0x30] sm:$0xff]  }
0x1386   :  { %v2569_v13 = vmul.f32 0.044715, %v2565_v25  ;;  %v2567_v15 = vmul.f32 %v2563_v12, %v2553_v34  ;;  %v4050_v25 = vld [vmem:[#allocation17] sm:$0xff]   ;;  %v4051_v12 = vld [vmem:[#allocation17 + $0x8] sm:$0xff]  }
0x1387   :  { %v2570_v32 = vmul.f32 0.044715, %v2566_v30  ;;  %v2568_v42 = vmul.f32 %v2564_v31, %v2555_v11  ;;  %3710 = vmatpush3.bf16.msra.mxu0 %v4043_v8  ;;  %v4052_v30 = vld [vmem:[#allocation17 + $0x10] sm:$0xff]   ;;  %v4053_v31 = vld [vmem:[#allocation17 + $0x18] sm:$0xff]  }
0x1388   :  { %v2573_v16 = vadd.f32 %v2569_v13, %v2549_v3  ;;  %v2571_v45 = vmul.f32 0.044715, %v2567_v15  ;;  %3711 = vmatprep.subr.bf16.mxu0 %v4483_v14 }
0x1389   :  { %v2574_v17 = vadd.f32 %v2570_v32, %v2551_v5  ;;  %v2572_v18 = vmul.f32 0.044715, %v2568_v42 }
0x138a   :  { %v2577_v19 = vmul.f32 0.7978846, %v2573_v16  ;;  %v2575_v20 = vadd.f32 %v2571_v45, %v2553_v34  ;;  %v4046_v34 = vld [vmem:[#allocation14 + $0x20] sm:$0xff]  }
0x138b   :  { %v2578_v21 = vmul.f32 0.7978846, %v2574_v17  ;;  %v2576_v22 = vadd.f32 %v2572_v18, %v2555_v11  ;;  %v4049_v11 = vld [vmem:[#allocation14 + $0x38] sm:$0xff]  }
0x138c   :  { %4122 = vtanh.f32 %v2577_v19  ;;  %v2579_v23 = vmul.f32 0.7978846, %v2575_v20  ;;  %v3374_v18 = vld [vmem:[%s5218_s2 + $0x1] ss:$0 sm:$0xff] }
0x138d   :  { %4124 = vtanh.f32 %v2578_v21  ;;  %v2580_v24 = vmul.f32 0.7978846, %v2576_v22  ;;  %v3375_v21 = vld [vmem:[#allocation13 + $0x1] ss:$0 sm:$0xff] }
0x138e   :  { %4126 = vtanh.f32 %v2579_v23 }
0x138f   :  { %4128 = vtanh.f32 %v2580_v24 }
0x1396   :  { %v4123_v26 = vpop.eup %4122 }
0x1397   :  { %v4125_v28 = vpop.eup %4124  ;;  %v2585_v29 = vadd.f32 1.0, %v4123_v26 }
0x1398   :  { %v4127_v43 = vpop.eup %4126  ;;  %v2586_v37 = vadd.f32 1.0, %v4125_v28 }
0x1399   :  { %v4129_v38 = vpop.eup %4128  ;;  %v2587_v6 = vadd.f32 1.0, %v4127_v43  ;;  %v2589_v47 = vmul.f32 %v2585_v29, %v2557_v63 }
0x139a   :  { %v2588_v44 = vadd.f32 1.0, %v4129_v38  ;;  %v2590_v50 = vmul.f32 %v2586_v37, %v2558_v39  ;;  %v4054_v39 = vld [vmem:[#allocation17 + $0x20] sm:$0xff]  }
0x139b   :  { %v2591_v49 = vmul.f32 %v2587_v6, %v2559_v2 }
0x139c   :  { %v2592_v51 = vmul.f32 %v2588_v44, %v2560_v40  ;;  %v4055_v40 = vld [vmem:[#allocation17 + $0x28] sm:$0xff]   ;;  %v4056_v44 = vld [vmem:[#allocation17 + $0x30] sm:$0xff]  }
0x139d   :  { %v2593_v52 = vpack.c.bf16 %v2591_v49, %v2589_v47  ;;  %v4057_v47 = vld [vmem:[#allocation17 + $0x38] sm:$0xff]   ;;  %v4058_v49 = vld [vmem:[#allocation20] sm:$0xff]  }
0x139e   :  { %v2594_v53 = vpack.c.bf16 %v2592_v51, %v2590_v50  ;;  %v4059_v50 = vld [vmem:[#allocation20 + $0x8] sm:$0xff]   ;;  %v4060_v51 = vld [vmem:[#allocation20 + $0x10] sm:$0xff]  }
0x13a0   :  { %2764 = vmatprep.mubr.bf16.mxu1 %v2594_v53  ;;  %v4062_v53 = vld [vmem:[#allocation20 + $0x20] sm:$0xff]  }
0x13a1   :  { %2765 = vmatmul.mubr.bf16.vlgmr.msra.gmra.mrb[40].mxu1 %v2593_v52  ;;  %v4061_v52 = vld [vmem:[#allocation20 + $0x18] sm:$0xff]  }
0x13a2   :  { %3743 = vmatprep.mubr.msk.bf16.mxu1 %vm4484_vm2, %v4483_v14  ;;  %3728 = vmatpush3.bf16.msra.mxu1 %v4050_v25 }
0x13a3   :  { %3729 = vmatprep.subr.bf16.mxu1 %v4483_v14 }
0x13a6   :  { %3730 = vmatpush3.bf16.msra.mxu1 %v4051_v12 }
0x13a7   :  { %3731 = vmatprep.subr.bf16.mxu1 %v4483_v14 }
0x13aa   :  { %3732 = vmatpush3.bf16.msra.mxu1 %v4052_v30 }
0x13ab   :  { %3733 = vmatprep.subr.bf16.mxu1 %v4483_v14 }
0x13ae   :  { %3734 = vmatpush3.bf16.msra.mxu1 %v4053_v31 }
0x13af   :  { %3735 = vmatprep.subr.bf16.mxu1 %v4483_v14 }
0x13b2   :  { %3736 = vmatpush3.bf16.msra.mxu1 %v4054_v39 }
0x13b3   :  { %3737 = vmatprep.subr.bf16.mxu1 %v4483_v14 }
0x13b6   :  { %3738 = vmatpush3.bf16.msra.mxu1 %v4055_v40 }
0x13b7   :  { %3739 = vmatprep.subr.bf16.mxu1 %v4483_v14 }
0x13ba   :  { %3740 = vmatpush3.bf16.msra.mxu1 %v4056_v44 }
0x13bb   :  { %3741 = vmatprep.subr.bf16.mxu1 %v4483_v14 }
0x13be   :  { %3742 = vmatpush3.bf16.msra.mxu1 %v4057_v47 }
0x1474   :  { %v3511_v54 = vpop.f32.mrb[40].mxu1 }
0x1475   :  { %v3512_v56 = vpop.f32.mrb[41].mxu1 }
0x1476   :  { %v3513_v41 = vadd.f32 %v3512_v56, %v3511_v54  ;;  %v3514_v7 = vpop.f32.mrb[42].mxu1  ;;  %v4063_v54 = vld [vmem:[#allocation20 + $0x28] sm:$0xff]  }
0x1477   :  { %v3515_v57 = vpop.f32.mrb[43].mxu1 }
0x1478   :  { %v2767_v35 = vadd.f32 %v3513_v41, %v3356_v55  ;;  %v3516_v36 = vadd.f32 %v3515_v57, %v3514_v7 }
0x147a   :  { %v2770_v46 = vadd.f32 %v3516_v36, %v3356_v55  ;;  %v2773_v58 = vadd.f32 %v2767_v35, %v5103_v27  ;;  %v4044_v27 = vld [vmem:[#allocation14 + $0x10] sm:$0xff]   ;;  %v3376_v55 = vld [vmem:[#allocation16] ss:$0 sm:$0xff] }
0x147b   :  { %3712 = vmatpush3.bf16.msra.mxu0 %v4044_v27 }
0x147c   :  { %2779 = vadd.xlane.f32.xlu0 %v2773_v58  ;;  %v2774_v59 = vadd.f32 %v2770_v46, %v5105_v48  ;;  %3713 = vmatprep.subr.bf16.mxu0 %v4483_v14  ;;  %v4045_v48 = vld [vmem:[#allocation14 + $0x18] sm:$0xff]  }
0x147e   :  { %2781 = vadd.xlane.f32.xlu1 %v2774_v59 }
0x147f   :  { %3714 = vmatpush3.bf16.msra.mxu0 %v4045_v48 }
0x1480   :  { %3715 = vmatprep.subr.bf16.mxu0 %v4483_v14 }
0x1483   :  { %3716 = vmatpush3.bf16.msra.mxu0 %v4046_v34 }
0x1484   :  { %3717 = vmatprep.subr.bf16.mxu0 %v4483_v14 }
0x1487   :  { %3718 = vmatpush3.bf16.msra.mxu0 %v4047_v9 }
0x1488   :  { %3719 = vmatprep.subr.bf16.mxu0 %v4483_v14 }
0x148b   :  { %3720 = vmatpush3.bf16.msra.mxu0 %v4048_v10 }
0x148c   :  { %3721 = vmatprep.subr.bf16.mxu0 %v4483_v14 }
0x148f   :  { %3722 = vmatpush3.bf16.msra.mxu0 %v4049_v11 }
0x1490   :  { %3747 = vmatprep.subr.bf16.mxu0 %v4483_v14 }
0x1509   :  { %v2780_v60 = vpop.xlane.xlu0 %2779 }
0x150a   :  { %v2783_v61 = vmul.f32 0.0078125, %v2780_v60  ;;  %v3385_v60 = vld [vmem:[#allocation19] ss:$0 sm:$0xff] }
0x150b   :  { %v2782_v62 = vpop.xlane.xlu1 %2781 }
0x150c   :  { %v2785_v0 = vsub.f32 %v2773_v58, %v2783_v61  ;;  %v2784_v1 = vmul.f32 0.0078125, %v2782_v62  ;;  %v4064_v58 = vld [vmem:[#allocation20 + $0x30] sm:$0xff]  }
0x150e   :  { %v2786_v3 = vsub.f32 %v2774_v59, %v2784_v1  ;;  %v2787_v4 = vmul.f32 %v2785_v0, %v2785_v0  ;;  %v4065_v59 = vld [vmem:[#allocation20 + $0x38] sm:$0xff]  }
0x1510   :  { %2789 = vadd.xlane.f32.xlu0 %v2787_v4  ;;  %v2788_v5 = vmul.f32 %v2786_v3, %v2786_v3 }
0x1512   :  { %2791 = vadd.xlane.f32.xlu1 %v2788_v5 }
0x159d   :  { %v2790_v13 = vpop.xlane.xlu0 %2789 }
0x159e   :  { %v2793_v15 = vmul.f32 0.0078125, %v2790_v13 }
0x159f   :  { %v2792_v32 = vpop.xlane.xlu1 %2791 }
0x15a0   :  { %v2795_v42 = vadd.f32 1e-12, %v2793_v15  ;;  %v2794_v16 = vmul.f32 0.0078125, %v2792_v32 }
0x15a2   :  { %4130 = vrsqrt.f32 %v2795_v42  ;;  %v2796_v45 = vadd.f32 1e-12, %v2794_v16 }
0x15a4   :  { %4132 = vrsqrt.f32 %v2796_v45 }
0x15ac   :  { %v4131_v17 = vpop.eup %4130 }
0x15ad   :  { %v2799_v19 = vmul.f32 %v4131_v17, %v2785_v0 }
0x15ae   :  { %v4133_v20 = vpop.eup %4132 }
0x15af   :  { %v2807_v22 = vmul.f32 %v3374_v18, %v2799_v19  ;;  %v2800_v23 = vmul.f32 %v4133_v20, %v2786_v3 }
0x15b1   :  { %v2808_v24 = vmul.f32 %v3374_v18, %v2800_v23  ;;  %v2815_v26 = vadd.f32 %v3375_v21, %v2807_v22 }
0x15b3   :  { %v2816_v28 = vadd.f32 %v3375_v21, %v2808_v24  ;;  %v2817_v29 = vpack.c.bf16 %v2815_v26, %v2815_v26 }
0x15b5   :  { %v2818_v43 = vpack.c.bf16 %v2816_v28, %v2816_v28  ;;  %v2844_v38 = vunpack.c.l.b16 %v2817_v29 }
0x15b7   :  { %v2845_v37 = vunpack.c.l.b16 %v2818_v43 }
0x15b9   :  { %v2846_v63 = vrot.slane %v2845_v37, 7 }
0x15bb   :  { %v2848_v2 = vsel %vm2847_vm4, %v2846_v63, %v2844_v38 }
0x15bc   :  { %v2849_v6 = vpack.c.b16 %v2848_v2, %v2848_v2 }
0x15be   :  { %3724 = vmatmul.mubr.bf16.vlgmr.msra.gmra.mrb[32].mxu0 %v2849_v6 }
0x15bf   :  { %3763 = vmatprep.mubr.msk.bf16.mxu0 %vm4484_vm2, %v4483_v14  ;;  %3748 = vmatpush3.bf16.msra.mxu0 %v4058_v49 }
0x15c0   :  { %3749 = vmatprep.subr.bf16.mxu0 %v4483_v14 }
0x15c3   :  { %3750 = vmatpush3.bf16.msra.mxu0 %v4059_v50 }
0x15c4   :  { %3751 = vmatprep.subr.bf16.mxu0 %v4483_v14 }
0x15c7   :  { %3752 = vmatpush3.bf16.msra.mxu0 %v4060_v51 }
0x15c8   :  { %3753 = vmatprep.subr.bf16.mxu0 %v4483_v14 }
0x15cb   :  { %3754 = vmatpush3.bf16.msra.mxu0 %v4061_v52 }
0x15cc   :  { %3755 = vmatprep.subr.bf16.mxu0 %v4483_v14 }
0x15cf   :  { %3756 = vmatpush3.bf16.msra.mxu0 %v4062_v53 }
0x15d0   :  { %3757 = vmatprep.subr.bf16.mxu0 %v4483_v14 }
0x15d3   :  { %3758 = vmatpush3.bf16.msra.mxu0 %v4063_v54 }
0x15d4   :  { %3759 = vmatprep.subr.bf16.mxu0 %v4483_v14 }
0x15d7   :  { %3760 = vmatpush3.bf16.msra.mxu0 %v4064_v58 }
0x15d8   :  { %3761 = vmatprep.subr.bf16.mxu0 %v4483_v14 }
0x15db   :  { %3762 = vmatpush3.bf16.msra.mxu0 %v4065_v59 }
0x1691   :  { %v2933_v56 = vpop.f32.mrb[32].mxu0 }
0x1692   :  { %v2934_v41 = vadd.f32 %v3376_v55, %v2933_v56  ;;  %v3725_v7 = vpop.f32.mrb[33].mxu0 }
0x1693   :  { %v2936_v57 = vpop.f32.mrb[34].mxu0 }
0x1694   :  { %4134 = vtanh.f32 %v2934_v41  ;;  %v3726_v35 = vpop.f32.mrb[35].mxu0 }
0x169e   :  { %v4135_v36 = vpop.eup %4134 }
0x169f   :  { %v2940_v46 = vpack.c.bf16 %v4135_v36, %v4135_v36 }
0x16a1   :  { %3744 = vmatmul.mubr.bf16.vlgmr.msra.gmra.mrb[44].mxu1 %v2940_v46 }
0x1774   :  { %v3046_v61 = vpop.f32.mrb[44].mxu1 }
0x1775   :  { %v3047_v62 = vadd.f32 %v3385_v60, %v3046_v61  ;;  %v3745_v0 = vpop.f32.mrb[45].mxu1 }
0x1776   :  { %v3049_v1 = vpop.f32.mrb[46].mxu1 }
0x1777   :  { %v3052_v3 = vmax.f32 %v3047_v62, 0.0  ;;  %v3746_v4 = vpop.f32.mrb[47].mxu1 }
0x1779   :  { %v3053_v5 = vpack.c.bf16 %v3052_v3, %v3052_v3 }
0x177b   :  { %3764 = vmatmul.mubr.bf16.vlgmr.msra.gmra.mrb[36].mxu0 %v3053_v5 }
0x184e   :  { %v3159_v8 = vpop.f32.mrb[36].mxu0 }
0x184f   :  { %v3160_v27 = vadd.f32 %v3394_v33, %v3159_v8  ;;  %v3765_v48 = vpop.f32.mrb[37].mxu0 }
0x1850   :  { %v3162_v34 = vpop.f32.mrb[38].mxu0 }
0x1851   :  { %3165 = vst [vmem:[#allocation23] sm:$0x3] %v3160_v27  ;;  %v3766_v14 = vpop.f32.mrb[39].mxu0 }
0x1852   :  { %4433 = shalt.err (!%p4430_p10)
}
0x1853   :  { %s5219_s20 = sld [smem:[#allocation42_spill]] }
0x1859   :  { %s4434_s0 = scalar_lea.hbm %s5219_s20, 32 }
0x185a   :  { %p4435_p11 = scmp.ne.s32.totalorder %s5219_s20, %s4434_s0  ;;  %p4438_p12 = scmp.lt.u32.totalorder %s4434_s0, %s5219_s20 }
0x185c   :  { %p4440_p13 = pnand %p4438_p12, %p4435_p11 }
0x185e   :  { %4443 = shalt.err (!%p4440_p13)
}
0x185f   :  { %3175 = dma.vmem_to_hbm [thread:$0]  %s3173_s24, 32, %s5219_s20, [#allocation4]  }
0x1860   :  { %4458 = dma.done.wait [#allocation4], 32  }
0x1861   :  { %4459 = vsyncadd [#allocation4], 4294967264 }
0x1862   :  { %3179 = vsyncpa [#allocation3], 1 }
0x1863   :  { %3180 = vsyncpa [#allocation6], 1 }
0x1864   :  { %3181 = vsyncpa [#allocation9], 1 }
0x1865   :  { %3182 = vsyncpa [#allocation12], 1 }
0x1866   :  { %3183 = vsyncpa [#allocation15], 1 }
0x1867   :  { %3184 = vsyncpa [#allocation18], 1 }
0x1868   :  { %3185 = vsyncpa [#allocation21], 1 }
0x1869   :  { %3186 = vsyncpa [#allocation4], 1 }

</bundles_post_ra>
